<compile_context>
chip_gen: v6e
topology: v6e:2x2x1
jax: 0.10.0
libtpu: 0.0.40
codegen_flags: <defaults>
</compile_context>

<pallas_src>
import functools

import jax
import jax.numpy as jnp
from jax.experimental import pallas as pl
from jax.experimental.pallas import tpu as pltpu

LANE = 128  # TPU lane width — channel padding target for lane-dense matmuls/stores.


def get_same_padding(kernel_size: int) -> int:
    assert kernel_size % 2 == 1, "only odd kernel sizes supported"
    return kernel_size // 2


def _round_up(x: int, m: int) -> int:
    return ((x + m - 1) // m) * m


def _apply_act(x, name):
    if name is None:
        return x
    if name == "relu":
        return jnp.maximum(x, 0.0)
    if name == "relu6":
        return jnp.clip(x, 0.0, 6.0)
    if name == "hswish":
        return x * jnp.clip(x + 3.0, 0.0, 6.0) * (1.0 / 6.0)
    raise NotImplementedError(f"act={name}")


def _fold_conv_bn(weight, bias, bn, cin_pad: int, cout_pad: int):
    """Fold conv bias + eval-mode BN into the weight (scale) and a shift vector.

    weight: (Cout, Cin, K, K) OIHW (torch layout).
    Returns:
      w:     (K*K, cin_pad, cout_pad) bf16, BN scale folded in, zero-padded channels.
      shift: (1, cout_pad) f32.
    """
    Cout, Cin, K, _ = weight.shape
    scale = jnp.ones((Cout,), jnp.float32)
    shift = jnp.zeros((Cout,), jnp.float32)
    if bias is not None:
        shift = shift + bias.astype(jnp.float32)
    if bn is not None:
        gamma, beta, mean, var, eps = bn
        s = gamma.astype(jnp.float32) / jnp.sqrt(var.astype(jnp.float32) + eps)
        scale = scale * s
        shift = (shift - mean.astype(jnp.float32)) * s + beta.astype(jnp.float32)
    # (O, I, KH, KW) -> (KH, KW, I, O) -> (K*K, I, O), scale folded per output channel.
    w = weight.astype(jnp.float32).transpose(2, 3, 1, 0).reshape(K * K, Cin, Cout)
    w = w * scale[None, None, :]
    w = jnp.pad(w, ((0, 0), (0, cin_pad - Cin), (0, cout_pad - Cout)))
    shift = jnp.pad(shift, (0, cout_pad - Cout)).reshape(1, cout_pad)
    return w.astype(jnp.bfloat16), shift


def _resblock_kernel(x_ref, w1_ref, b1_ref, w2_ref, b2_ref, o_ref, mid_ref,
                     *, K, pad, H, W, act1, act2):
    # x_ref : (Hp, Wp, Cin)          bf16  spatially pre-padded NHWC image (one batch el.)
    # w1_ref: (K*K, Cin,   Cmid_p)   bf16  BN1 scale folded in
    # b1_ref: (1, Cmid_p)            f32   BN1 shift
    # w2_ref: (K*K, Cmid_p, Cout_p)  bf16  BN2 scale folded in
    # b2_ref: (1, Cout_p)            f32   BN2 shift
    # o_ref : (H, W, Cout_p)         f32
    # mid_ref: (Hp, Wp, Cmid_p)      f32   VMEM scratch: conv1 output re-padded for conv2
    Cmid_p = w1_ref.shape[-1]
    Cout_p = w2_ref.shape[-1]
    HW = H * W

    # ---- conv1 + folded BN1 + act1: shifted-window accumulation on the MXU ----------
    acc1 = jnp.zeros((HW, Cmid_p), jnp.float32)
    for kh in range(K):
        for kw in range(K):
            win = x_ref[kh:kh + H, kw:kw + W, :]                       # (H, W, Cin) bf16
            acc1 = acc1 + jnp.dot(win.reshape(HW, win.shape[-1]),
                                  w1_ref[kh * K + kw],
                                  preferred_element_type=jnp.float32)
    acc1 = _apply_act(acc1 + b1_ref[...], act1)

    # Re-pad conv1's output inside VMEM ("same" padding for conv2); the intermediate
    # activation never touches HBM. Halo stays zero, interior fully rewritten.
    mid_ref[...] = jnp.zeros_like(mid_ref)
    mid_ref[pad:pad + H, pad:pad + W, :] = acc1.reshape(H, W, Cmid_p)

    # ---- conv2 + folded BN2 + act2 ---------------------------------------------------
    acc2 = jnp.zeros((HW, Cout_p), jnp.float32)
    for kh in range(K):
        for kw in range(K):
            win = mid_ref[kh:kh + H, kw:kw + W, :].astype(jnp.bfloat16)  # (H, W, Cmid_p)
            acc2 = acc2 + jnp.dot(win.reshape(HW, Cmid_p),
                                  w2_ref[kh * K + kw],
                                  preferred_element_type=jnp.float32)
    acc2 = _apply_act(acc2 + b2_ref[...], act2)
    o_ref[...] = acc2.reshape(H, W, Cout_p).astype(o_ref.dtype)


def resblock_forward(x, w1, bn1, w2, bn2, *, bias1=None, bias2=None,
                     act1="relu6", act2=None, stride=1, dilation=1):
    """ResBlock forward (conv1 -> BN -> relu6 -> conv2 -> BN), eval-mode BN.

    x: (N, Cin, H, W) NCHW (torch layout); returns (N, Cout, H, W).
    """
    assert stride == 1 and dilation == 1, "fused kernel supports stride=dilation=1"
    N, Cin, H, W = x.shape
    Cmid, _, K, _ = w1.shape
    Cout = w2.shape[0]
    pad = get_same_padding(K) * dilation
    Hp, Wp = H + 2 * pad, W + 2 * pad

    Cmid_p = _round_up(Cmid, LANE)
    Cout_p = _round_up(Cout, LANE)

    # Fold BN scale into bf16 weights; keep only a per-channel shift for the kernel.
    w1_k, b1 = _fold_conv_bn(w1, bias1, bn1, Cin, Cmid_p)
    w2_k, b2 = _fold_conv_bn(w2, bias2, bn2, Cmid_p, Cout_p)

    # Boundary glue (one pass): NCHW -> NHWC, zero spatial "same" padding, bf16 for MXU.
    x_nhwc = jnp.transpose(x, (0, 2, 3, 1))
    xp = jnp.pad(x_nhwc, ((0, 0), (pad, pad), (pad, pad), (0, 0))).astype(jnp.bfloat16)

    flops = 2 * N * H * W * K * K * (Cin * Cmid_p + Cmid_p * Cout_p)
    bytes_accessed = (N * Hp * Wp * Cin * 2
                      + K * K * Cin * Cmid_p * 2 + K * K * Cmid_p * Cout_p * 2
                      + 4 * (Cmid_p + Cout_p)
                      + N * H * W * Cout_p * 4)

    out = pl.pallas_call(
        functools.partial(_resblock_kernel, K=K, pad=pad, H=H, W=W,
                          act1=act1, act2=act2),
        out_shape=jax.ShapeDtypeStruct((N, H, W, Cout_p), jnp.float32),
        grid=(N,),
        in_specs=[
            pl.BlockSpec((None, Hp, Wp, Cin), lambda n: (n, 0, 0, 0)),       # image
            pl.BlockSpec((K * K, Cin, Cmid_p), lambda n: (0, 0, 0)),          # w1 (resident)
            pl.BlockSpec((1, Cmid_p), lambda n: (0, 0)),                      # shift1
            pl.BlockSpec((K * K, Cmid_p, Cout_p), lambda n: (0, 0, 0)),       # w2 (resident)
            pl.BlockSpec((1, Cout_p), lambda n: (0, 0)),                      # shift2
        ],
        out_specs=pl.BlockSpec((None, H, W, Cout_p), lambda n: (n, 0, 0, 0)),
        scratch_shapes=[pltpu.VMEM((Hp, Wp, Cmid_p), jnp.float32)],           # conv1 out, padded
        compiler_params=pltpu.CompilerParams(
            dimension_semantics=("parallel",),          # 2 TCs on v7x; no-op on v5e/v6e
            vmem_limit_bytes=32 * 1024 * 1024),
        cost_estimate=pl.CostEstimate(flops=flops, transcendentals=0,
                                      bytes_accessed=bytes_accessed),
    )(xp, w1_k, b1, w2_k, b2)

    # Slice off the lane padding and return to NCHW at the module boundary only.
    return jnp.transpose(out[..., :Cout], (0, 3, 1, 2))


# ------------------------------ pure-JAX reference ------------------------------------
def _ref_convlayer(x, w, bias, bn, act, stride=1, dilation=1):
    pad = get_same_padding(w.shape[2]) * dilation
    y = jax.lax.conv_general_dilated(
        x, w, window_strides=(stride, stride),
        padding=((pad, pad), (pad, pad)), rhs_dilation=(dilation, dilation),
        dimension_numbers=("NCHW", "OIHW", "NCHW"))
    C = w.shape[0]
    if bias is not None:
        y = y + bias.reshape(1, C, 1, 1)
    if bn is not None:
        gamma, beta, mean, var, eps = bn
        s = gamma / jnp.sqrt(var + eps)
        y = (y - mean.reshape(1, C, 1, 1)) * s.reshape(1, C, 1, 1) + beta.reshape(1, C, 1, 1)
    return _apply_act(y, act)


if __name__ == "__main__":
    # ResBlock(in_channels=4, out_channels=8, kernel_size=3, stride=1, mid_channels=8,
    #          use_bias=False, norm=('bn2d','bn2d'), act=('relu6', None))  -- eval mode
    N, Cin, H, W = 2, 4, 16, 16
    Cmid, Cout, K = 8, 8, 3

    keys = jax.random.split(jax.random.PRNGKey(0), 12)
    x = jax.random.normal(keys[0], (N, Cin, H, W), jnp.float32)
    w1 = jax.random.normal(keys[1], (Cmid, Cin, K, K), jnp.float32) * 0.1
    w2 = jax.random.normal(keys[2], (Cout, Cmid, K, K), jnp.float32) * 0.1
    bn1 = (1.0 + 0.1 * jax.random.normal(keys[3], (Cmid,), jnp.float32),
           0.1 * jax.random.normal(keys[4], (Cmid,), jnp.float32),
           0.1 * jax.random.normal(keys[5], (Cmid,), jnp.float32),
           1.0 + 0.5 * jax.random.uniform(keys[6], (Cmid,), jnp.float32),
           1e-5)
    bn2 = (1.0 + 0.1 * jax.random.normal(keys[7], (Cout,), jnp.float32),
           0.1 * jax.random.normal(keys[8], (Cout,), jnp.float32),
           0.1 * jax.random.normal(keys[9], (Cout,), jnp.float32),
           1.0 + 0.5 * jax.random.uniform(keys[10], (Cout,), jnp.float32),
           1e-5)

    out = jax.jit(resblock_forward)(x, w1, bn1, w2, bn2)
    out = jax.block_until_ready(out)
    assert out.shape == (N, Cout, H, W), out.shape

    ref = _ref_convlayer(_ref_convlayer(x, w1, None, bn1, "relu6"), w2, None, bn2, None)
    max_err = float(jnp.max(jnp.abs(out - ref)))
    # bf16 matmul operands with f32 accumulation -> ~1e-2 scale error budget.
    assert jnp.allclose(out, ref, atol=5e-2, rtol=5e-2), max_err

    print("KERNEL_OK")
</pallas_src>

<mosaic_0001>
module attributes {stable_mosaic.version = 11 : i64} {
  func.func @_resblock_kernel(%arg0: i32, %arg1: memref<1x18x18x4xbf16, #tpu.memory_space<vmem>>, %arg2: memref<9x4x128xbf16, #tpu.memory_space<vmem>>, %arg3: memref<1x128xf32, #tpu.memory_space<vmem>>, %arg4: memref<9x128x128xbf16, #tpu.memory_space<vmem>>, %arg5: memref<1x128xf32, #tpu.memory_space<vmem>>, %arg6: memref<1x16x16x128xf32, #tpu.memory_space<vmem>>, %arg7: memref<18x18x128xf32, #tpu.memory_space<vmem>>) attributes {dimension_semantics = [#tpu.dimension_semantics<parallel>], iteration_bounds = array<i64: 2>, scalar_prefetch = 0 : i64, scratch_operands = 1 : i64, tpu.core_type = #tpu.core_type<tc>, window_params = [{transform_indices = @transform_0, window_bounds = array<i64: 1, 18, 18, 4>}, {pipeline_mode = #tpu.pipeline_mode<synchronous>, transform_indices = @transform_1, window_bounds = array<i64: 9, 4, 128>}, {pipeline_mode = #tpu.pipeline_mode<synchronous>, transform_indices = @transform_2, window_bounds = array<i64: 1, 128>}, {pipeline_mode = #tpu.pipeline_mode<synchronous>, transform_indices = @transform_3, window_bounds = array<i64: 9, 128, 128>}, {pipeline_mode = #tpu.pipeline_mode<synchronous>, transform_indices = @transform_4, window_bounds = array<i64: 1, 128>}, {transform_indices = @transform_5, window_bounds = array<i64: 1, 16, 16, 128>}]} {
    %cst = arith.constant 0.000000e+00 : f32
    %0 = vector.broadcast %cst : f32 to vector<256x128xf32>
    %c0 = arith.constant 0 : index
    %c0_0 = arith.constant 0 : index
    %c0_1 = arith.constant 0 : index
    %c0_2 = arith.constant 0 : index
    %1 = vector.load %arg1[%c0, %c0_0, %c0_1, %c0_2] : memref<1x18x18x4xbf16, #tpu.memory_space<vmem>>, vector<1x16x16x4xbf16>
    %2 = vector.shape_cast %1 : vector<1x16x16x4xbf16> to vector<16x16x4xbf16>
    %3 = vector.shape_cast %2 : vector<16x16x4xbf16> to vector<256x4xbf16>
    %c0_3 = arith.constant 0 : index
    %c0_4 = arith.constant 0 : index
    %c0_5 = arith.constant 0 : index
    %4 = vector.load %arg2[%c0_3, %c0_4, %c0_5] : memref<9x4x128xbf16, #tpu.memory_space<vmem>>, vector<1x4x128xbf16>
    %5 = vector.shape_cast %4 : vector<1x4x128xbf16> to vector<4x128xbf16>
    %cst_6 = arith.constant dense<0.000000e+00> : vector<256x128xf32>
    %6 = tpu.matmul %3, %5, %cst_6 {dimension_numbers = #tpu.dot_dimension_numbers<[1], [0], [0], [1], [0, 0, 1, 1], [], []>} : vector<256x4xbf16>, vector<4x128xbf16>, vector<256x128xf32> -> vector<256x128xf32>
    %7 = arith.addf %0, %6 : vector<256x128xf32>
    %c0_7 = arith.constant 0 : index
    %c0_8 = arith.constant 0 : index
    %c1 = arith.constant 1 : index
    %c0_9 = arith.constant 0 : index
    %8 = vector.load %arg1[%c0_7, %c0_8, %c1, %c0_9] : memref<1x18x18x4xbf16, #tpu.memory_space<vmem>>, vector<1x16x16x4xbf16>
    %9 = vector.shape_cast %8 : vector<1x16x16x4xbf16> to vector<16x16x4xbf16>
    %10 = vector.shape_cast %9 : vector<16x16x4xbf16> to vector<256x4xbf16>
    %c1_10 = arith.constant 1 : index
    %c0_11 = arith.constant 0 : index
    %c0_12 = arith.constant 0 : index
    %11 = vector.load %arg2[%c1_10, %c0_11, %c0_12] : memref<9x4x128xbf16, #tpu.memory_space<vmem>>, vector<1x4x128xbf16>
    %12 = vector.shape_cast %11 : vector<1x4x128xbf16> to vector<4x128xbf16>
    %cst_13 = arith.constant dense<0.000000e+00> : vector<256x128xf32>
    %13 = tpu.matmul %10, %12, %cst_13 {dimension_numbers = #tpu.dot_dimension_numbers<[1], [0], [0], [1], [0, 0, 1, 1], [], []>} : vector<256x4xbf16>, vector<4x128xbf16>, vector<256x128xf32> -> vector<256x128xf32>
    %14 = arith.addf %7, %13 : vector<256x128xf32>
    %c0_14 = arith.constant 0 : index
    %c0_15 = arith.constant 0 : index
    %c2 = arith.constant 2 : index
    %c0_16 = arith.constant 0 : index
    %15 = vector.load %arg1[%c0_14, %c0_15, %c2, %c0_16] : memref<1x18x18x4xbf16, #tpu.memory_space<vmem>>, vector<1x16x16x4xbf16>
    %16 = vector.shape_cast %15 : vector<1x16x16x4xbf16> to vector<16x16x4xbf16>
    %17 = vector.shape_cast %16 : vector<16x16x4xbf16> to vector<256x4xbf16>
    %c2_17 = arith.constant 2 : index
    %c0_18 = arith.constant 0 : index
    %c0_19 = arith.constant 0 : index
    %18 = vector.load %arg2[%c2_17, %c0_18, %c0_19] : memref<9x4x128xbf16, #tpu.memory_space<vmem>>, vector<1x4x128xbf16>
    %19 = vector.shape_cast %18 : vector<1x4x128xbf16> to vector<4x128xbf16>
    %cst_20 = arith.constant dense<0.000000e+00> : vector<256x128xf32>
    %20 = tpu.matmul %17, %19, %cst_20 {dimension_numbers = #tpu.dot_dimension_numbers<[1], [0], [0], [1], [0, 0, 1, 1], [], []>} : vector<256x4xbf16>, vector<4x128xbf16>, vector<256x128xf32> -> vector<256x128xf32>
    %21 = arith.addf %14, %20 : vector<256x128xf32>
    %c0_21 = arith.constant 0 : index
    %c1_22 = arith.constant 1 : index
    %c0_23 = arith.constant 0 : index
    %c0_24 = arith.constant 0 : index
    %22 = vector.load %arg1[%c0_21, %c1_22, %c0_23, %c0_24] : memref<1x18x18x4xbf16, #tpu.memory_space<vmem>>, vector<1x16x16x4xbf16>
    %23 = vector.shape_cast %22 : vector<1x16x16x4xbf16> to vector<16x16x4xbf16>
    %24 = vector.shape_cast %23 : vector<16x16x4xbf16> to vector<256x4xbf16>
    %c3 = arith.constant 3 : index
    %c0_25 = arith.constant 0 : index
    %c0_26 = arith.constant 0 : index
    %25 = vector.load %arg2[%c3, %c0_25, %c0_26] : memref<9x4x128xbf16, #tpu.memory_space<vmem>>, vector<1x4x128xbf16>
    %26 = vector.shape_cast %25 : vector<1x4x128xbf16> to vector<4x128xbf16>
    %cst_27 = arith.constant dense<0.000000e+00> : vector<256x128xf32>
    %27 = tpu.matmul %24, %26, %cst_27 {dimension_numbers = #tpu.dot_dimension_numbers<[1], [0], [0], [1], [0, 0, 1, 1], [], []>} : vector<256x4xbf16>, vector<4x128xbf16>, vector<256x128xf32> -> vector<256x128xf32>
    %28 = arith.addf %21, %27 : vector<256x128xf32>
    %c0_28 = arith.constant 0 : index
    %c1_29 = arith.constant 1 : index
    %c1_30 = arith.constant 1 : index
    %c0_31 = arith.constant 0 : index
    %29 = vector.load %arg1[%c0_28, %c1_29, %c1_30, %c0_31] : memref<1x18x18x4xbf16, #tpu.memory_space<vmem>>, vector<1x16x16x4xbf16>
    %30 = vector.shape_cast %29 : vector<1x16x16x4xbf16> to vector<16x16x4xbf16>
    %31 = vector.shape_cast %30 : vector<16x16x4xbf16> to vector<256x4xbf16>
    %c4 = arith.constant 4 : index
    %c0_32 = arith.constant 0 : index
    %c0_33 = arith.constant 0 : index
    %32 = vector.load %arg2[%c4, %c0_32, %c0_33] : memref<9x4x128xbf16, #tpu.memory_space<vmem>>, vector<1x4x128xbf16>
    %33 = vector.shape_cast %32 : vector<1x4x128xbf16> to vector<4x128xbf16>
    %cst_34 = arith.constant dense<0.000000e+00> : vector<256x128xf32>
    %34 = tpu.matmul %31, %33, %cst_34 {dimension_numbers = #tpu.dot_dimension_numbers<[1], [0], [0], [1], [0, 0, 1, 1], [], []>} : vector<256x4xbf16>, vector<4x128xbf16>, vector<256x128xf32> -> vector<256x128xf32>
    %35 = arith.addf %28, %34 : vector<256x128xf32>
    %c0_35 = arith.constant 0 : index
    %c1_36 = arith.constant 1 : index
    %c2_37 = arith.constant 2 : index
    %c0_38 = arith.constant 0 : index
    %36 = vector.load %arg1[%c0_35, %c1_36, %c2_37, %c0_38] : memref<1x18x18x4xbf16, #tpu.memory_space<vmem>>, vector<1x16x16x4xbf16>
    %37 = vector.shape_cast %36 : vector<1x16x16x4xbf16> to vector<16x16x4xbf16>
    %38 = vector.shape_cast %37 : vector<16x16x4xbf16> to vector<256x4xbf16>
    %c5 = arith.constant 5 : index
    %c0_39 = arith.constant 0 : index
    %c0_40 = arith.constant 0 : index
    %39 = vector.load %arg2[%c5, %c0_39, %c0_40] : memref<9x4x128xbf16, #tpu.memory_space<vmem>>, vector<1x4x128xbf16>
    %40 = vector.shape_cast %39 : vector<1x4x128xbf16> to vector<4x128xbf16>
    %cst_41 = arith.constant dense<0.000000e+00> : vector<256x128xf32>
    %41 = tpu.matmul %38, %40, %cst_41 {dimension_numbers = #tpu.dot_dimension_numbers<[1], [0], [0], [1], [0, 0, 1, 1], [], []>} : vector<256x4xbf16>, vector<4x128xbf16>, vector<256x128xf32> -> vector<256x128xf32>
    %42 = arith.addf %35, %41 : vector<256x128xf32>
    %c0_42 = arith.constant 0 : index
    %c2_43 = arith.constant 2 : index
    %c0_44 = arith.constant 0 : index
    %c0_45 = arith.constant 0 : index
    %43 = vector.load %arg1[%c0_42, %c2_43, %c0_44, %c0_45] : memref<1x18x18x4xbf16, #tpu.memory_space<vmem>>, vector<1x16x16x4xbf16>
    %44 = vector.shape_cast %43 : vector<1x16x16x4xbf16> to vector<16x16x4xbf16>
    %45 = vector.shape_cast %44 : vector<16x16x4xbf16> to vector<256x4xbf16>
    %c6 = arith.constant 6 : index
    %c0_46 = arith.constant 0 : index
    %c0_47 = arith.constant 0 : index
    %46 = vector.load %arg2[%c6, %c0_46, %c0_47] : memref<9x4x128xbf16, #tpu.memory_space<vmem>>, vector<1x4x128xbf16>
    %47 = vector.shape_cast %46 : vector<1x4x128xbf16> to vector<4x128xbf16>
    %cst_48 = arith.constant dense<0.000000e+00> : vector<256x128xf32>
    %48 = tpu.matmul %45, %47, %cst_48 {dimension_numbers = #tpu.dot_dimension_numbers<[1], [0], [0], [1], [0, 0, 1, 1], [], []>} : vector<256x4xbf16>, vector<4x128xbf16>, vector<256x128xf32> -> vector<256x128xf32>
    %49 = arith.addf %42, %48 : vector<256x128xf32>
    %c0_49 = arith.constant 0 : index
    %c2_50 = arith.constant 2 : index
    %c1_51 = arith.constant 1 : index
    %c0_52 = arith.constant 0 : index
    %50 = vector.load %arg1[%c0_49, %c2_50, %c1_51, %c0_52] : memref<1x18x18x4xbf16, #tpu.memory_space<vmem>>, vector<1x16x16x4xbf16>
    %51 = vector.shape_cast %50 : vector<1x16x16x4xbf16> to vector<16x16x4xbf16>
    %52 = vector.shape_cast %51 : vector<16x16x4xbf16> to vector<256x4xbf16>
    %c7 = arith.constant 7 : index
    %c0_53 = arith.constant 0 : index
    %c0_54 = arith.constant 0 : index
    %53 = vector.load %arg2[%c7, %c0_53, %c0_54] : memref<9x4x128xbf16, #tpu.memory_space<vmem>>, vector<1x4x128xbf16>
    %54 = vector.shape_cast %53 : vector<1x4x128xbf16> to vector<4x128xbf16>
    %cst_55 = arith.constant dense<0.000000e+00> : vector<256x128xf32>
    %55 = tpu.matmul %52, %54, %cst_55 {dimension_numbers = #tpu.dot_dimension_numbers<[1], [0], [0], [1], [0, 0, 1, 1], [], []>} : vector<256x4xbf16>, vector<4x128xbf16>, vector<256x128xf32> -> vector<256x128xf32>
    %56 = arith.addf %49, %55 : vector<256x128xf32>
    %c0_56 = arith.constant 0 : index
    %c2_57 = arith.constant 2 : index
    %c2_58 = arith.constant 2 : index
    %c0_59 = arith.constant 0 : index
    %57 = vector.load %arg1[%c0_56, %c2_57, %c2_58, %c0_59] : memref<1x18x18x4xbf16, #tpu.memory_space<vmem>>, vector<1x16x16x4xbf16>
    %58 = vector.shape_cast %57 : vector<1x16x16x4xbf16> to vector<16x16x4xbf16>
    %59 = vector.shape_cast %58 : vector<16x16x4xbf16> to vector<256x4xbf16>
    %c8 = arith.constant 8 : index
    %c0_60 = arith.constant 0 : index
    %c0_61 = arith.constant 0 : index
    %60 = vector.load %arg2[%c8, %c0_60, %c0_61] : memref<9x4x128xbf16, #tpu.memory_space<vmem>>, vector<1x4x128xbf16>
    %61 = vector.shape_cast %60 : vector<1x4x128xbf16> to vector<4x128xbf16>
    %cst_62 = arith.constant dense<0.000000e+00> : vector<256x128xf32>
    %62 = tpu.matmul %59, %61, %cst_62 {dimension_numbers = #tpu.dot_dimension_numbers<[1], [0], [0], [1], [0, 0, 1, 1], [], []>} : vector<256x4xbf16>, vector<4x128xbf16>, vector<256x128xf32> -> vector<256x128xf32>
    %63 = arith.addf %56, %62 : vector<256x128xf32>
    %c0_63 = arith.constant 0 : index
    %c0_64 = arith.constant 0 : index
    %64 = vector.load %arg3[%c0_63, %c0_64] : memref<1x128xf32, #tpu.memory_space<vmem>>, vector<1x128xf32>
    %65 = vector.broadcast %64 : vector<1x128xf32> to vector<256x128xf32>
    %66 = arith.addf %63, %65 : vector<256x128xf32>
    %cst_65 = arith.constant 0.000000e+00 : f32
    %cst_66 = arith.constant 6.000000e+00 : f32
    %67 = vector.broadcast %cst_65 : f32 to vector<256x128xf32>
    %68 = arith.maximumf %67, %66 : vector<256x128xf32>
    %69 = vector.broadcast %cst_66 : f32 to vector<256x128xf32>
    %70 = arith.minimumf %69, %68 : vector<256x128xf32>
    %cst_67 = arith.constant 0.000000e+00 : f32
    %71 = vector.broadcast %cst_67 : f32 to vector<18x18x128xf32>
    %c0_68 = arith.constant 0 : index
    %c0_69 = arith.constant 0 : index
    %c0_70 = arith.constant 0 : index
    %72 = vector.load %arg7[%c0_68, %c0_69, %c0_70] : memref<18x18x128xf32, #tpu.memory_space<vmem>>, vector<18x18x128xf32>
    tpu.vector_store %arg7[%c0_68, %c0_69, %c0_70], %71 {strides = array<i32>} : memref<18x18x128xf32, #tpu.memory_space<vmem>>, vector<18x18x128xf32>,
    %73 = vector.shape_cast %70 : vector<256x128xf32> to vector<16x16x128xf32>
    %c1_71 = arith.constant 1 : index
    %c1_72 = arith.constant 1 : index
    %c0_73 = arith.constant 0 : index
    %74 = vector.load %arg7[%c1_71, %c1_72, %c0_73] : memref<18x18x128xf32, #tpu.memory_space<vmem>>, vector<16x16x128xf32>
    tpu.vector_store %arg7[%c1_71, %c1_72, %c0_73], %73 {strides = array<i32>} : memref<18x18x128xf32, #tpu.memory_space<vmem>>, vector<16x16x128xf32>,
    %cst_74 = arith.constant 0.000000e+00 : f32
    %75 = vector.broadcast %cst_74 : f32 to vector<256x128xf32>
    %c0_75 = arith.constant 0 : index
    %c0_76 = arith.constant 0 : index
    %c0_77 = arith.constant 0 : index
    %76 = vector.load %arg7[%c0_75, %c0_76, %c0_77] : memref<18x18x128xf32, #tpu.memory_space<vmem>>, vector<16x16x128xf32>
    %77 = arith.truncf %76 : vector<16x16x128xf32> to vector<16x16x128xbf16>
    %78 = vector.shape_cast %77 : vector<16x16x128xbf16> to vector<256x128xbf16>
    %c0_78 = arith.constant 0 : index
    %c0_79 = arith.constant 0 : index
    %c0_80 = arith.constant 0 : index
    %79 = vector.load %arg4[%c0_78, %c0_79, %c0_80] : memref<9x128x128xbf16, #tpu.memory_space<vmem>>, vector<1x128x128xbf16>
    %80 = vector.shape_cast %79 : vector<1x128x128xbf16> to vector<128x128xbf16>
    %cst_81 = arith.constant dense<0.000000e+00> : vector<256x128xf32>
    %81 = tpu.matmul %78, %80, %cst_81 {dimension_numbers = #tpu.dot_dimension_numbers<[1], [0], [0], [1], [0, 0, 1, 1], [], []>} : vector<256x128xbf16>, vector<128x128xbf16>, vector<256x128xf32> -> vector<256x128xf32>
    %82 = arith.addf %75, %81 : vector<256x128xf32>
    %c0_82 = arith.constant 0 : index
    %c1_83 = arith.constant 1 : index
    %c0_84 = arith.constant 0 : index
    %83 = vector.load %arg7[%c0_82, %c1_83, %c0_84] : memref<18x18x128xf32, #tpu.memory_space<vmem>>, vector<16x16x128xf32>
    %84 = arith.truncf %83 : vector<16x16x128xf32> to vector<16x16x128xbf16>
    %85 = vector.shape_cast %84 : vector<16x16x128xbf16> to vector<256x128xbf16>
    %c1_85 = arith.constant 1 : index
    %c0_86 = arith.constant 0 : index
    %c0_87 = arith.constant 0 : index
    %86 = vector.load %arg4[%c1_85, %c0_86, %c0_87] : memref<9x128x128xbf16, #tpu.memory_space<vmem>>, vector<1x128x128xbf16>
    %87 = vector.shape_cast %86 : vector<1x128x128xbf16> to vector<128x128xbf16>
    %cst_88 = arith.constant dense<0.000000e+00> : vector<256x128xf32>
    %88 = tpu.matmul %85, %87, %cst_88 {dimension_numbers = #tpu.dot_dimension_numbers<[1], [0], [0], [1], [0, 0, 1, 1], [], []>} : vector<256x128xbf16>, vector<128x128xbf16>, vector<256x128xf32> -> vector<256x128xf32>
    %89 = arith.addf %82, %88 : vector<256x128xf32>
    %c0_89 = arith.constant 0 : index
    %c2_90 = arith.constant 2 : index
    %c0_91 = arith.constant 0 : index
    %90 = vector.load %arg7[%c0_89, %c2_90, %c0_91] : memref<18x18x128xf32, #tpu.memory_space<vmem>>, vector<16x16x128xf32>
    %91 = arith.truncf %90 : vector<16x16x128xf32> to vector<16x16x128xbf16>
    %92 = vector.shape_cast %91 : vector<16x16x128xbf16> to vector<256x128xbf16>
    %c2_92 = arith.constant 2 : index
    %c0_93 = arith.constant 0 : index
    %c0_94 = arith.constant 0 : index
    %93 = vector.load %arg4[%c2_92, %c0_93, %c0_94] : memref<9x128x128xbf16, #tpu.memory_space<vmem>>, vector<1x128x128xbf16>
    %94 = vector.shape_cast %93 : vector<1x128x128xbf16> to vector<128x128xbf16>
    %cst_95 = arith.constant dense<0.000000e+00> : vector<256x128xf32>
    %95 = tpu.matmul %92, %94, %cst_95 {dimension_numbers = #tpu.dot_dimension_numbers<[1], [0], [0], [1], [0, 0, 1, 1], [], []>} : vector<256x128xbf16>, vector<128x128xbf16>, vector<256x128xf32> -> vector<256x128xf32>
    %96 = arith.addf %89, %95 : vector<256x128xf32>
    %c1_96 = arith.constant 1 : index
    %c0_97 = arith.constant 0 : index
    %c0_98 = arith.constant 0 : index
    %97 = vector.load %arg7[%c1_96, %c0_97, %c0_98] : memref<18x18x128xf32, #tpu.memory_space<vmem>>, vector<16x16x128xf32>
    %98 = arith.truncf %97 : vector<16x16x128xf32> to vector<16x16x128xbf16>
    %99 = vector.shape_cast %98 : vector<16x16x128xbf16> to vector<256x128xbf16>
    %c3_99 = arith.constant 3 : index
    %c0_100 = arith.constant 0 : index
    %c0_101 = arith.constant 0 : index
    %100 = vector.load %arg4[%c3_99, %c0_100, %c0_101] : memref<9x128x128xbf16, #tpu.memory_space<vmem>>, vector<1x128x128xbf16>
    %101 = vector.shape_cast %100 : vector<1x128x128xbf16> to vector<128x128xbf16>
    %cst_102 = arith.constant dense<0.000000e+00> : vector<256x128xf32>
    %102 = tpu.matmul %99, %101, %cst_102 {dimension_numbers = #tpu.dot_dimension_numbers<[1], [0], [0], [1], [0, 0, 1, 1], [], []>} : vector<256x128xbf16>, vector<128x128xbf16>, vector<256x128xf32> -> vector<256x128xf32>
    %103 = arith.addf %96, %102 : vector<256x128xf32>
    %c1_103 = arith.constant 1 : index
    %c1_104 = arith.constant 1 : index
    %c0_105 = arith.constant 0 : index
    %104 = vector.load %arg7[%c1_103, %c1_104, %c0_105] : memref<18x18x128xf32, #tpu.memory_space<vmem>>, vector<16x16x128xf32>
    %105 = arith.truncf %104 : vector<16x16x128xf32> to vector<16x16x128xbf16>
    %106 = vector.shape_cast %105 : vector<16x16x128xbf16> to vector<256x128xbf16>
    %c4_106 = arith.constant 4 : index
    %c0_107 = arith.constant 0 : index
    %c0_108 = arith.constant 0 : index
    %107 = vector.load %arg4[%c4_106, %c0_107, %c0_108] : memref<9x128x128xbf16, #tpu.memory_space<vmem>>, vector<1x128x128xbf16>
    %108 = vector.shape_cast %107 : vector<1x128x128xbf16> to vector<128x128xbf16>
    %cst_109 = arith.constant dense<0.000000e+00> : vector<256x128xf32>
    %109 = tpu.matmul %106, %108, %cst_109 {dimension_numbers = #tpu.dot_dimension_numbers<[1], [0], [0], [1], [0, 0, 1, 1], [], []>} : vector<256x128xbf16>, vector<128x128xbf16>, vector<256x128xf32> -> vector<256x128xf32>
    %110 = arith.addf %103, %109 : vector<256x128xf32>
    %c1_110 = arith.constant 1 : index
    %c2_111 = arith.constant 2 : index
    %c0_112 = arith.constant 0 : index
    %111 = vector.load %arg7[%c1_110, %c2_111, %c0_112] : memref<18x18x128xf32, #tpu.memory_space<vmem>>, vector<16x16x128xf32>
    %112 = arith.truncf %111 : vector<16x16x128xf32> to vector<16x16x128xbf16>
    %113 = vector.shape_cast %112 : vector<16x16x128xbf16> to vector<256x128xbf16>
    %c5_113 = arith.constant 5 : index
    %c0_114 = arith.constant 0 : index
    %c0_115 = arith.constant 0 : index
    %114 = vector.load %arg4[%c5_113, %c0_114, %c0_115] : memref<9x128x128xbf16, #tpu.memory_space<vmem>>, vector<1x128x128xbf16>
    %115 = vector.shape_cast %114 : vector<1x128x128xbf16> to vector<128x128xbf16>
    %cst_116 = arith.constant dense<0.000000e+00> : vector<256x128xf32>
    %116 = tpu.matmul %113, %115, %cst_116 {dimension_numbers = #tpu.dot_dimension_numbers<[1], [0], [0], [1], [0, 0, 1, 1], [], []>} : vector<256x128xbf16>, vector<128x128xbf16>, vector<256x128xf32> -> vector<256x128xf32>
    %117 = arith.addf %110, %116 : vector<256x128xf32>
    %c2_117 = arith.constant 2 : index
    %c0_118 = arith.constant 0 : index
    %c0_119 = arith.constant 0 : index
    %118 = vector.load %arg7[%c2_117, %c0_118, %c0_119] : memref<18x18x128xf32, #tpu.memory_space<vmem>>, vector<16x16x128xf32>
    %119 = arith.truncf %118 : vector<16x16x128xf32> to vector<16x16x128xbf16>
    %120 = vector.shape_cast %119 : vector<16x16x128xbf16> to vector<256x128xbf16>
    %c6_120 = arith.constant 6 : index
    %c0_121 = arith.constant 0 : index
    %c0_122 = arith.constant 0 : index
    %121 = vector.load %arg4[%c6_120, %c0_121, %c0_122] : memref<9x128x128xbf16, #tpu.memory_space<vmem>>, vector<1x128x128xbf16>
    %122 = vector.shape_cast %121 : vector<1x128x128xbf16> to vector<128x128xbf16>
    %cst_123 = arith.constant dense<0.000000e+00> : vector<256x128xf32>
    %123 = tpu.matmul %120, %122, %cst_123 {dimension_numbers = #tpu.dot_dimension_numbers<[1], [0], [0], [1], [0, 0, 1, 1], [], []>} : vector<256x128xbf16>, vector<128x128xbf16>, vector<256x128xf32> -> vector<256x128xf32>
    %124 = arith.addf %117, %123 : vector<256x128xf32>
    %c2_124 = arith.constant 2 : index
    %c1_125 = arith.constant 1 : index
    %c0_126 = arith.constant 0 : index
    %125 = vector.load %arg7[%c2_124, %c1_125, %c0_126] : memref<18x18x128xf32, #tpu.memory_space<vmem>>, vector<16x16x128xf32>
    %126 = arith.truncf %125 : vector<16x16x128xf32> to vector<16x16x128xbf16>
    %127 = vector.shape_cast %126 : vector<16x16x128xbf16> to vector<256x128xbf16>
    %c7_127 = arith.constant 7 : index
    %c0_128 = arith.constant 0 : index
    %c0_129 = arith.constant 0 : index
    %128 = vector.load %arg4[%c7_127, %c0_128, %c0_129] : memref<9x128x128xbf16, #tpu.memory_space<vmem>>, vector<1x128x128xbf16>
    %129 = vector.shape_cast %128 : vector<1x128x128xbf16> to vector<128x128xbf16>
    %cst_130 = arith.constant dense<0.000000e+00> : vector<256x128xf32>
    %130 = tpu.matmul %127, %129, %cst_130 {dimension_numbers = #tpu.dot_dimension_numbers<[1], [0], [0], [1], [0, 0, 1, 1], [], []>} : vector<256x128xbf16>, vector<128x128xbf16>, vector<256x128xf32> -> vector<256x128xf32>
    %131 = arith.addf %124, %130 : vector<256x128xf32>
    %c2_131 = arith.constant 2 : index
    %c2_132 = arith.constant 2 : index
    %c0_133 = arith.constant 0 : index
    %132 = vector.load %arg7[%c2_131, %c2_132, %c0_133] : memref<18x18x128xf32, #tpu.memory_space<vmem>>, vector<16x16x128xf32>
    %133 = arith.truncf %132 : vector<16x16x128xf32> to vector<16x16x128xbf16>
    %134 = vector.shape_cast %133 : vector<16x16x128xbf16> to vector<256x128xbf16>
    %c8_134 = arith.constant 8 : index
    %c0_135 = arith.constant 0 : index
    %c0_136 = arith.constant 0 : index
    %135 = vector.load %arg4[%c8_134, %c0_135, %c0_136] : memref<9x128x128xbf16, #tpu.memory_space<vmem>>, vector<1x128x128xbf16>
    %136 = vector.shape_cast %135 : vector<1x128x128xbf16> to vector<128x128xbf16>
    %cst_137 = arith.constant dense<0.000000e+00> : vector<256x128xf32>
    %137 = tpu.matmul %134, %136, %cst_137 {dimension_numbers = #tpu.dot_dimension_numbers<[1], [0], [0], [1], [0, 0, 1, 1], [], []>} : vector<256x128xbf16>, vector<128x128xbf16>, vector<256x128xf32> -> vector<256x128xf32>
    %138 = arith.addf %131, %137 : vector<256x128xf32>
    %c0_138 = arith.constant 0 : index
    %c0_139 = arith.constant 0 : index
    %139 = vector.load %arg5[%c0_138, %c0_139] : memref<1x128xf32, #tpu.memory_space<vmem>>, vector<1x128xf32>
    %140 = vector.broadcast %139 : vector<1x128xf32> to vector<256x128xf32>
    %141 = arith.addf %138, %140 : vector<256x128xf32>
    %142 = vector.shape_cast %141 : vector<256x128xf32> to vector<16x16x128xf32>
    %c0_140 = arith.constant 0 : index
    %c0_141 = arith.constant 0 : index
    %c0_142 = arith.constant 0 : index
    %c0_143 = arith.constant 0 : index
    %143 = vector.load %arg6[%c0_140, %c0_141, %c0_142, %c0_143] : memref<1x16x16x128xf32, #tpu.memory_space<vmem>>, vector<1x16x16x128xf32>
    %144 = vector.shape_cast %143 : vector<1x16x16x128xf32> to vector<16x16x128xf32>
    %145 = vector.shape_cast %142 : vector<16x16x128xf32> to vector<1x16x16x128xf32>
    tpu.vector_store %arg6[%c0_140, %c0_141, %c0_142, %c0_143], %145 {strides = array<i32>} : memref<1x16x16x128xf32, #tpu.memory_space<vmem>>, vector<1x16x16x128xf32>,
    return
  }
  func.func @transform_0(%arg0: i32) -> (i32, i32, i32, i32) {
    %c0_i32 = arith.constant 0 : i32
    %c0_i32_0 = arith.constant 0 : i32
    %c0_i32_1 = arith.constant 0 : i32
    %c0_i32_2 = arith.constant 0 : i32
    return %arg0, %c0_i32, %c0_i32_0, %c0_i32_1 : i32, i32, i32, i32
  }
  func.func @transform_1(%arg0: i32) -> (i32, i32, i32) {
    %c0_i32 = arith.constant 0 : i32
    %c0_i32_0 = arith.constant 0 : i32
    %c0_i32_1 = arith.constant 0 : i32
    %c0_i32_2 = arith.constant 0 : i32
    return %c0_i32, %c0_i32_0, %c0_i32_1 : i32, i32, i32
  }
  func.func @transform_2(%arg0: i32) -> (i32, i32) {
    %c0_i32 = arith.constant 0 : i32
    %c0_i32_0 = arith.constant 0 : i32
    %c0_i32_1 = arith.constant 0 : i32
    return %c0_i32, %c0_i32_0 : i32, i32
  }
  func.func @transform_3(%arg0: i32) -> (i32, i32, i32) {
    %c0_i32 = arith.constant 0 : i32
    %c0_i32_0 = arith.constant 0 : i32
    %c0_i32_1 = arith.constant 0 : i32
    %c0_i32_2 = arith.constant 0 : i32
    return %c0_i32, %c0_i32_0, %c0_i32_1 : i32, i32, i32
  }
  func.func @transform_4(%arg0: i32) -> (i32, i32) {
    %c0_i32 = arith.constant 0 : i32
    %c0_i32_0 = arith.constant 0 : i32
    %c0_i32_1 = arith.constant 0 : i32
    return %c0_i32, %c0_i32_0 : i32, i32
  }
  func.func @transform_5(%arg0: i32) -> (i32, i32, i32, i32) {
    %c0_i32 = arith.constant 0 : i32
    %c0_i32_0 = arith.constant 0 : i32
    %c0_i32_1 = arith.constant 0 : i32
    %c0_i32_2 = arith.constant 0 : i32
    return %arg0, %c0_i32, %c0_i32_0, %c0_i32_1 : i32, i32, i32, i32
  }
}

</mosaic_0001>

<bundles_post_ra>
// kernel: resblock_forward.1
= control target key start
LH: loop header
LB: loop body
LE: loop exit
PB: predicated region body
PF: predicated region fallthrough
CT: control target
= control target key end

     0   :  { %s9835_s18 = smov 0   ;;  %s13171_s0 = inlined_call_operand.vmem [shape: bf16[2,18,18,4], index: 0, kind: input, shape index: {}]   ;;  %s13172_s1 = inlined_call_operand.vmem [shape: bf16[9,4,128], index: 1, kind: input, shape index: {}]   ;;  %s13173_s2 = inlined_call_operand.vmem [shape: f32[1,128], index: 2, kind: input, shape index: {}]   ;;  %s13174_s3 = inlined_call_operand.vmem [shape: bf16[9,128,128], index: 3, kind: input, shape index: {}]   ;;  %s13175_s4 = inlined_call_operand.vmem [shape: f32[1,128], index: 4, kind: input, shape index: {}]   ;;  %s13176_s5 = inlined_call_operand.vmem [shape: f32[2,16,16,128], index: 5, kind: output, shape index: {}]  }
   0x1 LB: > { %s7791_s19 = sadd.s32 4294967295, %s9801_s18   ;;  %p7795_p0 = scmp.ge.s32.totalorder %s9801_s18, 1  ;;  %s9801_s18 = sphi %s9835_s18, %s15_s18  }
   0x2   : > { %p187_p1 = scmp.lt.s32.totalorder %s9801_s18, 3 }
   0x4   : > { %p188_p2 = pnand %p7795_p0, %p187_p1 }
   0x6   : > { %191 = sbr.rel (%p188_p2) target bundleno = 1027 (0x403), region = 40 }
   0xb   : > { %v7799_v0 = vld [vmem:[%s13172_s1 + $0x2] sm:$0x3]  ;;  %vm761_vm0 = vcmask 1041408   ;;  %v258_v1 = vld [vmem:[%s13172_s1] sm:$0x3]  ;;  %p215_p3 = scmp.lt.s32.totalorder %s7791_s19, 1 }
   0xc   : > { %9647 = vmatprep.subr.msk.bf16.mxu0 %vm761_vm0, %v7799_v0  ;;  %v763_v2 = vsel %vm761_vm0, %v7799_v0, 0  ;;  %9648 = vmatprep.subr.msk.bf16.mxu1 %vm761_vm0, %v258_v1  ;;  %v1055_v3 = vsel %vm761_vm0, %v258_v1, 0  ;;  %vm275_vm1 = vsmask.f32 3328  ;;  %vm276_vm2 = vsmask.f32 7440 }
   0xd   : > { %8910 = vmatpush3.bf16.msra.mxu0 %v763_v2  ;;  %8944 = vmatpush3.bf16.msra.mxu1 %v1055_v3  ;;  %s13509_s19 = smov (!%p215_p3, %s7791_s19), 1  ;;  %v7880_v4 = vld [vmem:[%s13172_s1 + $0x4] sm:$0x3]  ;;  %v7945_v5 = vld [vmem:[%s13172_s1 + $0x6] sm:$0x3]  ;;  %vm712_vm3 = vcmask 31744   ;;  %vm9908_vm4 = vmor %vm275_vm1, %vm276_vm2 }
   0xe   : > { %9649 = vmatprep.subr.msk.bf16.mxu0 %vm761_vm0, %v7880_v4  ;;  %v9863_v6 = vsel %vm761_vm0, %v7880_v4, 0  ;;  %9650 = vmatprep.subr.msk.bf16.mxu1 %vm761_vm0, %v7945_v5  ;;  %v1839_v7 = vsel %vm761_vm0, %v7945_v5, 0  ;;  %v9870_v8 = vld [vmem:[%s13172_s1 + $0x8] sm:$0x3]  ;;  %s9656_s30 = smul.u32 216, %s13509_s19  ;;  %vm1266_vm5 = vcmask 1042432  }
   0xf   : > { %v9875_v9 = vsel %vm761_vm0, %v9870_v8, 0  ;;  %vm1267_vm6 = vcmask 1046532   ;;  %s8539_s27 = sshll.u32 %s13509_s19, 8 }
  0x10   : > { %s9880_s8 = scalar_lea.vmem %s13171_s0, %s9656_s30  ;;  %vm10170_vm7 = vmor %vm1266_vm5, %vm1267_vm6  ;;  %s12987_s19 = scalar_lea.vmem %s13176_s5, %s8539_s27 }
  0x11   : > { %v226_v10 = vld [vmem:[%s9880_s8] sm:$0xf]  ;;  %v9884_v11 = vld [vmem:[%s9880_s8 + $0x4] sm:$0xf]  ;;  %v9887_v12 = vld [vmem:[%s9880_s8 + $0x8] sm:$0x1] }
  0x12   : > { %v279_v13 = vshrl.u32 %v226_v10, 16  ;;  %v282_v14 = vshll.u32 %v226_v10, 16  ;;  %v288_v15 = vshll.u32 %v9884_v11, 16  ;;  %v292_v16 = vshrl.u32 %v9884_v11, 16  ;;  %v228_v17 = vld [vmem:[%s9880_s8 + $0xc] sm:$0xf] }
  0x13   : > { %v298_v18 = vshll.u32 %v9887_v12, 16  ;;  %v1274_v19 = vrot.slane %v9887_v12, 5  ;;  %v7832_v20 = vcombine.low %v226_v10, %v9884_v11  ;;  %v9896_v21 = vld [vmem:[%s9880_s8 + $0x10] sm:$0xf]  ;;  %v9899_v22 = vld [vmem:[%s9880_s8 + $0x14] sm:$0x1] }
  0x14   : > { %v281_v23 = vrot.slane %v279_v13, 4  ;;  %v284_v24 = vrot.slane %v282_v14, 5  ;;  %v290_v25 = vrot.slane %v288_v15, 5  ;;  %v294_v26 = vrot.slane %v292_v16, 4  ;;  %v230_v35 = vld [vmem:[%s9880_s8 + $0x18] sm:$0xf] }
  0x15   : > { %v300_v27 = vrot.slane %v298_v18, 5  ;;  %8945 = vmatprep.mubr.msk.bf16.mxu1 %vm712_vm3, %v7832_v20  ;;  %v303_v28 = vshrl.u32 %v228_v17, 16  ;;  %v306_v29 = vshll.u32 %v228_v17, 16  ;;  %v312_v30 = vshll.u32 %v9896_v21, 16  ;;  %v9914_v45 = vld [vmem:[%s9880_s8 + $0x1c] sm:$0xf] }
  0x16   : > { %v285_v31 = vor.u32 %v284_v24, %v281_v23  ;;  %v295_v32 = vor.u32 %v294_v26, %v290_v25  ;;  %v316_v33 = vshrl.u32 %v9896_v21, 16  ;;  %v322_v34 = vshll.u32 %v9899_v22, 16  ;;  %v9919_v49 = vld [vmem:[%s9880_s8 + $0x20] sm:$0x1]  ;;  %v232_v55 = vld [vmem:[%s9880_s8 + $0x24] sm:$0xf] }
  0x17   : > { %v305_v37 = vrot.slane %v303_v28, 4  ;;  %v308_v38 = vrot.slane %v306_v29, 5  ;;  %v314_v39 = vrot.slane %v312_v30, 5  ;;  %v1278_v40 = vrot.slane %v9896_v21, 5  ;;  %v9931_v0 = vld [vmem:[%s9880_s8 + $0x28] sm:$0xf] }
  0x18   : > { %v286_v41 = vrot.slane %v285_v31, 4  ;;  %v296_v42 = vrot.slane %v295_v32, 4  ;;  %v318_v43 = vrot.slane %v316_v33, 4  ;;  %v324_v44 = vrot.slane %v322_v34, 5  ;;  %v9938_v4 = vld [vmem:[%s9880_s8 + $0x2c] sm:$0x1] }
  0x19   : > { %v309_v46 = vor.u32 %v308_v38, %v305_v37  ;;  %v1281_v47 = vrot.slane %v9899_v22, 5  ;;  %v7833_v48 = vcombine.low %v228_v17, %v9896_v21  ;;  %v327_v50 = vshrl.u32 %v230_v35, 16  ;;  %v9953_v31 = vld [vmem:[%s9880_s8 + $0x38] sm:$0x1] }
  0x1a   : > { %v291_v51 = vsel %vm9908_vm4, %v286_v41, %v290_v25  ;;  %v301_v52 = vsel %vm9908_vm4, %v296_v42, %v300_v27  ;;  %v319_v53 = vor.u32 %v318_v43, %v314_v39  ;;  %v330_v54 = vshll.u32 %v230_v35, 16  ;;  %v9948_v27 = vld [vmem:[%s9880_s8 + $0x34] sm:$0xf] }
  0x1b   : > { %v7800_v56 = vcombine.low %v291_v51, %v301_v52  ;;  %v310_v57 = vrot.slane %v309_v46, 4  ;;  %8946 = vmatmul.mubr.msk.bf16.vlgmr.msra.gmra.mxu1 %vm712_vm3, %v7833_v48  ;;  %v329_v58 = vrot.slane %v327_v50, 4  ;;  %v336_v59 = vshll.u32 %v9914_v45, 16  ;;  %v236_v48 = vld [vmem:[%s9880_s8 + $0x3c] sm:$0xf] }
  0x1c   : > { %v320_v60 = vrot.slane %v319_v53, 4  ;;  %v332_v61 = vrot.slane %v330_v54, 5  ;;  %v340_v62 = vshrl.u32 %v9914_v45, 16  ;;  %v346_v63 = vshll.u32 %v9919_v49, 16  ;;  %9012 = vmatpush3.bf16.msra.mxu1 %v1839_v7  ;;  %v234_v7 = vld [vmem:[%s9880_s8 + $0x30] sm:$0xf] }
  0x1d   : > { %8911 = vmatprep.mubr.msk.bf16.mxu0 %vm712_vm3, %v7800_v56  ;;  %v315_v1 = vsel %vm9908_vm4, %v310_v57, %v314_v39  ;;  %v338_v2 = vrot.slane %v336_v59, 5  ;;  %v7834_v3 = vcombine.low %v230_v35, %v9914_v45  ;;  %v351_v5 = vshrl.u32 %v232_v55, 16  ;;  %v9968_v54 = vld [vmem:[%s9880_s8 + $0x40] sm:$0xf] }
  0x1e   : > { %v325_v10 = vsel %vm9908_vm4, %v320_v60, %v324_v44  ;;  %v333_v13 = vor.u32 %v332_v61, %v329_v58  ;;  %v342_v14 = vrot.slane %v340_v62, 4  ;;  %v348_v15 = vrot.slane %v346_v63, 5  ;;  %v9975_v60 = vld [vmem:[%s9880_s8 + $0x44] sm:$0x1] }
  0x1f   : > { %v7801_v16 = vcombine.low %v315_v1, %v325_v10  ;;  %8949 = vmatprep.mubr.msk.bf16.mxu1 %vm712_vm3, %v7834_v3  ;;  %v353_v17 = vrot.slane %v351_v5, 4  ;;  %v354_v18 = vshll.u32 %v232_v55, 16  ;;  %v360_v20 = vshll.u32 %v9931_v0, 16  ;;  %v238_v5 = vld [vmem:[%s9880_s8 + $0x48] sm:$0xf] }
  0x20   : > { %v334_v23 = vrot.slane %v333_v13, 4  ;;  %v343_v24 = vor.u32 %v342_v14, %v338_v2  ;;  %v364_v25 = vshrl.u32 %v9931_v0, 16  ;;  %v370_v26 = vshll.u32 %v9938_v4, 16 }
  0x21   : > { %8912 = vmatmul.mubr.msk.bf16.vlgmr.msra.gmra.mxu0 %vm712_vm3, %v7801_v16  ;;  %v356_v28 = vrot.slane %v354_v18, 5  ;;  %v362_v29 = vrot.slane %v360_v20, 5  ;;  %v7835_v30 = vcombine.low %v232_v55, %v9931_v0  ;;  %v375_v32 = vshrl.u32 %v234_v7, 16  ;;  %v9985_v20 = vld [vmem:[%s9880_s8 + $0x4c] sm:$0xf] }
  0x22   : > { %8978 = vmatpush3.bf16.msra.mxu0 %v9863_v6  ;;  %v339_v33 = vsel %vm9908_vm4, %v334_v23, %v338_v2  ;;  %v344_v34 = vrot.slane %v343_v24, 4  ;;  %v366_v35 = vrot.slane %v364_v25, 4  ;;  %v372_v37 = vrot.slane %v370_v26, 5  ;;  %v9992_v26 = vld [vmem:[%s9880_s8 + $0x50] sm:$0x1] }
  0x23   : > { %v357_v38 = vor.u32 %v356_v28, %v353_v17  ;;  %8950 = vmatmul.mubr.msk.bf16.gmra.mxu1 %vm712_vm3, %v7835_v30  ;;  %v377_v39 = vrot.slane %v375_v32, 4  ;;  %v378_v41 = vshll.u32 %v234_v7, 16  ;;  %v384_v42 = vshll.u32 %v9948_v27, 16  ;;  %9651 = vmatprep.subr.msk.bf16.mxu0 %vm761_vm0, %v9870_v8 }
  0x24   : > { %v349_v6 = vsel %vm9908_vm4, %v344_v34, %v348_v15  ;;  %v367_v43 = vor.u32 %v366_v35, %v362_v29  ;;  %v388_v44 = vshrl.u32 %v9948_v27, 16  ;;  %v394_v46 = vshll.u32 %v9953_v31, 16  ;;  %v240_v34 = vld [vmem:[%s9880_s8 + $0x54] sm:$0xf] }
  0x25   : > { %v7802_v50 = vcombine.low %v339_v33, %v349_v6  ;;  %v358_v51 = vrot.slane %v357_v38, 4  ;;  %v380_v52 = vrot.slane %v378_v41, 5  ;;  %v386_v53 = vrot.slane %v384_v42, 5 }
  0x26   : > { %v368_v55 = vrot.slane %v367_v43, 4  ;;  %v390_v56 = vrot.slane %v388_v44, 4  ;;  %v396_v8 = vrot.slane %v394_v46, 5  ;;  %v7836_v57 = vcombine.low %v234_v7, %v9948_v27  ;;  %v10002_v44 = vld [vmem:[%s9880_s8 + $0x58] sm:$0xf] }
  0x27   : > { %8915 = vmatprep.mubr.msk.bf16.mxu0 %vm712_vm3, %v7802_v50  ;;  %v363_v58 = vsel %vm9908_vm4, %v358_v51, %v362_v29  ;;  %v381_v59 = vor.u32 %v380_v52, %v377_v39  ;;  %v399_v61 = vshrl.u32 %v236_v48, 16  ;;  %v402_v62 = vshll.u32 %v236_v48, 16  ;;  %v10009_v51 = vld [vmem:[%s9880_s8 + $0x5c] sm:$0x1] }
  0x28   : > { %v373_v63 = vsel %vm9908_vm4, %v368_v55, %v372_v37  ;;  %v391_v1 = vor.u32 %v390_v56, %v386_v53  ;;  %8953 = vmatprep.mubr.msk.bf16.mxu1 %vm712_vm3, %v7836_v57  ;;  %v408_v2 = vshll.u32 %v9968_v54, 16  ;;  %v412_v3 = vshrl.u32 %v9968_v54, 16  ;;  %v242_v57 = vld [vmem:[%s9880_s8 + $0x60] sm:$0xf] }
  0x29   : > { %v7803_v10 = vcombine.low %v363_v58, %v373_v63  ;;  %v382_v13 = vrot.slane %v381_v59, 4  ;;  %v401_v14 = vrot.slane %v399_v61, 4  ;;  %v404_v15 = vrot.slane %v402_v62, 5 }
  0x2a   : > { %v392_v7 = vrot.slane %v391_v1, 4  ;;  %v410_v16 = vrot.slane %v408_v2, 5  ;;  %v414_v17 = vrot.slane %v412_v3, 4  ;;  %v418_v18 = vshll.u32 %v9975_v60, 16 }
  0x2b   : > { %8916 = vmatmul.mubr.msk.bf16.gmra.mxu0 %vm712_vm3, %v7803_v10  ;;  %v387_v23 = vsel %vm9908_vm4, %v382_v13, %v386_v53  ;;  %v405_v24 = vor.u32 %v404_v15, %v401_v14  ;;  %v7837_v25 = vcombine.low %v236_v48, %v9968_v54  ;;  %v423_v28 = vshrl.u32 %v238_v5, 16  ;;  %v10024_v15 = vld [vmem:[%s9880_s8 + $0x68] sm:$0x1] }
  0x2c   : > { %v397_v29 = vsel %vm9908_vm4, %v392_v7, %v396_v8  ;;  %v415_v30 = vor.u32 %v414_v17, %v410_v16  ;;  %v420_v32 = vrot.slane %v418_v18, 5  ;;  %v426_v33 = vshll.u32 %v238_v5, 16 }
  0x2d   : > { %v7804_v35 = vcombine.low %v387_v23, %v397_v29  ;;  %v406_v37 = vrot.slane %v405_v24, 4  ;;  %8954 = vmatmul.mubr.msk.bf16.gmra.mxu1 %vm712_vm3, %v7837_v25  ;;  %v425_v38 = vrot.slane %v423_v28, 4  ;;  %v432_v39 = vshll.u32 %v9985_v20, 16  ;;  %v244_v24 = vld [vmem:[%s9880_s8 + $0x6c] sm:$0xf] }
  0x2e   : > { %v416_v41 = vrot.slane %v415_v30, 4  ;;  %v428_v42 = vrot.slane %v426_v33, 5  ;;  %v436_v6 = vshrl.u32 %v9985_v20, 16  ;;  %v442_v43 = vshll.u32 %v9992_v26, 16 }
  0x2f   : > { %8919 = vmatprep.mubr.msk.bf16.mxu0 %vm712_vm3, %v7804_v35  ;;  %v411_v46 = vsel %vm9908_vm4, %v406_v37, %v410_v16  ;;  %v434_v48 = vrot.slane %v432_v39, 5  ;;  %v7838_v50 = vcombine.low %v238_v5, %v9985_v20  ;;  %v447_v52 = vshrl.u32 %v240_v34, 16  ;;  %v10019_v5 = vld [vmem:[%s9880_s8 + $0x64] sm:$0xf] }
  0x30   : > { %v421_v53 = vsel %vm9908_vm4, %v416_v41, %v420_v32  ;;  %v429_v55 = vor.u32 %v428_v42, %v425_v38  ;;  %v438_v56 = vrot.slane %v436_v6, 4  ;;  %v444_v8 = vrot.slane %v442_v43, 5  ;;  %v10032_v32 = vld [vmem:[%s9880_s8 + $0x70] sm:$0xf]  ;;  %v10039_v6 = vld [vmem:[%s9880_s8 + $0x74] sm:$0x1] }
  0x31   : > { %v7805_v58 = vcombine.low %v411_v46, %v421_v53  ;;  %8957 = vmatprep.mubr.msk.bf16.mxu1 %vm712_vm3, %v7838_v50  ;;  %v449_v59 = vrot.slane %v447_v52, 4  ;;  %v450_v61 = vshll.u32 %v240_v34, 16  ;;  %v456_v62 = vshll.u32 %v10002_v44, 16  ;;  %v246_v52 = vld [vmem:[%s9880_s8 + $0x78] sm:$0xf] }
  0x32   : > { %v430_v63 = vrot.slane %v429_v55, 4  ;;  %v439_v1 = vor.u32 %v438_v56, %v434_v48  ;;  %v460_v2 = vshrl.u32 %v10002_v44, 16  ;;  %v466_v3 = vshll.u32 %v10009_v51, 16 }
  0x33   : > { %8920 = vmatmul.mubr.msk.bf16.gmra.mxu0 %vm712_vm3, %v7805_v58  ;;  %v452_v10 = vrot.slane %v450_v61, 5  ;;  %v458_v13 = vrot.slane %v456_v62, 5  ;;  %v7839_v14 = vcombine.low %v240_v34, %v10002_v44  ;;  %v471_v7 = vshrl.u32 %v242_v57, 16  ;;  %v10052_v62 = vld [vmem:[%s9880_s8 + $0x7c] sm:$0xf] }
  0x34   : > { %v435_v16 = vsel %vm9908_vm4, %v430_v63, %v434_v48  ;;  %v440_v17 = vrot.slane %v439_v1, 4  ;;  %v462_v18 = vrot.slane %v460_v2, 4  ;;  %v468_v23 = vrot.slane %v466_v3, 5 }
  0x35   : > { %v453_v25 = vor.u32 %v452_v10, %v449_v59  ;;  %8958 = vmatmul.mubr.msk.bf16.gmra.mxu1 %vm712_vm3, %v7839_v14  ;;  %v473_v28 = vrot.slane %v471_v7, 4  ;;  %v474_v29 = vshll.u32 %v242_v57, 16  ;;  %v480_v30 = vshll.u32 %v10019_v5, 16  ;;  %v10055_v10 = vld [vmem:[%s9880_s8 + $0x80] sm:$0x1] }
  0x36   : > { %v445_v33 = vsel %vm9908_vm4, %v440_v17, %v444_v8  ;;  %v463_v34 = vor.u32 %v462_v18, %v458_v13  ;;  %v484_v35 = vshrl.u32 %v10019_v5, 16  ;;  %v490_v37 = vshll.u32 %v10024_v15, 16  ;;  %v248_v17 = vld [vmem:[%s9880_s8 + $0x84] sm:$0xf] }
  0x37   : > { %v7806_v38 = vcombine.low %v435_v16, %v445_v33  ;;  %v454_v39 = vrot.slane %v453_v25, 4  ;;  %v476_v41 = vrot.slane %v474_v29, 5  ;;  %v482_v42 = vrot.slane %v480_v30, 5 }
  0x38   : > { %v464_v43 = vrot.slane %v463_v34, 4  ;;  %v486_v46 = vrot.slane %v484_v35, 4  ;;  %v492_v48 = vrot.slane %v490_v37, 5  ;;  %v7840_v50 = vcombine.low %v242_v57, %v10019_v5  ;;  %v10066_v35 = vld [vmem:[%s9880_s8 + $0x88] sm:$0xf] }
  0x39   : > { %8923 = vmatprep.mubr.msk.bf16.mxu0 %vm712_vm3, %v7806_v38  ;;  %v459_v53 = vsel %vm9908_vm4, %v454_v39, %v458_v13  ;;  %v477_v55 = vor.u32 %v476_v41, %v473_v28  ;;  %v495_v56 = vshrl.u32 %v244_v24, 16  ;;  %v498_v8 = vshll.u32 %v244_v24, 16 }
  0x3a   : > { %v469_v58 = vsel %vm9908_vm4, %v464_v43, %v468_v23  ;;  %v487_v59 = vor.u32 %v486_v46, %v482_v42  ;;  %8961 = vmatprep.mubr.msk.bf16.mxu1 %vm712_vm3, %v7840_v50  ;;  %v504_v61 = vshll.u32 %v10032_v32, 16  ;;  %v508_v57 = vshrl.u32 %v10032_v32, 16  ;;  %v250_v50 = vld [vmem:[%s9880_s8 + $0x90] sm:$0xf] }
  0x3b   : > { %v7807_v63 = vcombine.low %v459_v53, %v469_v58  ;;  %v478_v1 = vrot.slane %v477_v55, 4  ;;  %v497_v2 = vrot.slane %v495_v56, 4  ;;  %v500_v3 = vrot.slane %v498_v8, 5 }
  0x3c   : > { %v488_v13 = vrot.slane %v487_v59, 4  ;;  %v506_v14 = vrot.slane %v504_v61, 5  ;;  %v510_v7 = vrot.slane %v508_v57, 4  ;;  %v514_v16 = vshll.u32 %v10039_v6, 16 }
  0x3d   : > { %8924 = vmatmul.mubr.msk.bf16.gmra.mxu0 %vm712_vm3, %v7807_v63  ;;  %v483_v18 = vsel %vm9908_vm4, %v478_v1, %v482_v42  ;;  %v501_v23 = vor.u32 %v500_v3, %v497_v2  ;;  %v7841_v25 = vcombine.low %v244_v24, %v10032_v32  ;;  %v519_v28 = vshrl.u32 %v246_v52, 16  ;;  %v10071_v42 = vld [vmem:[%s9880_s8 + $0x8c] sm:$0x1] }
  0x3e   : > { %v493_v29 = vsel %vm9908_vm4, %v488_v13, %v492_v48  ;;  %v511_v30 = vor.u32 %v510_v7, %v506_v14  ;;  %v516_v33 = vrot.slane %v514_v16, 5  ;;  %v522_v34 = vshll.u32 %v246_v52, 16  ;;  %v10085_v13 = vld [vmem:[%s9880_s8 + $0x94] sm:$0xf] }
  0x3f   : > { %v7808_v37 = vcombine.low %v483_v18, %v493_v29  ;;  %v502_v38 = vrot.slane %v501_v23, 4  ;;  %8962 = vmatmul.mubr.msk.bf16.gmra.mxu1 %vm712_vm3, %v7841_v25  ;;  %v521_v39 = vrot.slane %v519_v28, 4  ;;  %v528_v41 = vshll.u32 %v10052_v62, 16  ;;  %v10090_v18 = vld [vmem:[%s9880_s8 + $0x98] sm:$0x1] }
  0x40   : > { %v512_v24 = vrot.slane %v511_v30, 4  ;;  %v524_v43 = vrot.slane %v522_v34, 5  ;;  %v532_v46 = vshrl.u32 %v10052_v62, 16  ;;  %v538_v48 = vshll.u32 %v10055_v10, 16 }
  0x41   : > { %8927 = vmatprep.mubr.msk.bf16.mxu0 %vm712_vm3, %v7808_v37  ;;  %v507_v53 = vsel %vm9908_vm4, %v502_v38, %v506_v14  ;;  %v530_v55 = vrot.slane %v528_v41, 5  ;;  %v7842_v56 = vcombine.low %v246_v52, %v10052_v62  ;;  %v543_v8 = vshrl.u32 %v248_v17, 16  ;;  %v252_v38 = vld [vmem:[%s9880_s8 + $0x9c] sm:$0xf] }
  0x42   : > { %v517_v58 = vsel %vm9908_vm4, %v512_v24, %v516_v33  ;;  %v525_v59 = vor.u32 %v524_v43, %v521_v39  ;;  %v534_v61 = vrot.slane %v532_v46, 4  ;;  %v540_v57 = vrot.slane %v538_v48, 5 }
  0x43   : > { %v7809_v63 = vcombine.low %v507_v53, %v517_v58  ;;  %8965 = vmatprep.mubr.msk.bf16.mxu1 %vm712_vm3, %v7842_v56  ;;  %v545_v1 = vrot.slane %v543_v8, 4  ;;  %v546_v2 = vshll.u32 %v248_v17, 16  ;;  %v552_v3 = vshll.u32 %v10066_v35, 16 }
  0x44   : > { %v526_v14 = vrot.slane %v525_v59, 4  ;;  %v535_v52 = vor.u32 %v534_v61, %v530_v55  ;;  %v556_v7 = vshrl.u32 %v10066_v35, 16  ;;  %v562_v16 = vshll.u32 %v10071_v42, 16  ;;  %v10107_v61 = vld [vmem:[%s9880_s8 + $0xa4] sm:$0x1] }
  0x45   : > { %8928 = vmatmul.mubr.msk.bf16.gmra.mxu0 %vm712_vm3, %v7809_v63  ;;  %v548_v23 = vrot.slane %v546_v2, 5  ;;  %v554_v25 = vrot.slane %v552_v3, 5  ;;  %v7843_v28 = vcombine.low %v248_v17, %v10066_v35  ;;  %v567_v29 = vshrl.u32 %v250_v50, 16 }
  0x46   : > { %v531_v30 = vsel %vm9908_vm4, %v526_v14, %v530_v55  ;;  %v536_v33 = vrot.slane %v535_v52, 4  ;;  %v558_v34 = vrot.slane %v556_v7, 4  ;;  %v564_v37 = vrot.slane %v562_v16, 5  ;;  %v10104_v55 = vld [vmem:[%s9880_s8 + $0xa0] sm:$0xf] }
  0x47   : > { %v549_v39 = vor.u32 %v548_v23, %v545_v1  ;;  %8966 = vmatmul.mubr.msk.bf16.gmra.mxu1 %vm712_vm3, %v7843_v28  ;;  %v569_v41 = vrot.slane %v567_v29, 4  ;;  %v570_v24 = vshll.u32 %v250_v50, 16  ;;  %v576_v43 = vshll.u32 %v10085_v13, 16 }
  0x48   : > { %v541_v17 = vsel %vm9908_vm4, %v536_v33, %v540_v57  ;;  %v559_v46 = vor.u32 %v558_v34, %v554_v25  ;;  %v580_v48 = vshrl.u32 %v10085_v13, 16  ;;  %v586_v53 = vshll.u32 %v10090_v18, 16  ;;  %v254_v57 = vld [vmem:[%s9880_s8 + $0xa8] sm:$0xf] }
  0x49   : > { %v7810_v56 = vcombine.low %v531_v30, %v541_v17  ;;  %v550_v8 = vrot.slane %v549_v39, 4  ;;  %v572_v58 = vrot.slane %v570_v24, 5  ;;  %v578_v59 = vrot.slane %v576_v43, 5  ;;  %v10120_v30 = vld [vmem:[%s9880_s8 + $0xac] sm:$0xf] }
  0x4a   : > { %v560_v63 = vrot.slane %v559_v46, 4  ;;  %v582_v1 = vrot.slane %v580_v48, 4  ;;  %v588_v2 = vrot.slane %v586_v53, 5  ;;  %v7844_v3 = vcombine.low %v250_v50, %v10085_v13  ;;  %v256_v46 = vld [vmem:[%s9880_s8 + $0xb4] sm:$0xf] }
  0x4b   : > { %8931 = vmatprep.mubr.msk.bf16.mxu0 %vm712_vm3, %v7810_v56  ;;  %v555_v14 = vsel %vm9908_vm4, %v550_v8, %v554_v25  ;;  %v573_v52 = vor.u32 %v572_v58, %v569_v41  ;;  %v591_v7 = vshrl.u32 %v252_v38, 16  ;;  %v594_v16 = vshll.u32 %v252_v38, 16  ;;  %v10123_v41 = vld [vmem:[%s9880_s8 + $0xb0] sm:$0x1] }
  0x4c   : > { %v565_v23 = vsel %vm9908_vm4, %v560_v63, %v564_v37  ;;  %v583_v28 = vor.u32 %v582_v1, %v578_v59  ;;  %8969 = vmatprep.mubr.msk.bf16.mxu1 %vm712_vm3, %v7844_v3  ;;  %v600_v29 = vshll.u32 %v10104_v55, 16  ;;  %v604_v50 = vshrl.u32 %v10104_v55, 16 }
  0x4d   : > { %v7811_v33 = vcombine.low %v555_v14, %v565_v23  ;;  %v574_v34 = vrot.slane %v573_v52, 4  ;;  %v593_v39 = vrot.slane %v591_v7, 4  ;;  %v596_v25 = vrot.slane %v594_v16, 5  ;;  %v10134_v14 = vld [vmem:[%s9880_s8 + $0xb8] sm:$0xf] }
  0x4e   : > { %v584_v37 = vrot.slane %v583_v28, 4  ;;  %v602_v24 = vrot.slane %v600_v29, 5  ;;  %v606_v43 = vrot.slane %v604_v50, 4  ;;  %v610_v17 = vshll.u32 %v10107_v61, 16  ;;  %v10139_v23 = vld [vmem:[%s9880_s8 + $0xbc] sm:$0x1] }
  0x4f   : > { %8932 = vmatmul.mubr.msk.bf16.gmra.mxu0 %vm712_vm3, %v7811_v33  ;;  %v579_v48 = vsel %vm9908_vm4, %v574_v34, %v578_v59  ;;  %v597_v53 = vor.u32 %v596_v25, %v593_v39  ;;  %v7845_v56 = vcombine.low %v252_v38, %v10104_v55  ;;  %v615_v8 = vshrl.u32 %v254_v57, 16  ;;  %v1218_v50 = vld [vmem:[%s9880_s8] sm:$0xe] }
  0x50   : > { %v589_v58 = vsel %vm9908_vm4, %v584_v37, %v588_v2  ;;  %v607_v63 = vor.u32 %v606_v43, %v602_v24  ;;  %v612_v1 = vrot.slane %v610_v17, 5  ;;  %v618_v3 = vshll.u32 %v254_v57, 16 }
  0x51   : > { %v7812_v52 = vcombine.low %v579_v48, %v589_v58  ;;  %v598_v7 = vrot.slane %v597_v53, 4  ;;  %8970 = vmatmul.mubr.msk.bf16.gmra.mxu1 %vm712_vm3, %v7845_v56  ;;  %v617_v16 = vrot.slane %v615_v8, 4  ;;  %v624_v59 = vshll.u32 %v10120_v30, 16  ;;  %v10153_v53 = vld [vmem:[%s13172_s1 + $0xa] sm:$0x3] }
  0x52   : > { %v608_v38 = vrot.slane %v607_v63, 4  ;;  %v620_v28 = vrot.slane %v618_v3, 5  ;;  %v628_v29 = vshrl.u32 %v10120_v30, 16  ;;  %v634_v2 = vshll.u32 %v10123_v41, 16  ;;  %9652 = vmatprep.subr.msk.bf16.mxu1 %vm761_vm0, %v10153_v53 }
  0x53   : > { %8935 = vmatprep.mubr.msk.bf16.mxu0 %vm712_vm3, %v7812_v52  ;;  %v603_v33 = vsel %vm9908_vm4, %v598_v7, %v602_v24  ;;  %v626_v34 = vrot.slane %v624_v59, 5  ;;  %v7846_v39 = vcombine.low %v254_v57, %v10120_v30  ;;  %v639_v25 = vshrl.u32 %v256_v46, 16  ;;  %v1219_v52 = vld [vmem:[%s9880_s8 + $0xc] sm:$0xe] }
  0x54   : > { %v613_v37 = vsel %vm9908_vm4, %v608_v38, %v612_v1  ;;  %v621_v43 = vor.u32 %v620_v28, %v617_v16  ;;  %v630_v17 = vrot.slane %v628_v29, 4  ;;  %v636_v48 = vrot.slane %v634_v2, 5  ;;  %v9682_v7 = vld [vmem:[%s9880_s8 + $0xc] sm:$0xff]   ;;  %v1220_v29 = vld [vmem:[%s9880_s8 + $0x18] sm:$0xe] }
  0x55   : > { %v7813_v56 = vcombine.low %v603_v33, %v613_v37  ;;  %8973 = vmatprep.mubr.msk.bf16.mxu1 %vm712_vm3, %v7846_v39  ;;  %v641_v24 = vrot.slane %v639_v25, 4  ;;  %v642_v57 = vshll.u32 %v256_v46, 16  ;;  %v648_v8 = vshll.u32 %v10134_v14, 16 }
  0x56   : > { %v622_v58 = vrot.slane %v621_v43, 4  ;;  %v631_v63 = vor.u32 %v630_v17, %v626_v34  ;;  %v652_v1 = vshrl.u32 %v10134_v14, 16  ;;  %v658_v3 = vshll.u32 %v10139_v23, 16 }
  0x57   : > { %8936 = vmatmul.mubr.msk.bf16.gmra.mxu0 %vm712_vm3, %v7813_v56  ;;  %v644_v16 = vrot.slane %v642_v57, 5  ;;  %v650_v59 = vrot.slane %v648_v8, 5  ;;  %v7847_v38 = vcombine.low %v256_v46, %v10134_v14  ;;  %v7864_v28 = vrot.slane %v1218_v50, 9 }
  0x58   : > { %v627_v2 = vsel %vm9908_vm4, %v622_v58, %v626_v34  ;;  %v632_v33 = vrot.slane %v631_v63, 4  ;;  %v654_v39 = vrot.slane %v652_v1, 4  ;;  %v660_v25 = vrot.slane %v658_v3, 5  ;;  %v1221_v1 = vld [vmem:[%s9880_s8 + $0x24] sm:$0xe] }
  0x59   : > { %v645_v43 = vor.u32 %v644_v16, %v641_v24  ;;  %8974 = vmatmul.mubr.msk.bf16.gmra.mxu1 %vm712_vm3, %v7847_v38  ;;  %v1271_v46 = vrot.slane %v9884_v11, 5  ;;  %v7865_v50 = vrot.slane %v1219_v52, 9  ;;  %v1280_v34 = vrot.slane %v1278_v40, 4  ;;  %v1223_v38 = vld [vmem:[%s9880_s8 + $0x3c] sm:$0xe] }
  0x5a   : > { %v637_v17 = vsel %vm9908_vm4, %v632_v33, %v636_v48  ;;  %v655_v56 = vor.u32 %v654_v39, %v650_v59  ;;  %9013 = vmatprep.mubr.msk.bf16.mxu1 %vm712_vm3, %v9682_v7  ;;  %v7866_v57 = vrot.slane %v1220_v29, 9  ;;  %v1285_v8 = vrot.slane %v9914_v45, 5  ;;  %v1222_v7 = vld [vmem:[%s9880_s8 + $0x30] sm:$0xe]  ;;  %v9684_v39 = vld [vmem:[%s9880_s8 + $0x24] sm:$0xff]  }
  0x5b   : > { %v7814_v24 = vcombine.low %v627_v2, %v637_v17  ;;  %v646_v58 = vrot.slane %v645_v43, 4  ;;  %v1272_v11 = vsel %vm10170_vm7, %v7864_v28, %v1271_v46  ;;  %v1273_v63 = vrot.slane %v1271_v46, 4  ;;  %v1224_v46 = vld [vmem:[%s9880_s8 + $0x48] sm:$0xe] }
  0x5c   : > { %v656_v3 = vrot.slane %v655_v56, 4  ;;  %v10189_v48 = vsel %vm10170_vm7, %v7865_v50, %v1278_v40  ;;  %v10195_v45 = vsel %vm10170_vm7, %v1280_v34, %v1281_v47  ;;  %v10199_v52 = vsel %vm10170_vm7, %v7866_v57, %v1285_v8  ;;  %v9683_v47 = vld [vmem:[%s9880_s8 + $0x18] sm:$0xff]   ;;  %v1225_v57 = vld [vmem:[%s9880_s8 + $0x54] sm:$0xe] }
  0x5d   : > { %8939 = vmatprep.mubr.msk.bf16.mxu0 %vm712_vm3, %v7814_v24  ;;  %v651_v21 = vsel %vm9908_vm4, %v646_v58, %v650_v59  ;;  %v1275_v22 = vsel %vm10170_vm7, %v1273_v63, %v1274_v19  ;;  %v7882_v40 = vcombine.low %v10189_v48, %v10195_v45  ;;  %v1287_v16 = vrot.slane %v1285_v8, 4 }
  0x5e   : > { %v661_v28 = vsel %vm9908_vm4, %v656_v3, %v660_v25  ;;  %v7881_v29 = vcombine.low %v1272_v11, %v1275_v22  ;;  %v1288_v2 = vrot.slane %v9919_v49, 5  ;;  %v7867_v33 = vrot.slane %v1221_v1, 9  ;;  %v1226_v1 = vld [vmem:[%s9880_s8 + $0x60] sm:$0xe] }
  0x5f   : > { %v7815_v59 = vcombine.low %v651_v21, %v661_v28  ;;  %v1292_v12 = vrot.slane %v9931_v0, 5  ;;  %v1295_v19 = vrot.slane %v9938_v4, 5  ;;  %v7868_v43 = vrot.slane %v1222_v7, 9  ;;  %v9685_v7 = vld [vmem:[%s9880_s8 + $0x30] sm:$0xff]  }
  0x60   : > { %v1289_v50 = vsel %vm10170_vm7, %v1287_v16, %v1288_v2  ;;  %v1299_v34 = vrot.slane %v9948_v27, 5  ;;  %v1302_v25 = vrot.slane %v9953_v31, 5  ;;  %v7869_v17 = vrot.slane %v1223_v38, 9  ;;  %v9686_v2 = vld [vmem:[%s9880_s8 + $0x3c] sm:$0xff]  }
  0x61   : > { %8940 = vmatmul.mubr.msk.bf16.gmra.mxu0 %vm712_vm3, %v7815_v59  ;;  %9014 = vmatmul.mubr.msk.bf16.vlgmr.msra.gmra.mxu1 %vm712_vm3, %v9683_v47  ;;  %v7883_v49 = vcombine.low %v10199_v52, %v1289_v50  ;;  %v10229_v0 = vsel %vm10170_vm7, %v7867_v33, %v1292_v12  ;;  %v1294_v4 = vrot.slane %v1292_v12, 4  ;;  %v1306_v56 = vrot.slane %v9968_v54, 5  ;;  %v1227_v52 = vld [vmem:[%s9880_s8 + $0x6c] sm:$0xe] }
  0x62   : > { %8979 = vmatprep.mubr.msk.bf16.mxu0 %vm712_vm3, %v7881_v29  ;;  %9017 = vmatprep.mubr.msk.bf16.mxu1 %vm712_vm3, %v9684_v39  ;;  %v10237_v27 = vsel %vm10170_vm7, %v7868_v43, %v1299_v34  ;;  %v1301_v31 = vrot.slane %v1299_v34, 4  ;;  %v1309_v8 = vrot.slane %v9975_v60, 5  ;;  %v7870_v24 = vrot.slane %v1224_v46, 9  ;;  %v1228_v29 = vld [vmem:[%s9880_s8 + $0x78] sm:$0xe] }
  0x63   : > { %v10242_v58 = vsel %vm10170_vm7, %v1294_v4, %v1295_v19  ;;  %v10246_v54 = vsel %vm10170_vm7, %v7869_v17, %v1306_v56  ;;  %v1308_v11 = vrot.slane %v1306_v56, 4  ;;  %v1313_v63 = vrot.slane %v9985_v20, 5  ;;  %v1229_v46 = vld [vmem:[%s9880_s8 + $0x84] sm:$0xe]  ;;  %v10292_v50 = vld [vmem:[%s13172_s1 + $0xc] sm:$0x3] }
  0x64   : > { %v7884_v3 = vcombine.low %v10229_v0, %v10242_v58  ;;  %v10254_v60 = vsel %vm10170_vm7, %v1301_v31, %v1302_v25  ;;  %v1316_v48 = vrot.slane %v9992_v26, 5  ;;  %v7871_v45 = vrot.slane %v1225_v57, 9  ;;  %v1230_v56 = vld [vmem:[%s9880_s8 + $0x90] sm:$0xe]  ;;  %v1231_v31 = vld [vmem:[%s9880_s8 + $0x9c] sm:$0xe] }
  0x65   : > { %v7885_v21 = vcombine.low %v10237_v27, %v10254_v60  ;;  %v10263_v20 = vsel %vm10170_vm7, %v1308_v11, %v1309_v8  ;;  %v10267_v22 = vsel %vm10170_vm7, %v7870_v24, %v1313_v63  ;;  %v1315_v47 = vrot.slane %v1313_v63, 4  ;;  %v9687_v63 = vld [vmem:[%s9880_s8 + $0x48] sm:$0xff]  }
  0x66   : > { %v7886_v16 = vcombine.low %v10246_v54, %v10263_v20  ;;  %v1320_v26 = vrot.slane %v10002_v44, 5  ;;  %v1323_v38 = vrot.slane %v10009_v51, 5  ;;  %v7872_v28 = vrot.slane %v1226_v1, 9 }
  0x67   : > { %v10277_v33 = vsel %vm10170_vm7, %v1315_v47, %v1316_v48  ;;  %v1327_v39 = vrot.slane %v10019_v5, 5  ;;  %v1330_v59 = vrot.slane %v10024_v15, 5  ;;  %v7873_v12 = vrot.slane %v1227_v52, 9  ;;  %v1232_v52 = vld [vmem:[%s9880_s8 + $0xa8] sm:$0xe] }
  0x68   : > { %v7887_v19 = vcombine.low %v10267_v22, %v10277_v33  ;;  %v10285_v44 = vsel %vm10170_vm7, %v7871_v45, %v1320_v26  ;;  %v1322_v51 = vrot.slane %v1320_v26, 4  ;;  %v1334_v43 = vrot.slane %v10032_v32, 5  ;;  %v8060_v22 = vld [vmem:[%s9880_s8 + $0x18] sm:$0xe] }
  0x69   : > { %8980 = vmatmul.mubr.msk.bf16.vlgmr.msra.gmra.mxu0 %vm712_vm3, %v7882_v40  ;;  %9018 = vmatmul.mubr.msk.bf16.gmra.mxu1 %vm712_vm3, %v9685_v7  ;;  %v10298_v5 = vsel %vm10170_vm7, %v7872_v28, %v1327_v39  ;;  %v1329_v15 = vrot.slane %v1327_v39, 4  ;;  %v1337_v34 = vrot.slane %v10039_v6, 5  ;;  %v7874_v25 = vrot.slane %v1228_v29, 9  ;;  %v9688_v7 = vld [vmem:[%s9880_s8 + $0x54] sm:$0xff]  }
  0x6a   : > { %9046 = vmatpush3.bf16.msra.mxu0 %v9875_v9  ;;  %8983 = vmatprep.mubr.msk.bf16.mxu0 %vm712_vm3, %v7883_v49  ;;  %v10305_v32 = vsel %vm10170_vm7, %v1322_v51, %v1323_v38  ;;  %v10309_v40 = vsel %vm10170_vm7, %v7873_v12, %v1334_v43  ;;  %v1336_v17 = vrot.slane %v1334_v43, 4  ;;  %v1341_v4 = vrot.slane %v10052_v62, 5  ;;  %v1233_v39 = vld [vmem:[%s9880_s8 + $0xb4] sm:$0xe] }
  0x6b   : > { %9021 = vmatprep.mubr.msk.bf16.mxu1 %vm712_vm3, %v9686_v2  ;;  %v7888_v9 = vcombine.low %v10285_v44, %v10305_v32  ;;  %v10318_v6 = vsel %vm10170_vm7, %v1329_v15, %v1330_v59  ;;  %v1344_v49 = vrot.slane %v10055_v10, 5  ;;  %v7875_v57 = vrot.slane %v1229_v46, 9  ;;  %9653 = vmatprep.subr.msk.bf16.mxu0 %vm761_vm0, %v10292_v50  ;;  %v10388_v15 = vld [vmem:[%s9880_s8 + $0x10] sm:$0xf] }
  0x6c   : > { %v7889_v62 = vcombine.low %v10298_v5, %v10318_v6  ;;  %v10328_v8 = vsel %vm10170_vm7, %v1336_v17, %v1337_v34  ;;  %v10332_v24 = vsel %vm10170_vm7, %v7874_v25, %v1341_v4  ;;  %v1343_v11 = vrot.slane %v1341_v4, 4  ;;  %v10403_v4 = vld [vmem:[%s9880_s8 + $0x14] sm:$0x1] }
  0x6d   : > { %v7890_v10 = vcombine.low %v10309_v40, %v10328_v8  ;;  %v1348_v1 = vrot.slane %v10066_v35, 5  ;;  %v1351_v48 = vrot.slane %v10071_v42, 5  ;;  %v7876_v45 = vrot.slane %v1230_v56, 9  ;;  %v9689_v56 = vld [vmem:[%s9880_s8 + $0x60] sm:$0xff]  }
  0x6e   : > { %v10343_v47 = vsel %vm10170_vm7, %v1343_v11, %v1344_v49  ;;  %v1355_v26 = vrot.slane %v10085_v13, 5  ;;  %v1358_v38 = vrot.slane %v10090_v18, 5  ;;  %v7877_v28 = vrot.slane %v1231_v31, 9 }
  0x6f   : > { %v7891_v29 = vcombine.low %v10332_v24, %v10343_v47  ;;  %v10351_v35 = vsel %vm10170_vm7, %v7875_v57, %v1348_v1  ;;  %v1350_v42 = vrot.slane %v1348_v1, 4  ;;  %v1362_v2 = vrot.slane %v10104_v55, 5 }
  0x70   : > { %v10357_v59 = vsel %vm10170_vm7, %v7876_v45, %v1355_v26  ;;  %v1357_v13 = vrot.slane %v1355_v26, 4  ;;  %v1365_v18 = vrot.slane %v10107_v61, 5  ;;  %v7878_v12 = vrot.slane %v1232_v52, 9  ;;  %v10423_v45 = vld [vmem:[%s9880_s8 + $0x1c] sm:$0xf] }
  0x71   : > { %8984 = vmatmul.mubr.msk.bf16.gmra.mxu0 %vm712_vm3, %v7884_v3  ;;  %9022 = vmatmul.mubr.msk.bf16.gmra.mxu1 %vm712_vm3, %v9687_v63  ;;  %v10367_v55 = vsel %vm10170_vm7, %v1350_v42, %v1351_v48  ;;  %v10371_v51 = vsel %vm10170_vm7, %v7877_v28, %v1362_v2  ;;  %v1364_v43 = vrot.slane %v1362_v2, 4  ;;  %v1369_v46 = vrot.slane %v10120_v30, 5  ;;  %v7978_v30 = vld [vmem:[%s9880_s8 + $0xc] sm:$0xf]  ;;  %v10431_v2 = vld [vmem:[%s9880_s8 + $0x20] sm:$0x1] }
  0x72   : > { %8987 = vmatprep.mubr.msk.bf16.mxu0 %vm712_vm3, %v7885_v21  ;;  %9025 = vmatprep.mubr.msk.bf16.mxu1 %vm712_vm3, %v9688_v7  ;;  %v7892_v61 = vcombine.low %v10351_v35, %v10367_v55  ;;  %v10383_v0 = vsel %vm10170_vm7, %v1357_v13, %v1358_v38  ;;  %v1372_v58 = vrot.slane %v10123_v41, 5  ;;  %v7879_v3 = vrot.slane %v1233_v39, 9  ;;  %v9690_v63 = vld [vmem:[%s9880_s8 + $0x6c] sm:$0xff]  }
  0x73   : > { %v7893_v27 = vcombine.low %v10357_v59, %v10383_v0  ;;  %v10394_v60 = vsel %vm10170_vm7, %v1364_v43, %v1365_v18  ;;  %v1371_v21 = vrot.slane %v1369_v46, 4  ;;  %v1376_v25 = vrot.slane %v10134_v14, 5  ;;  %v7981_v14 = vld [vmem:[%s9880_s8 + $0x18] sm:$0xf] }
  0x74   : > { %v7894_v34 = vcombine.low %v10371_v51, %v10394_v60  ;;  %v1379_v41 = vrot.slane %v10139_v23, 5  ;;  %v3035_v17 = vsel %vm761_vm0, %v10153_v53, 0  ;;  %v10408_v49 = vsel %vm10170_vm7, %v7878_v12, %v1369_v46 }
  0x75   : > { %9080 = vmatpush3.bf16.msra.mxu1 %v3035_v17  ;;  %v2083_v57 = vshrl.u32 %v7978_v30, 16  ;;  %v2086_v31 = vshll.u32 %v7978_v30, 16  ;;  %v2092_v11 = vshll.u32 %v10388_v15, 16  ;;  %v10415_v23 = vsel %vm10170_vm7, %v1371_v21, %v1372_v58  ;;  %v8059_v58 = vld [vmem:[%s9880_s8 + $0xc] sm:$0xe] }
  0x76   : > { %v10419_v53 = vsel %vm10170_vm7, %v7879_v3, %v1376_v25  ;;  %v1378_v1 = vrot.slane %v1376_v25, 4  ;;  %v2096_v48 = vshrl.u32 %v10388_v15, 16  ;;  %v2102_v38 = vshll.u32 %v10403_v4, 16 }
  0x77   : > { %v2085_v52 = vrot.slane %v2083_v57, 4  ;;  %v2088_v7 = vrot.slane %v2086_v31, 5  ;;  %v2094_v26 = vrot.slane %v2092_v11, 5  ;;  %v2107_v39 = vshrl.u32 %v7981_v14, 16  ;;  %v9691_v57 = vld [vmem:[%s9880_s8 + $0x78] sm:$0xff]  }
  0x78   : > { %v10428_v28 = vsel %vm10170_vm7, %v1378_v1, %v1379_v41  ;;  %v2098_v42 = vrot.slane %v2096_v48, 4  ;;  %v2110_v13 = vshll.u32 %v7981_v14, 16  ;;  %v2104_v43 = vrot.slane %v2102_v38, 5  ;;  %v7984_v1 = vld [vmem:[%s9880_s8 + $0x24] sm:$0xf] }
  0x79   : > { %8988 = vmatmul.mubr.msk.bf16.gmra.mxu0 %vm712_vm3, %v7886_v16  ;;  %9026 = vmatmul.mubr.msk.bf16.gmra.mxu1 %vm712_vm3, %v9689_v56  ;;  %v7896_v18 = vcombine.low %v10419_v53, %v10428_v28  ;;  %v2089_v12 = vor.u32 %v2088_v7, %v2085_v52  ;;  %v2116_v46 = vshll.u32 %v10423_v45, 16  ;;  %v2109_v20 = vrot.slane %v2107_v39, 4  ;;  %v9692_v48 = vld [vmem:[%s9880_s8 + $0x84] sm:$0xff]  }
  0x7a   : > { %8991 = vmatprep.mubr.msk.bf16.mxu0 %vm712_vm3, %v7887_v19  ;;  %9029 = vmatprep.mubr.msk.bf16.mxu1 %vm712_vm3, %v9690_v63  ;;  %v2099_v54 = vor.u32 %v2098_v42, %v2094_v26  ;;  %v2112_v16 = vrot.slane %v2110_v13, 5  ;;  %v2120_v3 = vshrl.u32 %v10423_v45, 16  ;;  %v7895_v30 = vcombine.low %v10408_v49, %v10415_v23  ;;  %v10462_v39 = vld [vmem:[%s9880_s8 + $0x28] sm:$0xf] }
  0x7b   : > { %v2090_v21 = vrot.slane %v2089_v12, 4  ;;  %v2118_v25 = vrot.slane %v2116_v46, 5  ;;  %v2126_v41 = vshll.u32 %v10431_v2, 16  ;;  %v8075_v56 = vrot.slane %v8059_v58, 9  ;;  %v10474_v12 = vld [vmem:[%s9880_s8 + $0x2c] sm:$0x1] }
  0x7c   : > { %v2100_v33 = vrot.slane %v2099_v54, 4  ;;  %v2113_v19 = vor.u32 %v2112_v16, %v2109_v20  ;;  %v2122_v17 = vrot.slane %v2120_v3, 4  ;;  %v2826_v14 = vrot.slane %v10388_v15, 5  ;;  %v7987_v46 = vld [vmem:[%s9880_s8 + $0x30] sm:$0xf] }
  0x7d   : > { %v2095_v31 = vsel %vm9908_vm4, %v2090_v21, %v2094_v26  ;;  %v2128_v11 = vrot.slane %v2126_v41, 5  ;;  %v2829_v63 = vrot.slane %v10403_v4, 5  ;;  %v8076_v42 = vrot.slane %v8060_v22, 9  ;;  %v10512_v41 = vld [vmem:[%s9880_s8 + $0x38] sm:$0x1] }
  0x7e   : > { %v2105_v52 = vsel %vm9908_vm4, %v2100_v33, %v2104_v43  ;;  %v2114_v7 = vrot.slane %v2113_v19, 4  ;;  %v2123_v38 = vor.u32 %v2122_v17, %v2118_v25  ;;  %v10466_v26 = vsel %vm761_vm0, %v10292_v50, 0  ;;  %v10481_v50 = vld [vmem:[%s9880_s8 + $0x34] sm:$0xf] }
  0x7f   : > { %v10470_v15 = vsel %vm10170_vm7, %v8075_v56, %v2826_v14  ;;  %v2828_v4 = vrot.slane %v2826_v14, 4  ;;  %v2833_v13 = vrot.slane %v10423_v45, 5  ;;  %v2836_v54 = vrot.slane %v10431_v2, 5  ;;  %v10497_v2 = vld [vmem:[%s13172_s1 + $0xe] sm:$0x3] }
  0x80   : > { %v2119_v43 = vsel %vm9908_vm4, %v2114_v7, %v2118_v25  ;;  %v2124_v58 = vrot.slane %v2123_v38, 4  ;;  %v2131_v20 = vshrl.u32 %v7984_v1, 16  ;;  %v10488_v45 = vcombine.low %v2095_v31, %v2105_v52  ;;  %9654 = vmatprep.subr.msk.bf16.mxu1 %vm761_vm0, %v10497_v2 }
  0x81   : > { %8992 = vmatmul.mubr.msk.bf16.gmra.mxu0 %vm712_vm3, %v7888_v9  ;;  %9030 = vmatmul.mubr.msk.bf16.gmra.mxu1 %vm712_vm3, %v9691_v57  ;;  %v10492_v16 = vsel %vm10170_vm7, %v2828_v4, %v2829_v63  ;;  %v2835_v3 = vrot.slane %v2833_v13, 4  ;;  %v2134_v21 = vshll.u32 %v7984_v1, 16  ;;  %v10508_v32 = vsel %vm10170_vm7, %v8076_v42, %v2833_v13  ;;  %v9693_v57 = vld [vmem:[%s9880_s8 + $0x90] sm:$0xff]   ;;  %v8061_v1 = vld [vmem:[%s9880_s8 + $0x24] sm:$0xe] }
  0x82   : > { %8995 = vmatprep.mubr.msk.bf16.mxu0 %vm712_vm3, %v7889_v62  ;;  %9033 = vmatprep.mubr.msk.bf16.mxu1 %vm712_vm3, %v9692_v48  ;;  %v2129_v44 = vsel %vm9908_vm4, %v2124_v58, %v2128_v11  ;;  %v2133_v9 = vrot.slane %v2131_v20, 4  ;;  %v2140_v25 = vshll.u32 %v10462_v39, 16  ;;  %v8092_v6 = vcombine.low %v10470_v15, %v10492_v16  ;;  %v9694_v48 = vld [vmem:[%s9880_s8 + $0x9c] sm:$0xff]   ;;  %v10674_v15 = vld [vmem:[%s9880_s8 + $0x68] sm:$0x1] }
  0x83   : > { %v10514_v5 = vcombine.low %v2119_v43, %v2129_v44  ;;  %v2136_v62 = vrot.slane %v2134_v21, 5  ;;  %v2144_v22 = vshrl.u32 %v10462_v39, 16  ;;  %v10523_v33 = vsel %vm10170_vm7, %v2835_v3, %v2836_v54  ;;  %v8062_v54 = vld [vmem:[%s9880_s8 + $0x30] sm:$0xe]  ;;  %v7990_v44 = vld [vmem:[%s9880_s8 + $0x3c] sm:$0xf] }
  0x84   : > { %v2142_v19 = vrot.slane %v2140_v25, 5  ;;  %v2150_v17 = vshll.u32 %v10474_v12, 16  ;;  %v2155_v56 = vshrl.u32 %v7987_v46, 16  ;;  %v2158_v14 = vshll.u32 %v7987_v46, 16 }
  0x85   : > { %v2137_v31 = vor.u32 %v2136_v62, %v2133_v9  ;;  %v2146_v11 = vrot.slane %v2144_v22, 4  ;;  %v2164_v63 = vshll.u32 %v10481_v50, 16  ;;  %v2168_v38 = vshrl.u32 %v10481_v50, 16 }
  0x86   : > { %v2152_v52 = vrot.slane %v2150_v17, 5  ;;  %v2157_v7 = vrot.slane %v2155_v56, 4  ;;  %v2174_v42 = vshll.u32 %v10512_v41, 16  ;;  %v2160_v43 = vrot.slane %v2158_v14, 5  ;;  %v10544_v17 = vld [vmem:[%s9880_s8 + $0x40] sm:$0xf] }
  0x87   : > { %v2138_v4 = vrot.slane %v2137_v31, 4  ;;  %v2147_v13 = vor.u32 %v2146_v11, %v2142_v19  ;;  %v2166_v58 = vrot.slane %v2164_v63, 5  ;;  %v8093_v46 = vcombine.low %v10508_v32, %v10523_v33  ;;  %v10566_v31 = vld [vmem:[%s9880_s8 + $0x44] sm:$0x1]  ;;  %v9695_v14 = vld [vmem:[%s9880_s8 + $0xa8] sm:$0xff]  }
  0x88   : > { %v2170_v20 = vrot.slane %v2168_v38, 4  ;;  %v8077_v3 = vrot.slane %v8061_v1, 9  ;;  %v2840_v21 = vrot.slane %v10462_v39, 5  ;;  %v2161_v25 = vor.u32 %v2160_v43, %v2157_v7  ;;  %v10577_v7 = vld [vmem:[%s9880_s8 + $0x4c] sm:$0xf]  ;;  %v9696_v38 = vld [vmem:[%s9880_s8 + $0xb4] sm:$0xff]  }
  0x89   : > { %8996 = vmatmul.mubr.msk.bf16.gmra.mxu0 %vm712_vm3, %v7890_v10  ;;  %9034 = vmatmul.mubr.msk.bf16.gmra.mxu1 %vm712_vm3, %v9693_v57  ;;  %v2148_v9 = vrot.slane %v2147_v13, 4  ;;  %v2176_v62 = vrot.slane %v2174_v42, 5  ;;  %v2843_v22 = vrot.slane %v10474_v12, 5  ;;  %v2143_v40 = vsel %vm9908_vm4, %v2138_v4, %v2142_v19  ;;  %v10584_v43 = vld [vmem:[%s9880_s8 + $0x50] sm:$0x1] }
  0x8a   : > { %8999 = vmatprep.mubr.msk.bf16.mxu0 %vm712_vm3, %v7891_v29  ;;  %9037 = vmatprep.mubr.msk.bf16.mxu1 %vm712_vm3, %v9694_v48  ;;  %v2171_v8 = vor.u32 %v2170_v20, %v2166_v58  ;;  %v10555_v10 = vsel %vm10170_vm7, %v8077_v3, %v2840_v21  ;;  %v2842_v39 = vrot.slane %v2840_v21, 4  ;;  %v2162_v24 = vrot.slane %v2161_v25, 4  ;;  %v8063_v21 = vld [vmem:[%s9880_s8 + $0x3c] sm:$0xe]  ;;  %v10711_v33 = vld [vmem:[%s9880_s8 + $0x70] sm:$0xf] }
  0x8b   : > { %v2153_v12 = vsel %vm9908_vm4, %v2148_v9, %v2152_v52  ;;  %v8078_v47 = vrot.slane %v8062_v54, 9  ;;  %v2847_v29 = vrot.slane %v10481_v50, 5  ;;  %v2850_v57 = vrot.slane %v10512_v41, 5  ;;  %v7993_v52 = vld [vmem:[%s9880_s8 + $0x48] sm:$0xf] }
  0x8c   : > { %v2172_v56 = vrot.slane %v2171_v8, 4  ;;  %v10562_v19 = vsel %vm10170_vm7, %v2842_v39, %v2843_v22  ;;  %v2179_v11 = vshrl.u32 %v7990_v44, 16  ;;  %v10569_v63 = vcombine.low %v2143_v40, %v2153_v12  ;;  %v8064_v22 = vld [vmem:[%s9880_s8 + $0x48] sm:$0xe] }
  0x8d   : > { %v2167_v1 = vsel %vm9908_vm4, %v2162_v24, %v2166_v58  ;;  %v8094_v50 = vcombine.low %v10555_v10, %v10562_v19  ;;  %v2849_v48 = vrot.slane %v2847_v29, 4  ;;  %v2182_v4 = vshll.u32 %v7990_v44, 16 }
  0x8e   : > { %v2177_v41 = vsel %vm9908_vm4, %v2172_v56, %v2176_v62  ;;  %v2181_v42 = vrot.slane %v2179_v11, 4  ;;  %v2188_v13 = vshll.u32 %v10544_v17, 16  ;;  %v10590_v58 = vsel %vm10170_vm7, %v8078_v47, %v2847_v29 }
  0x8f   : > { %v10586_v54 = vcombine.low %v2167_v1, %v2177_v41  ;;  %v2192_v20 = vshrl.u32 %v10544_v17, 16  ;;  %v2198_v3 = vshll.u32 %v10566_v31, 16  ;;  %v10597_v9 = vsel %vm10170_vm7, %v2849_v48, %v2850_v57  ;;  %v7996_v41 = vld [vmem:[%s9880_s8 + $0x54] sm:$0xf] }
  0x90   : > { %v2184_v44 = vrot.slane %v2182_v4, 5  ;;  %v2190_v25 = vrot.slane %v2188_v13, 5  ;;  %v2203_v62 = vshrl.u32 %v7993_v52, 16  ;;  %v2206_v39 = vshll.u32 %v7993_v52, 16 }
  0x91   : > { %9000 = vmatmul.mubr.msk.bf16.gmra.mxu0 %vm712_vm3, %v7892_v61  ;;  %9038 = vmatmul.mubr.msk.bf16.gmra.mxu1 %vm712_vm3, %v9695_v14  ;;  %v2194_v40 = vrot.slane %v2192_v20, 4  ;;  %v2200_v8 = vrot.slane %v2198_v3, 5  ;;  %v2212_v12 = vshll.u32 %v10577_v7, 16  ;;  %v2216_v35 = vshrl.u32 %v10577_v7, 16  ;;  %v10624_v3 = vld [vmem:[%s9880_s8 + $0x58] sm:$0xf] }
  0x92   : > { %9003 = vmatprep.mubr.msk.bf16.mxu0 %vm712_vm3, %v7893_v27  ;;  %9041 = vmatprep.mubr.msk.bf16.mxu1 %vm712_vm3, %v9696_v38  ;;  %v2185_v24 = vor.u32 %v2184_v44, %v2181_v42  ;;  %v2205_v47 = vrot.slane %v2203_v62, 4  ;;  %v2222_v55 = vshll.u32 %v10584_v43, 16  ;;  %v2208_v29 = vrot.slane %v2206_v39, 5  ;;  %v9697_v27 = vld [vmem:[%s9880_s8 + $0xc0] sm:$0xff]  }
  0x93   : > { %v2195_v61 = vor.u32 %v2194_v40, %v2190_v25  ;;  %v2214_v56 = vrot.slane %v2212_v12, 5  ;;  %v8079_v57 = vrot.slane %v8063_v21, 9  ;;  %v2218_v14 = vrot.slane %v2216_v35, 4  ;;  %v10663_v35 = vld [vmem:[%s9880_s8 + $0x64] sm:$0xf] }
  0x94   : > { %v2186_v11 = vrot.slane %v2185_v24, 4  ;;  %v2224_v59 = vrot.slane %v2222_v55, 5  ;;  %v2854_v0 = vrot.slane %v10544_v17, 5  ;;  %v2209_v48 = vor.u32 %v2208_v29, %v2205_v47  ;;  %v10627_v17 = vld [vmem:[%s9880_s8 + $0x5c] sm:$0x1] }
  0x95   : > { %v2196_v1 = vrot.slane %v2195_v61, 4  ;;  %v2857_v52 = vrot.slane %v10566_v31, 5  ;;  %v8080_v38 = vrot.slane %v8064_v22, 9  ;;  %v2219_v4 = vor.u32 %v2218_v14, %v2214_v56  ;;  %v7999_v22 = vld [vmem:[%s9880_s8 + $0x60] sm:$0xf] }
  0x96   : > { %v2191_v42 = vsel %vm9908_vm4, %v2186_v11, %v2190_v25  ;;  %v10621_v13 = vsel %vm10170_vm7, %v8079_v57, %v2854_v0  ;;  %v2856_v20 = vrot.slane %v2854_v0, 4  ;;  %v2210_v44 = vrot.slane %v2209_v48, 4 }
  0x97   : > { %v2201_v21 = vsel %vm9908_vm4, %v2196_v1, %v2200_v8  ;;  %v2861_v31 = vrot.slane %v10577_v7, 5  ;;  %v2864_v62 = vrot.slane %v10584_v43, 5  ;;  %v8095_v25 = vcombine.low %v10590_v58, %v10597_v9  ;;  %v8068_v58 = vld [vmem:[%s9880_s8 + $0x78] sm:$0xe] }
  0x98   : > { %v2220_v40 = vrot.slane %v2219_v4, 4  ;;  %v10638_v39 = vsel %vm10170_vm7, %v2856_v20, %v2857_v52  ;;  %v2227_v12 = vshrl.u32 %v7996_v41, 16  ;;  %v10645_v7 = vcombine.low %v2191_v42, %v2201_v21  ;;  %v8066_v52 = vld [vmem:[%s9880_s8 + $0x60] sm:$0xe]  ;;  %v8002_v20 = vld [vmem:[%s9880_s8 + $0x6c] sm:$0xf] }
  0x99   : > { %9004 = vmatmul.mubr.msk.bf16.gmra.mxu0 %vm712_vm3, %v7894_v34  ;;  %9042 = vmatmul.mubr.msk.bf16.gmra.mxu1 %vm712_vm3, %v9697_v27  ;;  %v2215_v43 = vsel %vm9908_vm4, %v2210_v44, %v2214_v56  ;;  %v8096_v8 = vcombine.low %v10621_v13, %v10638_v39  ;;  %v2863_v24 = vrot.slane %v2861_v31, 4  ;;  %v2230_v34 = vshll.u32 %v7996_v41, 16  ;;  %v8065_v56 = vld [vmem:[%s9880_s8 + $0x54] sm:$0xe] }
  0x9a   : > { %9007 = vmatprep.mubr.msk.bf16.mxu0 %vm712_vm3, %v7895_v30  ;;  %9081 = vmatprep.mubr.msk.bf16.mxu1 %vm712_vm3, %v8092_v6  ;;  %v2225_v51 = vsel %vm9908_vm4, %v2220_v40, %v2224_v59  ;;  %v2229_v60 = vrot.slane %v2227_v12, 4  ;;  %v2236_v47 = vshll.u32 %v10624_v3, 16  ;;  %v10669_v49 = vsel %vm10170_vm7, %v8080_v38, %v2861_v31 }
  0x9b   : > { %v10665_v55 = vcombine.low %v2215_v43, %v2225_v51  ;;  %v2240_v23 = vshrl.u32 %v10624_v3, 16  ;;  %v2246_v30 = vshll.u32 %v10627_v17, 16  ;;  %v10678_v16 = vsel %vm10170_vm7, %v2863_v24, %v2864_v62 }
  0x9c   : > { %v2232_v6 = vrot.slane %v2230_v34, 5  ;;  %v2238_v61 = vrot.slane %v2236_v47, 5  ;;  %v2251_v29 = vshrl.u32 %v7999_v22, 16  ;;  %v2254_v14 = vshll.u32 %v7999_v22, 16 }
  0x9d   : > { %v2242_v57 = vrot.slane %v2240_v23, 4  ;;  %v2248_v11 = vrot.slane %v2246_v30, 5  ;;  %v2260_v59 = vshll.u32 %v10663_v35, 16  ;;  %v2264_v1 = vshrl.u32 %v10663_v35, 16  ;;  %v10732_v30 = vld [vmem:[%s9880_s8 + $0x7c] sm:$0xf] }
  0x9e   : > { %v2233_v0 = vor.u32 %v2232_v6, %v2229_v60  ;;  %v2253_v27 = vrot.slane %v2251_v29, 4  ;;  %v2270_v48 = vshll.u32 %v10674_v15, 16  ;;  %v2256_v41 = vrot.slane %v2254_v14, 5  ;;  %v8005_v60 = vld [vmem:[%s9880_s8 + $0x78] sm:$0xf] }
  0x9f   : > { %v2243_v38 = vor.u32 %v2242_v57, %v2238_v61  ;;  %v2262_v42 = vrot.slane %v2260_v59, 5  ;;  %v8081_v4 = vrot.slane %v8065_v56, 9  ;;  %v8097_v21 = vcombine.low %v10669_v49, %v10678_v16  ;;  %v10735_v6 = vld [vmem:[%s9880_s8 + $0x80] sm:$0x1]  ;;  %v8067_v57 = vld [vmem:[%s9880_s8 + $0x6c] sm:$0xe] }
  0xa0   : > { %v2234_v44 = vrot.slane %v2233_v0, 4  ;;  %v2266_v31 = vrot.slane %v2264_v1, 4  ;;  %v2868_v62 = vrot.slane %v10624_v3, 5  ;;  %v2257_v40 = vor.u32 %v2256_v41, %v2253_v27 }
  0xa1   : > { %9008 = vmatmul.mubr.msk.bf16.gmra.mxu0 %vm712_vm3, %v7896_v18  ;;  %9082 = vmatmul.mubr.msk.bf16.vlgmr.msra.gmra.mxu1 %vm712_vm3, %v8093_v46  ;;  %v2244_v22 = vrot.slane %v2243_v38, 4  ;;  %v2272_v12 = vrot.slane %v2270_v48, 5  ;;  %v2871_v43 = vrot.slane %v10627_v17, 5  ;;  %v8082_v10 = vrot.slane %v8066_v52, 9 }
  0xa2   : > { %9047 = vmatprep.mubr.msk.bf16.mxu0 %vm712_vm3, %v10488_v45  ;;  %9085 = vmatprep.mubr.msk.bf16.mxu1 %vm712_vm3, %v8094_v50  ;;  %v2239_v53 = vsel %vm9908_vm4, %v2234_v44, %v2238_v61  ;;  %v2267_v28 = vor.u32 %v2266_v31, %v2262_v42  ;;  %v10708_v18 = vsel %vm10170_vm7, %v8081_v4, %v2868_v62  ;;  %v2870_v32 = vrot.slane %v2868_v62, 4  ;;  %v10717_v50 = vld [vmem:[%s9880_s8 + $0x74] sm:$0x1] }
  0xa3   : > { %v2249_v45 = vsel %vm9908_vm4, %v2244_v22, %v2248_v11  ;;  %v2258_v46 = vrot.slane %v2257_v40, 4  ;;  %v2875_v19 = vrot.slane %v10663_v35, 5  ;;  %v2878_v24 = vrot.slane %v10674_v15, 5  ;;  %v10744_v11 = vld [vmem:[%s13172_s1 + $0x10] sm:$0x3] }
  0xa4   : > { %v2268_v3 = vrot.slane %v2267_v28, 4  ;;  %v10721_v17 = vsel %vm10170_vm7, %v2870_v32, %v2871_v43  ;;  %v2275_v51 = vshrl.u32 %v8002_v20, 16  ;;  %v10725_v34 = vcombine.low %v2239_v53, %v2249_v45  ;;  %v8008_v53 = vld [vmem:[%s9880_s8 + $0x84] sm:$0xf] }
  0xa5   : > { %v2263_v47 = vsel %vm9908_vm4, %v2258_v46, %v2262_v42  ;;  %v8098_v35 = vcombine.low %v10708_v18, %v10721_v17  ;;  %v2877_v23 = vrot.slane %v2875_v19, 4  ;;  %v2278_v15 = vshll.u32 %v8002_v20, 16  ;;  %v8013_v17 = vld [vmem:[%s9880_s8 + $0x98] sm:$0x1] }
  0xa6   : > { %v2273_v61 = vsel %vm9908_vm4, %v2268_v3, %v2272_v12  ;;  %v2277_v29 = vrot.slane %v2275_v51, 4  ;;  %v2284_v56 = vshll.u32 %v10711_v33, 16  ;;  %v10750_v59 = vsel %vm10170_vm7, %v8082_v10, %v2875_v19  ;;  %v10788_v3 = vld [vmem:[%s9880_s8 + $0x8c] sm:$0x1] }
  0xa7   : > { %v10746_v14 = vcombine.low %v2263_v47, %v2273_v61  ;;  %v2288_v0 = vshrl.u32 %v10711_v33, 16  ;;  %v2294_v27 = vshll.u32 %v10717_v50, 16  ;;  %v10756_v1 = vsel %vm10170_vm7, %v2877_v23, %v2878_v24 }
  0xa8   : > { %v2280_v48 = vrot.slane %v2278_v15, 5  ;;  %v2286_v52 = vrot.slane %v2284_v56, 5  ;;  %v2299_v38 = vshrl.u32 %v8005_v60, 16  ;;  %v2302_v4 = vshll.u32 %v8005_v60, 16  ;;  %v8011_v56 = vld [vmem:[%s9880_s8 + $0x90] sm:$0xf] }
  0xa9   : > { %9048 = vmatmul.mubr.msk.bf16.vlgmr.msra.gmra.mxu0 %vm712_vm3, %v10514_v5  ;;  %9086 = vmatmul.mubr.msk.bf16.gmra.mxu1 %vm712_vm3, %v8095_v25  ;;  %v2290_v41 = vrot.slane %v2288_v0, 4  ;;  %v2296_v42 = vrot.slane %v2294_v27, 5  ;;  %v2308_v20 = vshll.u32 %v10732_v30, 16  ;;  %v2312_v5 = vshrl.u32 %v10732_v30, 16 }
  0xaa   : > { %9114 = vmatpush3.bf16.msra.mxu0 %v10466_v26  ;;  %9051 = vmatprep.mubr.msk.bf16.mxu0 %vm712_vm3, %v10569_v63  ;;  %v2281_v44 = vor.u32 %v2280_v48, %v2277_v29  ;;  %v2301_v31 = vrot.slane %v2299_v38, 4  ;;  %v2318_v62 = vshll.u32 %v10735_v6, 16  ;;  %v2304_v25 = vrot.slane %v2302_v4, 5  ;;  %v8070_v38 = vld [vmem:[%s9880_s8 + $0x90] sm:$0xe] }
  0xab   : > { %9089 = vmatprep.mubr.msk.bf16.mxu1 %vm712_vm3, %v8096_v8  ;;  %v2291_v9 = vor.u32 %v2290_v41, %v2286_v52  ;;  %v2310_v26 = vrot.slane %v2308_v20, 5  ;;  %v8083_v22 = vrot.slane %v8067_v57, 9  ;;  %9655 = vmatprep.subr.msk.bf16.mxu0 %vm761_vm0, %v10744_v11  ;;  %v2314_v40 = vrot.slane %v2312_v5, 4  ;;  %v10781_v8 = vld [vmem:[%s9880_s8 + $0x88] sm:$0xf] }
  0xac   : > { %v2282_v63 = vrot.slane %v2281_v44, 4  ;;  %v2320_v12 = vrot.slane %v2318_v62, 5  ;;  %v2882_v43 = vrot.slane %v10711_v33, 5  ;;  %v2305_v32 = vor.u32 %v2304_v25, %v2301_v31  ;;  %v8012_v57 = vld [vmem:[%s9880_s8 + $0x94] sm:$0xf] }
  0xad   : > { %v2292_v28 = vrot.slane %v2291_v9, 4  ;;  %v2885_v13 = vrot.slane %v10717_v50, 5  ;;  %v8084_v39 = vrot.slane %v8068_v58, 9  ;;  %v2315_v46 = vor.u32 %v2314_v40, %v2310_v26 }
  0xae   : > { %v2287_v45 = vsel %vm9908_vm4, %v2282_v63, %v2286_v52  ;;  %v2883_v10 = vsel %vm10170_vm7, %v8083_v22, %v2882_v43  ;;  %v2884_v19 = vrot.slane %v2882_v43, 4  ;;  %v2306_v24 = vrot.slane %v2305_v32, 4 }
  0xaf   : > { %v2297_v33 = vsel %vm9908_vm4, %v2292_v28, %v2296_v42  ;;  %v2889_v50 = vrot.slane %v10732_v30, 5  ;;  %v2892_v51 = vrot.slane %v10735_v6, 5  ;;  %v8099_v60 = vcombine.low %v10750_v59, %v10756_v1 }
  0xb0   : > { %v2316_v47 = vrot.slane %v2315_v46, 4  ;;  %v2886_v23 = vsel %vm10170_vm7, %v2884_v19, %v2885_v13  ;;  %v2323_v61 = vshrl.u32 %v8008_v53, 16  ;;  %v10804_v30 = vcombine.low %v2287_v45, %v2297_v33  ;;  %v8014_v13 = vld [vmem:[%s9880_s8 + $0x9c] sm:$0xf] }
  0xb1   : > { %9052 = vmatmul.mubr.msk.bf16.gmra.mxu0 %vm712_vm3, %v10586_v54  ;;  %9090 = vmatmul.mubr.msk.bf16.gmra.mxu1 %vm712_vm3, %v8097_v21  ;;  %v2311_v6 = vsel %vm9908_vm4, %v2306_v24, %v2310_v26  ;;  %v8100_v29 = vcombine.low %v2883_v10, %v2886_v23  ;;  %v2891_v15 = vrot.slane %v2889_v50, 4  ;;  %v2326_v16 = vshll.u32 %v8008_v53, 16 }
  0xb2   : > { %9055 = vmatprep.mubr.msk.bf16.mxu0 %vm712_vm3, %v10645_v7  ;;  %9093 = vmatprep.mubr.msk.bf16.mxu1 %vm712_vm3, %v8098_v35  ;;  %v2321_v54 = vsel %vm9908_vm4, %v2316_v47, %v2320_v12  ;;  %v2325_v49 = vrot.slane %v2323_v61, 4  ;;  %v2332_v21 = vshll.u32 %v10781_v8, 16  ;;  %v10823_v0 = vsel %vm10170_vm7, %v8084_v39, %v2889_v50  ;;  %v8069_v35 = vld [vmem:[%s9880_s8 + $0x84] sm:$0xe] }
  0xb3   : > { %v10819_v59 = vcombine.low %v2311_v6, %v2321_v54  ;;  %v2336_v7 = vshrl.u32 %v10781_v8, 16  ;;  %v2342_v18 = vshll.u32 %v10788_v3, 16  ;;  %v10831_v27 = vsel %vm10170_vm7, %v2891_v15, %v2892_v51  ;;  %v10862_v51 = vld [vmem:[%s9880_s8 + $0xa4] sm:$0x1] }
  0xb4   : > { %v2328_v1 = vrot.slane %v2326_v16, 5  ;;  %v2334_v48 = vrot.slane %v2332_v21, 5  ;;  %v2347_v52 = vshrl.u32 %v8011_v56, 16  ;;  %v2350_v4 = vshll.u32 %v8011_v56, 16  ;;  %v8018_v16 = vld [vmem:[%s9880_s8 + $0xac] sm:$0xf] }
  0xb5   : > { %v2338_v41 = vrot.slane %v2336_v7, 4  ;;  %v2344_v42 = vrot.slane %v2342_v18, 5  ;;  %v2356_v20 = vshll.u32 %v8012_v57, 16  ;;  %v2360_v5 = vshrl.u32 %v8012_v57, 16  ;;  %v10881_v18 = vld [vmem:[%s9880_s8 + $0xb0] sm:$0x1] }
  0xb6   : > { %v2329_v44 = vor.u32 %v2328_v1, %v2325_v49  ;;  %v2349_v31 = vrot.slane %v2347_v52, 4  ;;  %v2366_v62 = vshll.u32 %v8013_v17, 16  ;;  %v2352_v9 = vrot.slane %v2350_v4, 5 }
  0xb7   : > { %v2339_v58 = vor.u32 %v2338_v41, %v2334_v48  ;;  %v10834_v25 = vrot.slane %v2356_v20, 5  ;;  %v8085_v26 = vrot.slane %v8069_v35, 9  ;;  %v2362_v63 = vrot.slane %v2360_v5, 4  ;;  %v8072_v5 = vld [vmem:[%s9880_s8 + $0xa8] sm:$0xe] }
  0xb8   : > { %v2330_v22 = vrot.slane %v2329_v44, 4  ;;  %v10836_v40 = vrot.slane %v2366_v62, 5  ;;  %v2896_v12 = vrot.slane %v10781_v8, 5  ;;  %v2353_v53 = vor.u32 %v2352_v9, %v2349_v31 }
  0xb9   : > { %9056 = vmatmul.mubr.msk.bf16.gmra.mxu0 %vm712_vm3, %v10665_v55  ;;  %9094 = vmatmul.mubr.msk.bf16.gmra.mxu1 %vm712_vm3, %v8099_v60  ;;  %v2340_v43 = vrot.slane %v2339_v58, 4  ;;  %v2899_v28 = vrot.slane %v10788_v3, 5  ;;  %v8086_v32 = vrot.slane %v8070_v38, 9  ;;  %v2363_v55 = vor.u32 %v2362_v63, %v10834_v25 }
  0xba   : > { %9059 = vmatprep.mubr.msk.bf16.mxu0 %vm712_vm3, %v10725_v34  ;;  %9097 = vmatprep.mubr.msk.bf16.mxu1 %vm712_vm3, %v8100_v29  ;;  %v2335_v39 = vsel %vm9908_vm4, %v2330_v22, %v2334_v48  ;;  %v2897_v8 = vsel %vm10170_vm7, %v8085_v26, %v2896_v12  ;;  %v2898_v45 = vrot.slane %v2896_v12, 4  ;;  %v10854_v10 = vrot.slane %v2353_v53, 4  ;;  %v8015_v34 = vld [vmem:[%s9880_s8 + $0xa0] sm:$0xf]  ;;  %v8017_v29 = vld [vmem:[%s9880_s8 + $0xa8] sm:$0xf] }
  0xbb   : > { %v2345_v46 = vsel %vm9908_vm4, %v2340_v43, %v2344_v42  ;;  %v2903_v19 = vrot.slane %v8012_v57, 5  ;;  %v2906_v3 = vrot.slane %v8013_v17, 5  ;;  %v8101_v33 = vcombine.low %v10823_v0, %v10831_v27  ;;  %v8071_v48 = vld [vmem:[%s9880_s8 + $0x9c] sm:$0xe] }
  0xbc   : > { %v2364_v24 = vrot.slane %v2363_v55, 4  ;;  %v2900_v50 = vsel %vm10170_vm7, %v2898_v45, %v2899_v28  ;;  %v2371_v60 = vshrl.u32 %v8014_v13, 16  ;;  %v10864_v47 = vcombine.low %v2335_v39, %v2345_v46  ;;  %v10899_v28 = vld [vmem:[%s9880_s8 + $0xb8] sm:$0xf] }
  0xbd   : > { %v2359_v23 = vsel %vm9908_vm4, %v10854_v10, %v10834_v25  ;;  %v2904_v61 = vsel %vm10170_vm7, %v8086_v32, %v2903_v19  ;;  %v2905_v6 = vrot.slane %v2903_v19, 4  ;;  %v8102_v15 = vcombine.low %v2897_v8, %v2900_v50  ;;  %v8020_v25 = vld [vmem:[%s9880_s8 + $0xb4] sm:$0xf]  ;;  %v10907_v8 = vld [vmem:[%s9880_s8 + $0xbc] sm:$0x1] }
  0xbe   : > { %v2373_v56 = vrot.slane %v2371_v60, 4  ;;  %v2374_v54 = vshll.u32 %v8014_v13, 16  ;;  %v2380_v49 = vshll.u32 %v8015_v34, 16  ;;  %v2369_v21 = vsel %vm9908_vm4, %v2364_v24, %v10836_v40 }
  0xbf   : > { %v2907_v57 = vsel %vm10170_vm7, %v2905_v6, %v2906_v3  ;;  %v2384_v0 = vshrl.u32 %v8015_v34, 16  ;;  %v2390_v7 = vshll.u32 %v10862_v51, 16  ;;  %v2395_v1 = vshrl.u32 %v8017_v29, 16  ;;  %v8023_v3 = vld [vmem:[%s9880_s8 + $0xc0] sm:$0xf] }
  0xc0   : > { %v8103_v17 = vcombine.low %v2904_v61, %v2907_v57  ;;  %v2376_v35 = vrot.slane %v2374_v54, 5  ;;  %v2382_v27 = vrot.slane %v2380_v49, 5  ;;  %v2398_v41 = vshll.u32 %v8017_v29, 16  ;;  %v10928_v29 = vld [vmem:[%s9880_s8 + $0xc8] sm:$0x1] }
  0xc1   : > { %9060 = vmatmul.mubr.msk.bf16.gmra.mxu0 %vm712_vm3, %v10746_v14  ;;  %9098 = vmatmul.mubr.msk.bf16.gmra.mxu1 %vm712_vm3, %v8101_v33  ;;  %v2386_v52 = vrot.slane %v2384_v0, 4  ;;  %v2392_v38 = vrot.slane %v2390_v7, 5  ;;  %v2404_v42 = vshll.u32 %v8018_v16, 16  ;;  %v2397_v20 = vrot.slane %v2395_v1, 4  ;;  %v8073_v49 = vld [vmem:[%s9880_s8 + $0xb4] sm:$0xe] }
  0xc2   : > { %9063 = vmatprep.mubr.msk.bf16.mxu0 %vm712_vm3, %v10804_v30  ;;  %9101 = vmatprep.mubr.msk.bf16.mxu1 %vm712_vm3, %v8102_v15  ;;  %v2377_v4 = vor.u32 %v2376_v35, %v2373_v56  ;;  %v2408_v44 = vshrl.u32 %v8018_v16, 16  ;;  %v2414_v31 = vshll.u32 %v10881_v18, 16  ;;  %v2400_v62 = vrot.slane %v2398_v41, 5  ;;  %v8074_v35 = vld [vmem:[%s9880_s8 + $0xc0] sm:$0xe] }
  0xc3   : > { %v2387_v14 = vor.u32 %v2386_v52, %v2382_v27  ;;  %v10892_v58 = vrot.slane %v2404_v42, 5  ;;  %v8087_v9 = vrot.slane %v8071_v48, 9  ;;  %v2910_v30 = vrot.slane %v8015_v34, 5 }
  0xc4   : > { %v2378_v26 = vrot.slane %v2377_v4, 4  ;;  %v2410_v22 = vrot.slane %v2408_v44, 4  ;;  %v10895_v63 = vrot.slane %v2414_v31, 5  ;;  %v2401_v12 = vor.u32 %v2400_v62, %v2397_v20 }
  0xc5   : > { %v2388_v40 = vrot.slane %v2387_v14, 4  ;;  %v2913_v43 = vrot.slane %v10862_v51, 5  ;;  %v8088_v53 = vrot.slane %v8072_v5, 9  ;;  %v2911_v39 = vsel %vm10170_vm7, %v8087_v9, %v2910_v30  ;;  %v10920_v51 = vld [vmem:[%s9880_s8 + $0xc4] sm:$0xf] }
  0xc6   : > { %v2383_v32 = vsel %vm9908_vm4, %v2378_v26, %v2382_v27  ;;  %v2411_v13 = vor.u32 %v2410_v22, %v10892_v58  ;;  %v2912_v55 = vrot.slane %v2910_v30, 4  ;;  %v10911_v46 = vrot.slane %v2401_v12, 4  ;;  %v8189_v30 = vld [vmem:[%s9880_s8 + $0x18] sm:$0xf] }
  0xc7   : > { %v2393_v45 = vsel %vm9908_vm4, %v2388_v40, %v2392_v38  ;;  %v2917_v10 = vrot.slane %v8018_v16, 5  ;;  %v2920_v19 = vrot.slane %v10881_v18, 5  ;;  %v8038_v34 = vcombine.low %v2359_v23, %v2369_v21 }
  0xc8   : > { %v10915_v33 = vrot.slane %v2411_v13, 4  ;;  %v2914_v24 = vsel %vm10170_vm7, %v2912_v55, %v2913_v43  ;;  %v2419_v50 = vshrl.u32 %v8020_v25, 16  ;;  %v8039_v60 = vcombine.low %v2383_v32, %v2393_v45 }
  0xc9   : > { %9064 = vmatmul.mubr.msk.bf16.gmra.mxu0 %vm712_vm3, %v10819_v59  ;;  %9102 = vmatmul.mubr.msk.bf16.gmra.mxu1 %vm712_vm3, %v8103_v17  ;;  %v8104_v61 = vcombine.low %v2911_v39, %v2914_v24  ;;  %v2918_v6 = vsel %vm10170_vm7, %v8088_v53, %v2917_v10  ;;  %v2919_v23 = vrot.slane %v2917_v10, 4  ;;  %v2407_v15 = vsel %vm9908_vm4, %v10911_v46, %v10892_v58 }
  0xca   : > { %9067 = vmatprep.mubr.msk.bf16.mxu0 %vm712_vm3, %v10864_v47  ;;  %v2421_v59 = vrot.slane %v2419_v50, 4  ;;  %v2422_v56 = vshll.u32 %v8020_v25, 16  ;;  %v2428_v54 = vshll.u32 %v10899_v28, 16  ;;  %v2417_v16 = vsel %vm9908_vm4, %v10915_v33, %v10895_v63 }
  0xcb   : > { %9105 = vmatprep.mubr.msk.bf16.mxu1 %vm712_vm3, %v8104_v61  ;;  %v2921_v47 = vsel %vm10170_vm7, %v2919_v23, %v2920_v19  ;;  %v2432_v21 = vshrl.u32 %v10899_v28, 16  ;;  %v2438_v57 = vshll.u32 %v10907_v8, 16  ;;  %v2443_v17 = vshrl.u32 %v8023_v3, 16  ;;  %v8192_v19 = vld [vmem:[%s9880_s8 + $0x24] sm:$0xf] }
  0xcc   : > { %v8105_v0 = vcombine.low %v2918_v6, %v2921_v47  ;;  %v2424_v7 = vrot.slane %v2422_v56, 5  ;;  %v2430_v18 = vrot.slane %v2428_v54, 5  ;;  %v2446_v48 = vshll.u32 %v8023_v3, 16  ;;  %v10983_v6 = vld [vmem:[%s9880_s8 + $0x28] sm:$0xf] }
  0xcd   : > { %v2434_v27 = vrot.slane %v2432_v21, 4  ;;  %v2440_v1 = vrot.slane %v2438_v57, 5  ;;  %v2452_v52 = vshll.u32 %v10920_v51, 16  ;;  %v2445_v41 = vrot.slane %v2443_v17, 4 }
  0xce   : > { %v2425_v38 = vor.u32 %v2424_v7, %v2421_v59  ;;  %v2456_v42 = vshrl.u32 %v10920_v51, 16  ;;  %v2462_v4 = vshll.u32 %v10928_v29, 16  ;;  %v2448_v44 = vrot.slane %v2446_v48, 5  ;;  %v8195_v7 = vld [vmem:[%s9880_s8 + $0x30] sm:$0xf] }
  0xcf   : > { %v2435_v20 = vor.u32 %v2434_v27, %v2430_v18  ;;  %v10951_v31 = vrot.slane %v2452_v52, 5  ;;  %v8089_v5 = vrot.slane %v8073_v49, 9  ;;  %v2924_v9 = vrot.slane %v10899_v28, 5  ;;  %v8190_v28 = vld [vmem:[%s9880_s8 + $0x1c] sm:$0xf] }
  0xd0   : > { %v2426_v14 = vrot.slane %v2425_v38, 4  ;;  %v2458_v62 = vrot.slane %v2456_v42, 4  ;;  %v10953_v58 = vrot.slane %v2462_v4, 5  ;;  %v2449_v26 = vor.u32 %v2448_v44, %v2445_v41  ;;  %v9698_v4 = vld [vmem:[%s9880_s8 + $0x18] sm:$0xff]  }
  0xd1   : > { %9068 = vmatmul.mubr.msk.bf16.gmra.mxu0 %vm712_vm3, %v8038_v34  ;;  %9106 = vmatmul.mubr.msk.bf16.gmra.mxu1 %vm712_vm3, %v8105_v0  ;;  %v2436_v25 = vrot.slane %v2435_v20, 4  ;;  %v2927_v22 = vrot.slane %v10907_v8, 5  ;;  %v8090_v63 = vrot.slane %v8074_v35, 9  ;;  %v2925_v43 = vsel %vm10170_vm7, %v8089_v5, %v2924_v9  ;;  %v8191_v8 = vld [vmem:[%s9880_s8 + $0x20] sm:$0x1] }
  0xd2   : > { %9071 = vmatprep.mubr.msk.bf16.mxu0 %vm712_vm3, %v8039_v60  ;;  %v2431_v40 = vsel %vm9908_vm4, %v2426_v14, %v2430_v18  ;;  %v2459_v12 = vor.u32 %v2458_v62, %v10951_v31  ;;  %v2926_v53 = vrot.slane %v2924_v9, 4  ;;  %v2450_v13 = vrot.slane %v2449_v26, 4  ;;  %v8197_v5 = vld [vmem:[%s9880_s8 + $0x38] sm:$0x1]  ;;  %v8198_v26 = vld [vmem:[%s9880_s8 + $0x3c] sm:$0xf] }
  0xd3   : > { %v2441_v32 = vsel %vm9908_vm4, %v2436_v25, %v2440_v1  ;;  %v2931_v39 = vrot.slane %v10920_v51, 5  ;;  %v2934_v55 = vrot.slane %v10928_v29, 5  ;;  %v4120_v10 = vsel %vm761_vm0, %v10497_v2, 0  ;;  %v8196_v1 = vld [vmem:[%s9880_s8 + $0x34] sm:$0xf] }
  0xd4   : > { %v2460_v45 = vrot.slane %v2459_v12, 4  ;;  %v2928_v46 = vsel %vm10170_vm7, %v2926_v53, %v2927_v22  ;;  %v8040_v3 = vcombine.low %v2407_v15, %v2417_v16  ;;  %9148 = vmatpush3.bf16.msra.mxu1 %v4120_v10  ;;  %v8041_v50 = vcombine.low %v2431_v40, %v2441_v32  ;;  %v10992_v16 = vld [vmem:[%s9880_s8 + $0x2c] sm:$0x1] }
  0xd5   : > { %v8106_v34 = vcombine.low %v2925_v43, %v2928_v46  ;;  %v2932_v33 = vsel %vm10170_vm7, %v8090_v63, %v2931_v39  ;;  %v2933_v24 = vrot.slane %v2931_v39, 4  ;;  %v2455_v51 = vsel %vm9908_vm4, %v2450_v13, %v10951_v31 }
  0xd6   : > { %v3638_v60 = vshrl.u32 %v8189_v30, 16  ;;  %v3641_v61 = vshll.u32 %v8189_v30, 16  ;;  %v2465_v2 = vsel %vm9908_vm4, %v2460_v45, %v10953_v58  ;;  %v3647_v29 = vshll.u32 %v8190_v28, 16  ;;  %v8199_v45 = vld [vmem:[%s9880_s8 + $0x40] sm:$0xf] }
  0xd7   : > { %9109 = vmatprep.mubr.msk.bf16.mxu1 %vm712_vm3, %v8106_v34  ;;  %v2935_v23 = vsel %vm10170_vm7, %v2933_v24, %v2934_v55  ;;  %v3651_v15 = vshrl.u32 %v8190_v28, 16  ;;  %v3657_v49 = vshll.u32 %v8191_v8, 16  ;;  %v3662_v57 = vshrl.u32 %v8192_v19, 16  ;;  %v8200_v24 = vld [vmem:[%s9880_s8 + $0x44] sm:$0x1] }
  0xd8   : > { %v8107_v59 = vcombine.low %v2932_v33, %v2935_v23  ;;  %v3640_v56 = vrot.slane %v3638_v60, 4  ;;  %v3643_v54 = vrot.slane %v3641_v61, 5  ;;  %v3649_v47 = vrot.slane %v3647_v29, 5 }
  0xd9   : > { %9072 = vmatmul.mubr.msk.bf16.gmra.mxu0 %vm712_vm3, %v8040_v3  ;;  %v3653_v21 = vrot.slane %v3651_v15, 4  ;;  %v3665_v0 = vshll.u32 %v8192_v19, 16  ;;  %v3659_v17 = vrot.slane %v3657_v49, 5  ;;  %v3671_v35 = vshll.u32 %v10983_v6, 16  ;;  %v8201_v49 = vld [vmem:[%s9880_s8 + $0x48] sm:$0xf] }
  0xda   : > { %9075 = vmatprep.mubr.msk.bf16.mxu0 %vm712_vm3, %v8041_v50  ;;  %9110 = vmatmul.mubr.msk.bf16.gmra.mxu1 %vm712_vm3, %v8107_v59  ;;  %v3644_v18 = vor.u32 %v3643_v54, %v3640_v56  ;;  %v3675_v27 = vshrl.u32 %v10983_v6, 16  ;;  %v3664_v38 = vrot.slane %v3662_v57, 4  ;;  %v3681_v42 = vshll.u32 %v10992_v16, 16 }
  0xdb   : > { %v8947_v48 = vpop.f32.mrf.mxu1  ;;  %v3654_v52 = vor.u32 %v3653_v21, %v3649_v47  ;;  %v3667_v41 = vrot.slane %v3665_v0, 5  ;;  %v3673_v44 = vrot.slane %v3671_v35, 5  ;;  %v8042_v14 = vcombine.low %v2455_v51, %v2465_v2  ;;  %v9699_v2 = vld [vmem:[%s9880_s8 + $0x24] sm:$0xff]   ;;  %v9700_v21 = vld [vmem:[%s9880_s8 + $0x30] sm:$0xff]  }
  0xdc   : > { %v3645_v20 = vrot.slane %v3644_v18, 4  ;;  %v3677_v31 = vrot.slane %v3675_v27, 4  ;;  %v3683_v25 = vrot.slane %v3681_v42, 5  ;;  %v3686_v30 = vshrl.u32 %v8195_v7, 16  ;;  %v8202_v18 = vld [vmem:[%s9880_s8 + $0x4c] sm:$0xf] }
  0xdd   : > { %v3655_v62 = vrot.slane %v3654_v52, 4  ;;  %v1091_v58 = vpop.f32.mrf.mxu1  ;;  %v3668_v9 = vor.u32 %v3667_v41, %v3664_v38  ;;  %v3689_v40 = vshll.u32 %v8195_v7, 16  ;;  %v3695_v28 = vshll.u32 %v8196_v1, 16  ;;  %v8203_v38 = vld [vmem:[%s9880_s8 + $0x50] sm:$0x1] }
  0xde   : > { %v3650_v22 = vsel %vm9908_vm4, %v3645_v20, %v3649_v47  ;;  %v3678_v63 = vor.u32 %v3677_v31, %v3673_v44  ;;  %v3699_v32 = vshrl.u32 %v8196_v1, 16  ;;  %v3688_v55 = vrot.slane %v3686_v30, 4  ;;  %v8204_v41 = vld [vmem:[%s9880_s8 + $0x54] sm:$0xf] }
  0xdf   : > { %v3660_v12 = vsel %vm9908_vm4, %v3655_v62, %v3659_v17  ;;  %v3669_v43 = vrot.slane %v3668_v9, 4  ;;  %v8948_v53 = vpop.f32.mrf.mxu1  ;;  %v3691_v8 = vrot.slane %v3689_v40, 5  ;;  %v3697_v3 = vrot.slane %v3695_v28, 5 }
  0xe0   : > { %v8238_v13 = vcombine.low %v3650_v22, %v3660_v12  ;;  %v3679_v39 = vrot.slane %v3678_v63, 4  ;;  %v3701_v34 = vrot.slane %v3699_v32, 4  ;;  %v3705_v33 = vshll.u32 %v8197_v5, 16  ;;  %v11040_v63 = vld [vmem:[%s9880_s8 + $0x58] sm:$0xf] }
  0xe1   : > { %9076 = vmatmul.mubr.msk.bf16.gmra.mxu0 %vm712_vm3, %v8042_v14  ;;  %v8913_v46 = vpop.f32.mrf.mxu0  ;;  %v3674_v10 = vsel %vm9908_vm4, %v3669_v43, %v3673_v44  ;;  %v1094_v19 = vpop.f32.mrf.mxu1  ;;  %v3692_v60 = vor.u32 %v3691_v8, %v3688_v55  ;;  %v3710_v61 = vshrl.u32 %v8198_v26, 16  ;;  %v3713_v54 = vshll.u32 %v8198_v26, 16 }
  0xe2   : > { %9115 = vmatprep.mubr.msk.bf16.mxu0 %vm712_vm3, %v9698_v4  ;;  %v11015_v50 = vadd.f32 %v8947_v48, %v8913_v46  ;;  %9149 = vmatprep.mubr.msk.bf16.mxu1 %vm712_vm3, %v8238_v13  ;;  %v3684_v51 = vsel %vm9908_vm4, %v3679_v39, %v3683_v25  ;;  %v3702_v59 = vor.u32 %v3701_v34, %v3697_v3  ;;  %v3707_v56 = vrot.slane %v3705_v33, 5  ;;  %v11045_v39 = vld [vmem:[%s9880_s8 + $0x5c] sm:$0x1]  ;;  %v9702_v33 = vld [vmem:[%s9880_s8 + $0x48] sm:$0xff]  }
  0xe3   : > { %v799_v23 = vpop.f32.mrf.mxu0  ;;  %v8239_v29 = vcombine.low %v3674_v10, %v3684_v51  ;;  %v8951_v15 = vpop.f32.mrf.mxu1  ;;  %v3693_v57 = vrot.slane %v3692_v60, 4  ;;  %v3712_v0 = vrot.slane %v3710_v61, 4  ;;  %v3719_v7 = vshll.u32 %v8199_v45, 16  ;;  %v8207_v61 = vld [vmem:[%s9880_s8 + $0x60] sm:$0xf] }
  0xe4   : > { %v11022_v47 = vadd.f32 %v1091_v58, %v799_v23  ;;  %v3703_v35 = vrot.slane %v3702_v59, 4  ;;  %v3715_v1 = vrot.slane %v3713_v54, 5  ;;  %v3723_v48 = vshrl.u32 %v8199_v45, 16  ;;  %v9701_v45 = vld [vmem:[%s9880_s8 + $0x3c] sm:$0xff]  }
  0xe5   : > { %9150 = vmatmul.mubr.msk.bf16.vlgmr.msra.gmra.mxu1 %vm712_vm3, %v8239_v29  ;;  %v8914_v17 = vpop.f32.mrf.mxu0  ;;  %v1107_v27 = vpop.f32.mrf.mxu1  ;;  %v3729_v52 = vshll.u32 %v8200_v24, 16  ;;  %v4590_v42 = vsel %vm761_vm0, %v10744_v11, 0  ;;  %v3698_v20 = vsel %vm9908_vm4, %v3693_v57, %v3697_v3  ;;  %v3721_v44 = vrot.slane %v3719_v7, 5 }
  0xe6   : > { %v11031_v4 = vadd.f32 %v8948_v53, %v8914_v17  ;;  %v3708_v5 = vsel %vm9908_vm4, %v3703_v35, %v3707_v56  ;;  %v3716_v14 = vor.u32 %v3715_v1, %v3712_v0  ;;  %v3725_v62 = vrot.slane %v3723_v48, 4  ;;  %v11062_v0 = vld [vmem:[%s9880_s8 + $0x64] sm:$0xf] }
  0xe7   : > { %v802_v31 = vpop.f32.mrf.mxu0  ;;  %v3731_v58 = vrot.slane %v3729_v52, 5  ;;  %v8952_v9 = vpop.f32.mrf.mxu1  ;;  %v8240_v26 = vcombine.low %v3698_v20, %v3708_v5  ;;  %v3734_v22 = vshrl.u32 %v8201_v49, 16  ;;  %v3737_v11 = vshll.u32 %v8201_v49, 16  ;;  %v11066_v52 = vld [vmem:[%s9880_s8 + $0x68] sm:$0x1] }
  0xe8   : > { %v11037_v25 = vadd.f32 %v1094_v19, %v802_v31  ;;  %v3717_v30 = vrot.slane %v3716_v14, 4  ;;  %v3726_v40 = vor.u32 %v3725_v62, %v3721_v44  ;;  %v3743_v43 = vshll.u32 %v8202_v18, 16 }
  0xe9   : > { %9116 = vmatmul.mubr.msk.bf16.vlgmr.msra.gmra.mxu0 %vm712_vm3, %v9699_v2  ;;  %v1110_v12 = vpop.f32.mrf.mxu1  ;;  %v3747_v53 = vshrl.u32 %v8202_v18, 16  ;;  %v3736_v28 = vrot.slane %v3734_v22, 4  ;;  %v3739_v32 = vrot.slane %v3737_v11, 5  ;;  %v3753_v13 = vshll.u32 %v8203_v38, 16  ;;  %9153 = vmatprep.mubr.msk.bf16.mxu1 %vm712_vm3, %v8240_v26 }
  0xea   : > { %9182 = vmatpush3.bf16.msra.mxu0 %v4590_v42  ;;  %9119 = vmatprep.mubr.msk.bf16.mxu0 %vm712_vm3, %v9700_v21  ;;  %v3758_v55 = vshrl.u32 %v8204_v41, 16  ;;  %v3722_v46 = vsel %vm9908_vm4, %v3717_v30, %v3721_v44  ;;  %v3727_v10 = vrot.slane %v3726_v40, 4  ;;  %v3745_v19 = vrot.slane %v3743_v43, 5  ;;  %v8210_v42 = vld [vmem:[%s9880_s8 + $0x6c] sm:$0xf] }
  0xeb   : > { %v8917_v8 = vpop.f32.mrf.mxu0  ;;  %v3749_v3 = vrot.slane %v3747_v53, 4  ;;  %v3740_v24 = vor.u32 %v3739_v32, %v3736_v28  ;;  %v3755_v51 = vrot.slane %v3753_v13, 5  ;;  %v3761_v56 = vshll.u32 %v8204_v41, 16  ;;  %v11083_v32 = vld [vmem:[%s9880_s8 + $0x70] sm:$0xf] }
  0xec   : > { %v11051_v34 = vadd.f32 %v8951_v15, %v8917_v8  ;;  %v3760_v60 = vrot.slane %v3758_v55, 4  ;;  %v3732_v23 = vsel %vm9908_vm4, %v3727_v10, %v3731_v58  ;;  %v3767_v54 = vshll.u32 %v11040_v63, 16 }
  0xed   : > { %v815_v2 = vpop.f32.mrf.mxu0  ;;  %v8955_v29 = vpop.f32.mrf.mxu1  ;;  %v3750_v59 = vor.u32 %v3749_v3, %v3745_v19  ;;  %v8241_v15 = vcombine.low %v3722_v46, %v3732_v23  ;;  %v3741_v21 = vrot.slane %v3740_v24, 4  ;;  %v3771_v57 = vshrl.u32 %v11040_v63, 16  ;;  %v9703_v46 = vld [vmem:[%s9880_s8 + $0x54] sm:$0xff]  }
  0xee   : > { %v11058_v49 = vadd.f32 %v1107_v27, %v815_v2  ;;  %v3763_v35 = vrot.slane %v3761_v56, 5  ;;  %v3769_v1 = vrot.slane %v3767_v54, 5  ;;  %v3777_v48 = vshll.u32 %v11045_v39, 16  ;;  %v9704_v2 = vld [vmem:[%s9880_s8 + $0x60] sm:$0xff]  }
  0xef   : > { %v8918_v7 = vpop.f32.mrf.mxu0  ;;  %v3751_v18 = vrot.slane %v3750_v59, 4  ;;  %v1123_v17 = vpop.f32.mrf.mxu1  ;;  %9154 = vmatmul.mubr.msk.bf16.gmra.mxu1 %vm712_vm3, %v8241_v15  ;;  %v3746_v38 = vsel %vm9908_vm4, %v3741_v21, %v3745_v19  ;;  %v3773_v41 = vrot.slane %v3771_v57, 4  ;;  %v3782_v62 = vshrl.u32 %v8207_v61, 16  ;;  %v8213_v59 = vld [vmem:[%s9880_s8 + $0x78] sm:$0xf] }
  0xf0   : > { %v11069_v27 = vadd.f32 %v8952_v9, %v8918_v7  ;;  %v3764_v31 = vor.u32 %v3763_v35, %v3760_v60  ;;  %v3779_v5 = vrot.slane %v3777_v48, 5  ;;  %v3785_v22 = vshll.u32 %v8207_v61, 16 }
  0xf1   : > { %9120 = vmatmul.mubr.msk.bf16.gmra.mxu0 %vm712_vm3, %v9701_v45  ;;  %v818_v20 = vpop.f32.mrf.mxu0  ;;  %v3756_v44 = vsel %vm9908_vm4, %v3751_v18, %v3755_v51  ;;  %v8956_v14 = vpop.f32.mrf.mxu1  ;;  %v3774_v26 = vor.u32 %v3773_v41, %v3769_v1  ;;  %v3784_v43 = vrot.slane %v3782_v62, 4  ;;  %v3791_v53 = vshll.u32 %v11062_v0, 16  ;;  %v11090_v45 = vld [vmem:[%s9880_s8 + $0x74] sm:$0x1]  ;;  %v11102_v18 = vld [vmem:[%s9880_s8 + $0x7c] sm:$0xf] }
  0xf2   : > { %v11077_v58 = vadd.f32 %v1110_v12, %v818_v20  ;;  %9123 = vmatprep.mubr.msk.bf16.mxu0 %vm712_vm3, %v9702_v33  ;;  %v8242_v9 = vcombine.low %v3746_v38, %v3756_v44  ;;  %v3765_v30 = vrot.slane %v3764_v31, 4  ;;  %v3795_v28 = vshrl.u32 %v11062_v0, 16  ;;  %v11109_v38 = vld [vmem:[%s9880_s8 + $0x80] sm:$0x1] }
  0xf3   : > { %v8921_v11 = vpop.f32.mrf.mxu0  ;;  %v1126_v40 = vpop.f32.mrf.mxu1  ;;  %v3775_v13 = vrot.slane %v3774_v26, 4  ;;  %v3787_v55 = vrot.slane %v3785_v22, 5  ;;  %v3801_v8 = vshll.u32 %v11066_v52, 16  ;;  %v3793_v33 = vrot.slane %v3791_v53, 5  ;;  %v8216_v26 = vld [vmem:[%s9880_s8 + $0x84] sm:$0xf] }
  0xf4   : > { %v11085_v12 = vadd.f32 %v8955_v29, %v8921_v11  ;;  %9157 = vmatprep.mubr.msk.bf16.mxu1 %vm712_vm3, %v8242_v9  ;;  %v3770_v19 = vsel %vm9908_vm4, %v3765_v30, %v3769_v1  ;;  %v3797_v24 = vrot.slane %v3795_v28, 4  ;;  %v3806_v51 = vshrl.u32 %v8210_v42, 16  ;;  %v9705_v22 = vld [vmem:[%s9880_s8 + $0x6c] sm:$0xff]  }
  0xf5   : > { %v831_v10 = vpop.f32.mrf.mxu0  ;;  %v8959_v3 = vpop.f32.mrf.mxu1  ;;  %v3780_v61 = vsel %vm9908_vm4, %v3775_v13, %v3779_v5  ;;  %v3788_v23 = vor.u32 %v3787_v55, %v3784_v43  ;;  %v3803_v29 = vrot.slane %v3801_v8, 5  ;;  %v3809_v7 = vshll.u32 %v8210_v42, 16 }
  0xf6   : > { %v11095_v60 = vadd.f32 %v1123_v17, %v831_v10  ;;  %v8243_v56 = vcombine.low %v3770_v19, %v3780_v61  ;;  %v3798_v15 = vor.u32 %v3797_v24, %v3793_v33  ;;  %v3808_v57 = vrot.slane %v3806_v51, 4 }
  0xf7   : > { %v8922_v54 = vpop.f32.mrf.mxu0  ;;  %v1139_v21 = vpop.f32.mrf.mxu1  ;;  %v3789_v17 = vrot.slane %v3788_v23, 4  ;;  %v3815_v1 = vshll.u32 %v11083_v32, 16  ;;  %v3819_v48 = vshrl.u32 %v11083_v32, 16  ;;  %v3811_v42 = vrot.slane %v3809_v7, 5  ;;  %v9706_v23 = vld [vmem:[%s9880_s8 + $0x78] sm:$0xff]  }
  0xf8   : > { %v11104_v35 = vadd.f32 %v8956_v14, %v8922_v54  ;;  %9158 = vmatmul.mubr.msk.bf16.gmra.mxu1 %vm712_vm3, %v8243_v56  ;;  %v3799_v20 = vrot.slane %v3798_v15, 4  ;;  %v3825_v44 = vshll.u32 %v11090_v45, 16  ;;  %v3830_v28 = vshrl.u32 %v8213_v59, 16  ;;  %v8219_v54 = vld [vmem:[%s9880_s8 + $0x90] sm:$0xf] }
  0xf9   : > { %9124 = vmatmul.mubr.msk.bf16.gmra.mxu0 %vm712_vm3, %v9703_v46  ;;  %v834_v41 = vpop.f32.mrf.mxu0  ;;  %v8960_v31 = vpop.f32.mrf.mxu1  ;;  %v3794_v14 = vsel %vm9908_vm4, %v3789_v17, %v3793_v33  ;;  %v3817_v62 = vrot.slane %v3815_v1, 5  ;;  %v3821_v9 = vrot.slane %v3819_v48, 4  ;;  %v3812_v30 = vor.u32 %v3811_v42, %v3808_v57  ;;  %v11125_v46 = vld [vmem:[%s9880_s8 + $0x88] sm:$0xf] }
  0xfa   : > { %v11114_v5 = vadd.f32 %v1126_v40, %v834_v41  ;;  %9127 = vmatprep.mubr.msk.bf16.mxu0 %vm712_vm3, %v9704_v2  ;;  %v3804_v11 = vsel %vm9908_vm4, %v3799_v20, %v3803_v29  ;;  %v3827_v43 = vrot.slane %v3825_v44, 5  ;;  %v3833_v55 = vshll.u32 %v8213_v59, 16  ;;  %v11134_v59 = vld [vmem:[%s9880_s8 + $0x8c] sm:$0x1] }
  0xfb   : > { %v1142_v53 = vpop.f32.mrf.mxu1  ;;  %v8244_v40 = vcombine.low %v3794_v14, %v3804_v11  ;;  %v3822_v13 = vor.u32 %v3821_v9, %v3817_v62  ;;  %v3839_v8 = vshll.u32 %v11102_v18, 16  ;;  %v3813_v19 = vrot.slane %v3812_v30, 4 }
  0xfc   : > { %v3832_v33 = vrot.slane %v3830_v28, 4  ;;  %v3843_v24 = vshrl.u32 %v11102_v18, 16  ;;  %v3849_v51 = vshll.u32 %v11109_v38, 16  ;;  %v3835_v29 = vrot.slane %v3833_v55, 5 }
  0xfd   : > { %v8925_v10 = vpop.f32.mrf.mxu0  ;;  %9161 = vmatprep.mubr.msk.bf16.mxu1 %vm712_vm3, %v8244_v40  ;;  %v3823_v2 = vrot.slane %v3822_v13, 4  ;;  %v3841_v56 = vrot.slane %v3839_v8, 5  ;;  %v3818_v57 = vsel %vm9908_vm4, %v3813_v19, %v3817_v62  ;;  %v3854_v48 = vshrl.u32 %v8216_v26, 16 }
  0xfe   : > { %v11129_v61 = vadd.f32 %v8959_v3, %v8925_v10  ;;  %v3845_v17 = vrot.slane %v3843_v24, 4  ;;  %v3851_v1 = vrot.slane %v3849_v51, 5  ;;  %v3836_v20 = vor.u32 %v3835_v29, %v3832_v33  ;;  %v8222_v33 = vld [vmem:[%s9880_s8 + $0x9c] sm:$0xf] }
  0xff   : > { %v847_v15 = vpop.f32.mrf.mxu0  ;;  %v8963_v7 = vpop.f32.mrf.mxu1  ;;  %v3828_v3 = vsel %vm9908_vm4, %v3823_v2, %v3827_v43  ;;  %v3857_v42 = vshll.u32 %v8216_v26, 16  ;;  %v3856_v62 = vrot.slane %v3854_v48, 4  ;;  %v3863_v30 = vshll.u32 %v11125_v46, 16  ;;  %v11150_v26 = vld [vmem:[%s9880_s8 + $0x94] sm:$0xf] }
 0x100   : > { %v11139_v41 = vadd.f32 %v1139_v21, %v847_v15  ;;  %v8245_v44 = vcombine.low %v3818_v57, %v3828_v3  ;;  %v3846_v9 = vor.u32 %v3845_v17, %v3841_v56  ;;  %v3837_v21 = vrot.slane %v3836_v20, 4  ;;  %v9707_v15 = vld [vmem:[%s9880_s8 + $0x84] sm:$0xff]  }
 0x101   : > { %9128 = vmatmul.mubr.msk.bf16.gmra.mxu0 %vm712_vm3, %v9705_v22  ;;  %v8926_v14 = vpop.f32.mrf.mxu0  ;;  %v1155_v11 = vpop.f32.mrf.mxu1  ;;  %v3859_v40 = vrot.slane %v3857_v42, 5  ;;  %v3867_v43 = vshrl.u32 %v11125_v46, 16  ;;  %v11153_v22 = vld [vmem:[%s9880_s8 + $0x98] sm:$0x1]  ;;  %v3865_v8 = vrot.slane %v3863_v30, 5  ;;  %v3873_v10 = vshll.u32 %v11134_v59, 16 }
 0x102   : > { %v11145_v28 = vadd.f32 %v8960_v31, %v8926_v14  ;;  %9131 = vmatprep.mubr.msk.bf16.mxu0 %vm712_vm3, %v9706_v23  ;;  %9162 = vmatmul.mubr.msk.bf16.gmra.mxu1 %vm712_vm3, %v8245_v44  ;;  %v3847_v55 = vrot.slane %v3846_v9, 4  ;;  %v3878_v19 = vshrl.u32 %v8219_v54, 16  ;;  %v3842_v51 = vsel %vm9908_vm4, %v3837_v21, %v3841_v56  ;;  %v9708_v56 = vld [vmem:[%s9880_s8 + $0x90] sm:$0xff]   ;;  %v11171_v9 = vld [vmem:[%s9880_s8 + $0xa0] sm:$0xf] }
 0x103   : > { %v850_v13 = vpop.f32.mrf.mxu0  ;;  %v8964_v31 = vpop.f32.mrf.mxu1  ;;  %v3860_v2 = vor.u32 %v3859_v40, %v3856_v62  ;;  %v3869_v23 = vrot.slane %v3867_v43, 4  ;;  %v3875_v17 = vrot.slane %v3873_v10, 5  ;;  %v3881_v20 = vshll.u32 %v8219_v54, 16 }
 0x104   : > { %13189 = vst [vmem:[#allocation3_spill] sm:$0xff] %v11145_v28  ;;  %v11158_v24 = vadd.f32 %v1142_v53, %v850_v13  ;;  %v3852_v57 = vsel %vm9908_vm4, %v3847_v55, %v3851_v1  ;;  %v3880_v3 = vrot.slane %v3878_v19, 4  ;;  %v3887_v1 = vshll.u32 %v11150_v26, 16  ;;  %v11177_v13 = vld [vmem:[%s9880_s8 + $0xa4] sm:$0x1] }
 0x105   : > { %v8929_v29 = vpop.f32.mrf.mxu0  ;;  %v11165_v48 = vpop.f32.mrf.mxu1  ;;  %v8246_v53 = vcombine.low %v3842_v51, %v3852_v57  ;;  %v3861_v44 = vrot.slane %v3860_v2, 4  ;;  %v3870_v14 = vor.u32 %v3869_v23, %v3865_v8  ;;  %v3883_v21 = vrot.slane %v3881_v20, 5  ;;  %13193 = vst [vmem:[#allocation7_spill] sm:$0xff] %v11177_v13  ;;  %v8225_v19 = vld [vmem:[%s9880_s8 + $0xa8] sm:$0xf] }
 0x106   : > { %13190 = vst [vmem:[#allocation4_spill] sm:$0xff] %v11158_v24  ;;  %13191 = vst [vmem:[#allocation5_spill] sm:$0xff] %v11165_v48  ;;  %v11167_v42 = vadd.f32 %v8963_v7, %v8929_v29  ;;  %v3891_v40 = vshrl.u32 %v11150_v26, 16  ;;  %v3897_v43 = vshll.u32 %v11153_v22, 16  ;;  %v3902_v10 = vshrl.u32 %v8222_v33, 16 }
 0x107   : > { %v863_v62 = vpop.f32.mrf.mxu0  ;;  %v8967_v30 = vpop.f32.mrf.mxu1  ;;  %9165 = vmatprep.mubr.msk.bf16.mxu1 %vm712_vm3, %v8246_v53  ;;  %v3866_v7 = vsel %vm9908_vm4, %v3861_v44, %v3865_v8  ;;  %v3871_v55 = vrot.slane %v3870_v14, 4  ;;  %v3884_v2 = vor.u32 %v3883_v21, %v3880_v3  ;;  %v3889_v23 = vrot.slane %v3887_v1, 5  ;;  %v11192_v14 = vld [vmem:[%s9880_s8 + $0xac] sm:$0xf]  ;;  %v11222_v24 = vld [vmem:[%s9880_s8 + $0xbc] sm:$0x1] }
 0x108   : > { %13192 = vst [vmem:[#allocation6_spill] sm:$0xff] %v11167_v42  ;;  %v11180_v54 = vadd.f32 %v1155_v11, %v863_v62  ;;  %v3893_v29 = vrot.slane %v3891_v40, 4  ;;  %v3899_v57 = vrot.slane %v3897_v43, 5  ;;  %v3904_v8 = vrot.slane %v3902_v10, 4  ;;  %13201 = vst [vmem:[#allocation15_spill] sm:$0xff] %v11222_v24 }
 0x109   : > { %9132 = vmatmul.mubr.msk.bf16.gmra.mxu0 %vm712_vm3, %v9707_v15  ;;  %v8930_v51 = vpop.f32.mrf.mxu0  ;;  %v1171_v20 = vpop.f32.mrf.mxu1  ;;  %v3876_v11 = vsel %vm9908_vm4, %v3871_v55, %v3875_v17  ;;  %v3905_v44 = vshll.u32 %v8222_v33, 16  ;;  %v3885_v3 = vrot.slane %v3884_v2, 4  ;;  %v3911_v1 = vshll.u32 %v11171_v9, 16  ;;  %v9709_v33 = vld [vmem:[%s9880_s8 + $0x9c] sm:$0xff]  }
 0x10a   : > { %13194 = vst [vmem:[#allocation8_spill] sm:$0xff] %v11180_v54  ;;  %v11188_v53 = vadd.f32 %v8964_v31, %v8930_v51  ;;  %9135 = vmatprep.mubr.msk.bf16.mxu0 %vm712_vm3, %v9708_v56  ;;  %v8247_v15 = vcombine.low %v3866_v7, %v3876_v11  ;;  %v3894_v21 = vor.u32 %v3893_v29, %v3889_v23  ;;  %v3915_v31 = vshrl.u32 %v11171_v9, 16  ;;  %v11200_v56 = vld [vmem:[%s9880_s8 + $0xb0] sm:$0x1]  ;;  %v8228_v29 = vld [vmem:[%s9880_s8 + $0xb4] sm:$0xf] }
 0x10b   : > { %v11194_v62 = vpop.f32.mrf.mxu0  ;;  %v8968_v40 = vpop.f32.mrf.mxu1  ;;  %v3907_v17 = vrot.slane %v3905_v44, 5  ;;  %v3921_v43 = vshll.u32 %v11177_v13, 16  ;;  %13197 = vst [vmem:[#allocation11_spill] sm:$0xff] %v11200_v56  ;;  %v3890_v7 = vsel %vm9908_vm4, %v3885_v3, %v3889_v23  ;;  %v3913_v10 = vrot.slane %v3911_v1, 5 }
 0x10c   : > { %13195 = vst [vmem:[#allocation9_spill] sm:$0xff] %v11188_v53  ;;  %13196 = vst [vmem:[#allocation10_spill] sm:$0xff] %v11194_v62  ;;  %9166 = vmatmul.mubr.msk.bf16.gmra.mxu1 %vm712_vm3, %v8247_v15  ;;  %v3895_v55 = vrot.slane %v3894_v21, 4  ;;  %v3926_v2 = vshrl.u32 %v8225_v19, 16  ;;  %v3917_v44 = vrot.slane %v3915_v31, 4  ;;  %v9710_v62 = vld [vmem:[%s9880_s8 + $0xa8] sm:$0xff]  }
 0x10d   : > { %v11206_v51 = vpop.f32.mrf.mxu1  ;;  %v3908_v11 = vor.u32 %v3907_v17, %v3904_v8  ;;  %v3923_v48 = vrot.slane %v3921_v43, 5  ;;  %v3929_v53 = vshll.u32 %v8225_v19, 16  ;;  %v3935_v23 = vshll.u32 %v11192_v14, 16  ;;  %v11215_v21 = vld [vmem:[%s9880_s8 + $0xb8] sm:$0xf] }
 0x10e   : > { %13198 = vst [vmem:[#allocation12_spill] sm:$0xff] %v11206_v51  ;;  %v3900_v15 = vsel %vm9908_vm4, %v3895_v55, %v3899_v57  ;;  %v3928_v42 = vrot.slane %v3926_v2, 4  ;;  %v3939_v3 = vshrl.u32 %v11192_v14, 16  ;;  %13199 = vst [vmem:[#allocation13_spill] sm:$0xff] %v11215_v21  ;;  %v3918_v17 = vor.u32 %v3917_v44, %v3913_v10  ;;  %v9711_v44 = vld [vmem:[%s9880_s8 + $0xb4] sm:$0xff]  }
 0x10f   : > { %v8933_v54 = vpop.f32.mrf.mxu0  ;;  %v8248_v51 = vcombine.low %v3890_v7, %v3900_v15  ;;  %v3909_v8 = vrot.slane %v3908_v11, 4  ;;  %v3931_v57 = vrot.slane %v3929_v53, 5  ;;  %v3937_v43 = vrot.slane %v3935_v23, 5  ;;  %v8231_v11 = vld [vmem:[%s9880_s8 + $0xc0] sm:$0xf] }
 0x110   : > { %v11217_v1 = vadd.f32 %v8967_v30, %v8933_v54  ;;  %v3941_v55 = vrot.slane %v3939_v3, 4  ;;  %v3945_v2 = vshll.u32 %v11200_v56, 16  ;;  %v3919_v7 = vrot.slane %v3918_v17, 4  ;;  %v9712_v56 = vld [vmem:[%s9880_s8 + $0xc0] sm:$0xff]  }
 0x111   : > { %9136 = vmatmul.mubr.msk.bf16.gmra.mxu0 %vm712_vm3, %v9709_v33  ;;  %v879_v19 = vpop.f32.mrf.mxu0  ;;  %v8971_v31 = vpop.f32.mrf.mxu1  ;;  %9169 = vmatprep.mubr.msk.bf16.mxu1 %vm712_vm3, %v8248_v51  ;;  %v3914_v54 = vsel %vm9908_vm4, %v3909_v8, %v3913_v10  ;;  %v3950_v33 = vshrl.u32 %v8228_v29, 16  ;;  %v3932_v15 = vor.u32 %v3931_v57, %v3928_v42  ;;  %v3953_v51 = vshll.u32 %v8228_v29, 16  ;;  %v11238_v8 = vld [vmem:[%s9880_s8 + $0xc4] sm:$0xf]  ;;  %v11244_v29 = vld [vmem:[%s9880_s8 + $0xc8] sm:$0x1] }
 0x112   : > { %13200 = vst [vmem:[#allocation14_spill] sm:$0xff] %v11217_v1  ;;  %v11225_v30 = vadd.f32 %v1171_v20, %v879_v19  ;;  %9139 = vmatprep.mubr.msk.bf16.mxu0 %vm712_vm3, %v9710_v62  ;;  %v3942_v23 = vor.u32 %v3941_v55, %v3937_v43  ;;  %v3947_v3 = vrot.slane %v3945_v2, 5  ;;  %v3924_v20 = vsel %vm9908_vm4, %v3919_v7, %v3923_v48 }
 0x113   : > { %v8934_v53 = vpop.f32.mrf.mxu0  ;;  %v1187_v1 = vpop.f32.mrf.mxu1  ;;  %v3952_v10 = vrot.slane %v3950_v33, 4  ;;  %v3959_v62 = vshll.u32 %v11215_v21, 16  ;;  %13204 = vst [vmem:[#allocation18_spill] sm:$0xff] %v11238_v8  ;;  %v8249_v17 = vcombine.low %v3914_v54, %v3924_v20  ;;  %v3933_v42 = vrot.slane %v3932_v15, 4  ;;  %13206 = vst [vmem:[#allocation20_spill] sm:$0xff] %v11244_v29 }
 0x114   : > { %13202 = vst [vmem:[#allocation16_spill] sm:$0xff] %v11225_v30  ;;  %v11234_v19 = vadd.f32 %v8968_v40, %v8934_v53  ;;  %v3943_v57 = vrot.slane %v3942_v23, 4  ;;  %v3955_v55 = vrot.slane %v3953_v51, 5  ;;  %v3963_v7 = vshrl.u32 %v11215_v21, 16  ;;  %v8234_v53 = vld [vmem:[%s9880_s8 + $0xcc] sm:$0xf] }
 0x115   : > { %v11240_v30 = vpop.f32.mrf.mxu0  ;;  %v8972_v2 = vpop.f32.mrf.mxu1  ;;  %v3961_v40 = vrot.slane %v3959_v62, 5  ;;  %v3969_v33 = vshll.u32 %v11222_v24, 16  ;;  %9170 = vmatmul.mubr.msk.bf16.gmra.mxu1 %vm712_vm3, %v8249_v17  ;;  %v3938_v15 = vsel %vm9908_vm4, %v3933_v42, %v3937_v43  ;;  %v3974_v48 = vshrl.u32 %v8231_v11, 16  ;;  %v11260_v24 = vld [vmem:[%s9880_s8 + $0xd0] sm:$0xf] }
 0x116   : > { %13203 = vst [vmem:[#allocation17_spill] sm:$0xff] %v11234_v19  ;;  %13205 = vst [vmem:[#allocation19_spill] sm:$0xff] %v11240_v30  ;;  %v3948_v23 = vsel %vm9908_vm4, %v3943_v57, %v3947_v3  ;;  %v3956_v51 = vor.u32 %v3955_v55, %v3952_v10  ;;  %v3965_v19 = vrot.slane %v3963_v7, 4  ;;  %v3977_v28 = vshll.u32 %v8231_v11, 16 }
 0x117   : > { %v8937_v54 = vpop.f32.mrf.mxu0  ;;  %v11255_v20 = vpop.f32.mrf.mxu1  ;;  %v8250_v62 = vcombine.low %v3938_v15, %v3948_v23  ;;  %v3971_v21 = vrot.slane %v3969_v33, 5  ;;  %v3976_v42 = vrot.slane %v3974_v48, 4  ;;  %v3983_v3 = vshll.u32 %v11238_v8, 16 }
 0x118   : > { %13207 = vst [vmem:[#allocation21_spill] sm:$0xff] %v11255_v20  ;;  %v11257_v30 = vadd.f32 %v8971_v31, %v8937_v54  ;;  %v3957_v13 = vrot.slane %v3956_v51, 4  ;;  %v3966_v31 = vor.u32 %v3965_v19, %v3961_v40  ;;  %v3987_v57 = vshrl.u32 %v11238_v8, 16  ;;  %v11272_v54 = vld [vmem:[%s9880_s8 + $0xd4] sm:$0x1] }
 0x119   : > { %9140 = vmatmul.mubr.msk.bf16.gmra.mxu0 %vm712_vm3, %v9711_v44  ;;  %v895_v17 = vpop.f32.mrf.mxu0  ;;  %v8975_v43 = vpop.f32.mrf.mxu1  ;;  %9173 = vmatprep.mubr.msk.bf16.mxu1 %vm712_vm3, %v8250_v62  ;;  %v3993_v44 = vshll.u32 %v11244_v29, 16  ;;  %v3979_v48 = vrot.slane %v3977_v28, 5  ;;  %v3985_v11 = vrot.slane %v3983_v3, 5  ;;  %v3998_v15 = vshrl.u32 %v8234_v53, 16  ;;  %v8270_v51 = vld [vmem:[%s9880_s8 + $0x18] sm:$0xe] }
 0x11a   : > { %13208 = vst [vmem:[#allocation22_spill] sm:$0xff] %v11257_v30  ;;  %v11265_v10 = vadd.f32 %v1187_v1, %v895_v17  ;;  %9143 = vmatprep.mubr.msk.bf16.mxu0 %vm712_vm3, %v9712_v56  ;;  %v3962_v1 = vsel %vm9908_vm4, %v3957_v13, %v3961_v40  ;;  %v3967_v19 = vrot.slane %v3966_v31, 4  ;;  %v3989_v56 = vrot.slane %v3987_v57, 4  ;;  %v9713_v17 = vld [vmem:[%s9880_s8 + $0xcc] sm:$0xff]  }
 0x11b   : > { %v8938_v7 = vpop.f32.mrf.mxu0  ;;  %v1203_v33 = vpop.f32.mrf.mxu1  ;;  %v3980_v55 = vor.u32 %v3979_v48, %v3976_v42  ;;  %v4000_v20 = vrot.slane %v3998_v15, 4  ;;  %v4001_v28 = vshll.u32 %v8234_v53, 16  ;;  %v4007_v3 = vshll.u32 %v11260_v24, 16  ;;  %v8271_v53 = vld [vmem:[%s9880_s8 + $0x24] sm:$0xe] }
 0x11c   : > { %13209 = vst [vmem:[#allocation23_spill] sm:$0xff] %v11265_v10  ;;  %v11276_v23 = vadd.f32 %v8972_v2, %v8938_v7  ;;  %v3972_v30 = vsel %vm9908_vm4, %v3967_v19, %v3971_v21  ;;  %v3990_v13 = vor.u32 %v3989_v56, %v3985_v11  ;;  %v3995_v40 = vrot.slane %v3993_v44, 5  ;;  %v8272_v8 = vld [vmem:[%s9880_s8 + $0x30] sm:$0xe]  ;;  %v9787_v19 = vld [vmem:[%s9880_s8 + $0x20] sm:$0x1] }
 0x11d   : > { %v11279_v62 = vpop.f32.mrf.mxu0  ;;  %v8976_v10 = vpop.f32.mrf.mxu1  ;;  %v4011_v2 = vshrl.u32 %v11260_v24, 16  ;;  %v8251_v31 = vcombine.low %v3962_v1, %v3972_v30  ;;  %v3981_v57 = vrot.slane %v3980_v55, 4  ;;  %v4003_v7 = vrot.slane %v4001_v28, 5  ;;  %v9786_v55 = vld [vmem:[%s9880_s8 + $0x1c] sm:$0xf] }
 0x11e   : > { %13210 = vst [vmem:[#allocation24_spill] sm:$0xff] %v11276_v23  ;;  %13211 = vst [vmem:[#allocation25_spill] sm:$0xff] %v11279_v62  ;;  %v4009_v62 = vrot.slane %v4007_v3, 5  ;;  %v3991_v48 = vrot.slane %v3990_v13, 4  ;;  %v4017_v23 = vshll.u32 %v11272_v54, 16  ;;  %v8286_v29 = vrot.slane %v8270_v51, 9 }
 0x11f   : > { %v11286_v42 = vpop.f32.mrf.mxu1  ;;  %v4013_v15 = vrot.slane %v4011_v2, 4  ;;  %9174 = vmatmul.mubr.msk.bf16.gmra.mxu1 %vm712_vm3, %v8251_v31  ;;  %v3986_v30 = vsel %vm9908_vm4, %v3981_v57, %v3985_v11  ;;  %v4004_v44 = vor.u32 %v4003_v7, %v4000_v20  ;;  %v4381_v1 = vrot.slane %v9786_v55, 5  ;;  %v8273_v7 = vld [vmem:[%s9880_s8 + $0x3c] sm:$0xe] }
 0x120   : > { %13212 = vst [vmem:[#allocation26_spill] sm:$0xff] %v11286_v42  ;;  %v4384_v56 = vrot.slane %v9787_v19, 5  ;;  %v3996_v51 = vsel %vm9908_vm4, %v3991_v48, %v3995_v40  ;;  %v4019_v2 = vrot.slane %v4017_v23, 5  ;;  %v13213_v40 = vrot.slane %v10983_v6, 5  ;;  %v8275_v6 = vld [vmem:[%s9880_s8 + $0x54] sm:$0xe] }
 0x121   : > { %v8941_v21 = vpop.f32.mrf.mxu0  ;;  %9144 = vmatmul.mubr.msk.bf16.gmra.mxu0 %vm712_vm3, %v9713_v17  ;;  %v11297_v28 = vpop.f32.mrf.mxu1  ;;  %v4014_v13 = vor.u32 %v4013_v15, %v4009_v62  ;;  %v8252_v31 = vcombine.low %v3986_v30, %v3996_v51  ;;  %v4005_v42 = vrot.slane %v4004_v44, 4  ;;  %v4382_v20 = vsel %vm10170_vm7, %v8286_v29, %v4381_v1  ;;  %v9788_v44 = vld [vmem:[%s9880_s8 + $0x34] sm:$0xf] }
 0x122   : > { %v11299_v3 = vadd.f32 %v8975_v43, %v8941_v21  ;;  %v4383_v11 = vrot.slane %v4381_v1, 4  ;;  %v8287_v21 = vrot.slane %v8271_v53, 9  ;;  %v4390_v23 = vrot.slane %v13213_v40, 4 }
 0x123   : > { %v911_v17 = vpop.f32.mrf.mxu0  ;;  %v11305_v57 = vpop.f32.mrf.mxu1  ;;  %v4015_v43 = vrot.slane %v4014_v13, 4  ;;  %9177 = vmatprep.mubr.msk.bf16.mxu1 %vm712_vm3, %v8252_v31  ;;  %v4010_v48 = vsel %vm9908_vm4, %v4005_v42, %v4009_v62  ;;  %v4395_v1 = vrot.slane %v9788_v44, 5  ;;  %v13214_v13 = vmov %v13213_v40  ;;  %v8274_v42 = vld [vmem:[%s9880_s8 + $0x48] sm:$0xe] }
 0x124   : > { %v11308_v55 = vadd.f32 %v1203_v33, %v911_v17  ;;  %v4385_v29 = vsel %vm10170_vm7, %v4383_v11, %v4384_v56  ;;  %v8288_v33 = vrot.slane %v8272_v8, 9  ;;  %v4389_v62 = vsel %vm10170_vm7, %v8287_v21, %v13214_v13  ;;  %v9789_v56 = vld [vmem:[%s9880_s8 + $0x44] sm:$0x1]  ;;  %v9790_v21 = vld [vmem:[%s9880_s8 + $0x38] sm:$0x1] }
 0x125   : > { %v8942_v15 = vpop.f32.mrf.mxu0  ;;  %v11317_v30 = vpop.f32.mrf.mxu1  ;;  %v4020_v53 = vsel %vm9908_vm4, %v4015_v43, %v4019_v2  ;;  %v8303_v51 = vcombine.low %v4382_v20, %v4385_v29  ;;  %v4405_v31 = vrot.slane %v9789_v56, 5  ;;  %v13215_v11 = vrot.slane %v10992_v16, 5  ;;  %v9793_v56 = vld [vmem:[%s9880_s8 + $0x50] sm:$0x1] }
 0x126   : > { %v11322_v19 = vadd.f32 %v8976_v10, %v8942_v15  ;;  %v8253_v17 = vcombine.low %v4010_v48, %v4020_v53  ;;  %v4397_v10 = vrot.slane %v4395_v1, 4  ;;  %v4396_v43 = vsel %vm10170_vm7, %v8288_v33, %v4395_v1  ;;  %v9791_v15 = vld [vmem:[%s9880_s8 + $0x40] sm:$0xf]  ;;  %v9792_v53 = vld [vmem:[%s9880_s8 + $0x4c] sm:$0xf] }
 0x127   : > { %v11330_v8 = vpop.f32.mrf.mxu0  ;;  %v4392_v36 = vsel %vm10170_vm7, %v4390_v23, %v13215_v11  ;;  %v11336_v2 = vpop.f32.mrf.mxu1  ;;  %9183 = vmatprep.mubr.msk.bf16.mxu0 %vm712_vm3, %v8303_v51  ;;  %v4398_v40 = vrot.slane %v9790_v21, 5  ;;  %v8289_v48 = vrot.slane %v8273_v7, 9  ;;  %v4402_v23 = vrot.slane %v9791_v15, 5 }
 0x128   : > { %v8304_v20 = vcombine.low %v4389_v62, %v4392_v36  ;;  %9178 = vmatmul.mubr.msk.bf16.gmra.mxu1 %vm712_vm3, %v8253_v17  ;;  %v8290_v44 = vrot.slane %v8274_v42, 9  ;;  %v4409_v13 = vrot.slane %v9792_v53, 5  ;;  %v4412_v11 = vrot.slane %v9793_v56, 5 }
 0x129   : > { %v8981_v16 = vpop.f32.mrf.mxu0  ;;  %v9019_v29 = vpop.f32.mrf.mxu1  ;;  %v4399_v33 = vsel %vm10170_vm7, %v4397_v10, %v4398_v40  ;;  %v8291_v7 = vrot.slane %v8275_v6, 9  ;;  %v4416_v1 = vrot.slane %v11040_v63, 5  ;;  %v4419_v62 = vrot.slane %v11045_v39, 5  ;;  %v8276_v63 = vld [vmem:[%s9880_s8 + $0x60] sm:$0xe] }
 0x12a   : > { %v1645_v51 = vadd.f32 %v8981_v16, %v11015_v50  ;;  %9184 = vmatmul.mubr.msk.bf16.vlgmr.msra.gmra.mxu0 %vm712_vm3, %v8304_v20  ;;  %v8305_v36 = vcombine.low %v4396_v43, %v4399_v33  ;;  %v4403_v42 = vsel %vm10170_vm7, %v8289_v48, %v4402_v23  ;;  %v4404_v21 = vrot.slane %v4402_v23, 4 }
 0x12b   : > { %v1516_v17 = vpop.f32.mrf.mxu0  ;;  %v1891_v15 = vpop.f32.mrf.mxu1  ;;  %v4410_v10 = vsel %vm10170_vm7, %v8290_v44, %v4409_v13  ;;  %v4411_v6 = vrot.slane %v4409_v13, 4  ;;  %v4417_v40 = vsel %vm10170_vm7, %v8291_v7, %v4416_v1  ;;  %v4423_v48 = vrot.slane %v11062_v0, 5  ;;  %v8277_v13 = vld [vmem:[%s9880_s8 + $0x6c] sm:$0xe] }
 0x12c   : > { %v1643_v53 = vadd.f32 %v1516_v17, %v11022_v47  ;;  %v11357_v50 = vadd.f32 %v11297_v28, %v1645_v51  ;;  %9187 = vmatprep.mubr.msk.bf16.mxu0 %vm712_vm3, %v8305_v36  ;;  %v4406_v39 = vsel %vm10170_vm7, %v4404_v21, %v4405_v31  ;;  %v4418_v47 = vrot.slane %v4416_v1, 4 }
 0x12d   : > { %v8982_v20 = vpop.f32.mrf.mxu0  ;;  %v9020_v43 = vpop.f32.mrf.mxu1  ;;  %v8306_v23 = vcombine.low %v4403_v42, %v4406_v39  ;;  %v4413_v44 = vsel %vm10170_vm7, %v4411_v6, %v4412_v11  ;;  %v8292_v7 = vrot.slane %v8276_v63, 9  ;;  %v4425_v1 = vrot.slane %v4423_v48, 4 }
 0x12e   : > { %v1646_v28 = vadd.f32 %v8982_v20, %v11031_v4  ;;  %v11370_v16 = vadd.f32 %v11305_v57, %v1643_v53  ;;  %v8307_v51 = vcombine.low %v4410_v10, %v4413_v44  ;;  %v4420_v33 = vsel %vm10170_vm7, %v4418_v47, %v4419_v62 }
 0x12f   : > { %v1519_v56 = vpop.f32.mrf.mxu0  ;;  %v11375_v31 = vpop.f32.mrf.mxu1  ;;  %v8308_v57 = vcombine.low %v4417_v40, %v4420_v33  ;;  %v4426_v17 = vrot.slane %v11066_v52, 5  ;;  %v4433_v11 = vrot.slane %v11090_v45, 5  ;;  %v8293_v21 = vrot.slane %v8277_v13, 9 }
 0x130   : > { %v11380_v0 = vadd.f32 %v1519_v56, %v11037_v25  ;;  %v11383_v4 = vadd.f32 %v11317_v30, %v1646_v28  ;;  %v4430_v53 = vrot.slane %v11083_v32, 5  ;;  %v4424_v10 = vsel %vm10170_vm7, %v8292_v7, %v4423_v48  ;;  %v8278_v32 = vld [vmem:[%s9880_s8 + $0x78] sm:$0xe] }
 0x131   : > { %v8985_v36 = vpop.f32.mrf.mxu0  ;;  %v9023_v42 = vpop.f32.mrf.mxu1  ;;  %v4437_v20 = vrot.slane %v11102_v18, 5  ;;  %v8294_v13 = vrot.slane %v8278_v32, 9  ;;  %v4440_v33 = vrot.slane %v11109_v38, 5 }
 0x132   : > { %v1649_v62 = vadd.f32 %v8985_v36, %v11051_v34  ;;  %9188 = vmatmul.mubr.msk.bf16.gmra.mxu0 %vm712_vm3, %v8306_v23  ;;  %v4431_v52 = vsel %vm10170_vm7, %v8293_v21, %v4430_v53  ;;  %v4432_v45 = vrot.slane %v4430_v53, 4  ;;  %v4427_v34 = vsel %vm10170_vm7, %v4425_v1, %v4426_v17 }
 0x133   : > { %v1532_v25 = vpop.f32.mrf.mxu0  ;;  %9191 = vmatprep.mubr.msk.bf16.mxu0 %vm712_vm3, %v8307_v51  ;;  %v1907_v30 = vpop.f32.mrf.mxu1  ;;  %v4439_v51 = vrot.slane %v4437_v20, 4 }
 0x134   : > { %v1647_v6 = vadd.f32 %v1532_v25, %v11058_v49  ;;  %v11396_v63 = vadd.f32 %v9019_v29, %v1649_v62  ;;  %v4434_v47 = vsel %vm10170_vm7, %v4432_v45, %v4433_v11  ;;  %v8309_v49 = vcombine.low %v4424_v10, %v4427_v34  ;;  %v8279_v11 = vld [vmem:[%s9880_s8 + $0x84] sm:$0xe] }
 0x135   : > { %v8986_v39 = vpop.f32.mrf.mxu0  ;;  %v9024_v40 = vpop.f32.mrf.mxu1  ;;  %v8310_v23 = vcombine.low %v4431_v52, %v4434_v47  ;;  %v4441_v38 = vsel %vm10170_vm7, %v4439_v51, %v4440_v33  ;;  %v8295_v52 = vrot.slane %v8279_v11, 9  ;;  %v8282_v33 = vld [vmem:[%s9880_s8 + $0xa8] sm:$0xe] }
 0x136   : > { %v1650_v48 = vadd.f32 %v8986_v39, %v11069_v27  ;;  %v11405_v28 = vadd.f32 %v1891_v15, %v1647_v6 }
 0x137   : > { %v1535_v44 = vpop.f32.mrf.mxu0  ;;  %v11407_v29 = vpop.f32.mrf.mxu1 }
 0x138   : > { %v11410_v56 = vadd.f32 %v1535_v44, %v11077_v58  ;;  %v11412_v18 = vadd.f32 %v9020_v43, %v1650_v48  ;;  %v4438_v58 = vsel %vm10170_vm7, %v8294_v13, %v4437_v20  ;;  %v4444_v43 = vrot.slane %v11125_v46, 5 }
 0x139   : > { %v8989_v7 = vpop.f32.mrf.mxu0  ;;  %v9027_v27 = vpop.f32.mrf.mxu1  ;;  %v8311_v6 = vcombine.low %v4438_v58, %v4441_v38  ;;  %v13216_v58 = vld [vmem:[#allocation3_spill] sm:$0xff] }
 0x13a   : > { %v1653_v15 = vadd.f32 %v8989_v7, %v11085_v12  ;;  %9192 = vmatmul.mubr.msk.bf16.gmra.mxu0 %vm712_vm3, %v8308_v57  ;;  %v8280_v12 = vld [vmem:[%s9880_s8 + $0x90] sm:$0xe]  ;;  %v4451_v57 = vrot.slane %v11150_v26, 5  ;;  %v4465_v7 = vrot.slane %v11192_v14, 5 }
 0x13b   : > { %v1548_v1 = vpop.f32.mrf.mxu0  ;;  %9195 = vmatprep.mubr.msk.bf16.mxu0 %vm712_vm3, %v8309_v49  ;;  %v1923_v17 = vpop.f32.mrf.mxu1  ;;  %v8296_v34 = vrot.slane %v8280_v12, 9 }
 0x13c   : > { %v1651_v36 = vadd.f32 %v1548_v1, %v11095_v60  ;;  %v11423_v21 = vadd.f32 %v9023_v42, %v1653_v15  ;;  %v4446_v60 = vrot.slane %v4444_v43, 4  ;;  %v4447_v42 = vrot.slane %v11134_v59, 5  ;;  %v9714_v59 = vld [vmem:[%s13174_s3 + $0x78] sm:$0xff]  }
 0x13d   : > { %v8990_v53 = vpop.f32.mrf.mxu0  ;;  %v9028_v62 = vpop.f32.mrf.mxu1  ;;  %v4453_v20 = vrot.slane %v4451_v57, 4  ;;  %v4452_v44 = vsel %vm10170_vm7, %v8296_v34, %v4451_v57  ;;  %9215 = vmatprep.subr.bf16.mxu1 %v9714_v59  ;;  %v13217_v57 = vld [vmem:[#allocation7_spill] sm:$0xff] }
 0x13e   : > { %v1654_v25 = vadd.f32 %v8990_v53, %v11104_v35  ;;  %v11430_v10 = vadd.f32 %v1907_v30, %v1651_v36  ;;  %v4454_v35 = vrot.slane %v11153_v22, 5  ;;  %v4448_v22 = vsel %vm10170_vm7, %v4446_v60, %v4447_v42  ;;  %9216 = vmatpush3.bf16.msra.mxu1 %v9714_v59  ;;  %v13219_v60 = vld [vmem:[#allocation11_spill] sm:$0xff] }
 0x13f   : > { %v1551_v45 = vpop.f32.mrf.mxu0  ;;  %v11432_v46 = vpop.f32.mrf.mxu1  ;;  %v4461_v53 = vrot.slane %v13217_v57, 5  ;;  %v4468_v42 = vrot.slane %v13219_v60, 5 }
 0x140   : > { %v11436_v32 = vadd.f32 %v1551_v45, %v11114_v5  ;;  %v11438_v26 = vadd.f32 %v9024_v40, %v1654_v25  ;;  %v4445_v5 = vsel %vm10170_vm7, %v8295_v52, %v4444_v43  ;;  %v4455_v51 = vsel %vm10170_vm7, %v4453_v20, %v4454_v35  ;;  %v13218_v52 = vld [vmem:[#allocation4_spill] sm:$0xff]  ;;  %v13220_v20 = vld [vmem:[#allocation6_spill] sm:$0xff] }
 0x141   : > { %v8993_v30 = vpop.f32.mrf.mxu0  ;;  %v9031_v39 = vpop.f32.mrf.mxu1  ;;  %v8312_v36 = vcombine.low %v4445_v5, %v4448_v22  ;;  %v8298_v25 = vrot.slane %v8282_v33, 9  ;;  %v13221_v22 = vld [vmem:[#allocation13_spill] sm:$0xff] }
 0x142   : > { %v1657_v47 = vadd.f32 %v8993_v30, %v11129_v61  ;;  %9196 = vmatmul.mubr.msk.bf16.gmra.mxu0 %vm712_vm3, %v8310_v23  ;;  %v8281_v61 = vld [vmem:[%s9880_s8 + $0x9c] sm:$0xe]  ;;  %v4458_v23 = vrot.slane %v11171_v9, 5  ;;  %v9715_v30 = vld [vmem:[%s13174_s3 + $0x70] sm:$0xff]  }
 0x143   : > { %v1564_v48 = vpop.f32.mrf.mxu0  ;;  %9199 = vmatprep.mubr.msk.bf16.mxu0 %vm712_vm3, %v8311_v6  ;;  %v1939_v40 = vpop.f32.mrf.mxu1  ;;  %v8297_v9 = vrot.slane %v8281_v61, 9  ;;  %v4467_v6 = vrot.slane %v4465_v7, 4  ;;  %v4466_v5 = vsel %vm10170_vm7, %v8298_v25, %v4465_v7  ;;  %v13222_v61 = vld [vmem:[#allocation8_spill] sm:$0xff]  ;;  %9217 = vmatprep.subr.bf16.mxu1 %v9715_v30 }
 0x144   : > { %v1655_v49 = vadd.f32 %v1564_v48, %v11139_v41  ;;  %v11456_v13 = vadd.f32 %v9027_v27, %v1657_v47  ;;  %v8313_v41 = vcombine.low %v4452_v44, %v4455_v51  ;;  %v4460_v12 = vrot.slane %v4458_v23, 4  ;;  %9218 = vmatpush3.bf16.msra.mxu1 %v9715_v30 }
 0x145   : > { %v8994_v15 = vpop.f32.mrf.mxu0  ;;  %v9032_v1 = vpop.f32.mrf.mxu1  ;;  %v4472_v44 = vrot.slane %v13221_v22, 5  ;;  %v4469_v33 = vsel %vm10170_vm7, %v4467_v6, %v4468_v42  ;;  %v13225_v6 = vld [vmem:[#allocation15_spill] sm:$0xff]  ;;  %v13227_v22 = vld [vmem:[#allocation14_spill] sm:$0xff] }
 0x146   : > { %v1658_v11 = vadd.f32 %v8994_v15, %v13216_v58  ;;  %v11463_v43 = vadd.f32 %v1923_v17, %v1655_v49  ;;  %v4462_v59 = vsel %vm10170_vm7, %v4460_v12, %v4461_v53  ;;  %v8283_v15 = vld [vmem:[%s9880_s8 + $0xb4] sm:$0xe]  ;;  %v13223_v58 = vld [vmem:[#allocation18_spill] sm:$0xff]  ;;  %v4475_v60 = vrot.slane %v13225_v6, 5 }
 0x147   : > { %v1567_v38 = vpop.f32.mrf.mxu0  ;;  %v11465_v27 = vpop.f32.mrf.mxu1  ;;  %v8299_v25 = vrot.slane %v8283_v15, 9 }
 0x148   : > { %v11469_v14 = vadd.f32 %v1567_v38, %v13218_v52  ;;  %v11471_v45 = vadd.f32 %v9028_v62, %v1658_v11  ;;  %v4459_v62 = vsel %vm10170_vm7, %v8297_v9, %v4458_v23  ;;  %v4479_v11 = vrot.slane %v13223_v58, 5  ;;  %v8284_v9 = vld [vmem:[%s9880_s8 + $0xc0] sm:$0xe] }
 0x149   : > { %v8997_v17 = vpop.f32.mrf.mxu0  ;;  %v9035_v34 = vpop.f32.mrf.mxu1  ;;  %v13224_v38 = vld [vmem:[#allocation9_spill] sm:$0xff]  ;;  %v8314_v12 = vcombine.low %v4459_v62, %v4462_v59  ;;  %v4474_v52 = vrot.slane %v4472_v44, 4 }
 0x14a   : > { %v1661_v35 = vadd.f32 %v8997_v17, %v13220_v20  ;;  %9200 = vmatmul.mubr.msk.bf16.gmra.mxu0 %vm712_vm3, %v8312_v36  ;;  %v8300_v17 = vrot.slane %v8284_v9, 9  ;;  %v4481_v20 = vrot.slane %v4479_v11, 4 }
 0x14b   : > { %v1580_v47 = vpop.f32.mrf.mxu0  ;;  %9203 = vmatprep.mubr.msk.bf16.mxu0 %vm712_vm3, %v8313_v41  ;;  %v1955_v48 = vpop.f32.mrf.mxu1 }
 0x14c   : > { %v1659_v49 = vadd.f32 %v1580_v47, %v13222_v61  ;;  %v11488_v51 = vadd.f32 %v9031_v39, %v1661_v35  ;;  %v8315_v39 = vcombine.low %v4466_v5, %v4469_v33  ;;  %v13226_v35 = vld [vmem:[#allocation20_spill] sm:$0xff]  ;;  %v4473_v5 = vsel %vm10170_vm7, %v8299_v25, %v4472_v44  ;;  %v9716_v44 = vld [vmem:[%s13174_s3 + $0x68] sm:$0xff]  }
 0x14d   : > { %v8998_v23 = vpop.f32.mrf.mxu0  ;;  %v9036_v36 = vpop.f32.mrf.mxu1  ;;  %v4482_v30 = vrot.slane %v13226_v35, 5  ;;  %v13228_v33 = vld [vmem:[#allocation16_spill] sm:$0xff]  ;;  %9219 = vmatprep.subr.bf16.mxu1 %v9716_v44 }
 0x14e   : > { %v1662_v41 = vadd.f32 %v8998_v23, %v13224_v38  ;;  %v11496_v7 = vadd.f32 %v1939_v40, %v1659_v49  ;;  %v4486_v49 = vrot.slane %v11260_v24, 5  ;;  %v4480_v23 = vsel %vm10170_vm7, %v8300_v17, %v4479_v11  ;;  %v8285_v38 = vld [vmem:[%s9880_s8 + $0xcc] sm:$0xe]  ;;  %9220 = vmatpush3.bf16.msra.mxu1 %v9716_v44 }
 0x14f   : > { %v11498_v57 = vpop.f32.mrf.mxu0  ;;  %v11500_v53 = vpop.f32.mrf.mxu1  ;;  %v4483_v9 = vsel %vm10170_vm7, %v4481_v20, %v4482_v30  ;;  %v4489_v20 = vrot.slane %v11272_v54, 5  ;;  %v13231_v54 = vld [vmem:[#allocation23_spill] sm:$0xff] }
 0x150   : > { %v11503_v42 = vadd.f32 %v9032_v1, %v1662_v41  ;;  %v4476_v1 = vsel %vm10170_vm7, %v4474_v52, %v4475_v60  ;;  %v8317_v6 = vcombine.low %v4480_v23, %v4483_v9  ;;  %v8301_v60 = vrot.slane %v8285_v38, 9  ;;  %v13232_v9 = vld [vmem:[#allocation24_spill] sm:$0xff] }
 0x151   : > { %v9001_v47 = vpop.f32.mrf.mxu0  ;;  %v9039_v40 = vpop.f32.mrf.mxu1  ;;  %v8316_v52 = vcombine.low %v4473_v5, %v4476_v1  ;;  %v4488_v17 = vrot.slane %v4486_v49, 4 }
 0x152   : > { %v1665_v62 = vadd.f32 %v9001_v47, %v13227_v22  ;;  %9204 = vmatmul.mubr.msk.bf16.gmra.mxu0 %vm712_vm3, %v8314_v12  ;;  %v13230_v22 = vld [vmem:[#allocation22_spill] sm:$0xff] }
 0x153   : > { %v1596_v59 = vpop.f32.mrf.mxu0  ;;  %9207 = vmatprep.mubr.msk.bf16.mxu0 %vm712_vm3, %v8315_v39  ;;  %v1971_v61 = vpop.f32.mrf.mxu1  ;;  %v13229_v39 = vld [vmem:[#allocation17_spill] sm:$0xff]  ;;  %v4490_v5 = vsel %vm10170_vm7, %v4488_v17, %v4489_v20 }
 0x154   : > { %v1663_v15 = vadd.f32 %v1596_v59, %v13228_v33  ;;  %v11515_v58 = vadd.f32 %v9035_v34, %v1665_v62  ;;  %v4487_v59 = vsel %vm10170_vm7, %v8301_v60, %v4486_v49 }
 0x155   : > { %v9002_v41 = vpop.f32.mrf.mxu0  ;;  %v9040_v12 = vpop.f32.mrf.mxu1 }
 0x156   : > { %v1666_v25 = vadd.f32 %v9002_v41, %v13229_v39  ;;  %v11526_v24 = vadd.f32 %v1955_v48, %v1663_v15  ;;  %v8318_v41 = vcombine.low %v4487_v59, %v4490_v5  ;;  %v9717_v39 = vld [vmem:[%s13174_s3 + $0x60] sm:$0xff]  }
 0x157   : > { %v11528_v34 = vpop.f32.mrf.mxu0  ;;  %v11530_v11 = vpop.f32.mrf.mxu1  ;;  %9221 = vmatprep.subr.bf16.mxu1 %v9717_v39 }
 0x158   : > { %v11533_v35 = vadd.f32 %v9036_v36, %v1666_v25  ;;  %9222 = vmatpush3.bf16.msra.mxu1 %v9717_v39 }
 0x159   : > { %v9005_v30 = vpop.f32.mrf.mxu0  ;;  %v9043_v47 = vpop.f32.mrf.mxu1 }
 0x15a   : > { %v1669_v62 = vadd.f32 %v9005_v30, %v13230_v22  ;;  %9208 = vmatmul.mubr.msk.bf16.gmra.mxu0 %vm712_vm3, %v8316_v52 }
 0x15b   : > { %v1612_v48 = vpop.f32.mrf.mxu0  ;;  %9211 = vmatprep.mubr.msk.bf16.mxu0 %vm712_vm3, %v8317_v6  ;;  %v1987_v1 = vpop.f32.mrf.mxu1 }
 0x15c   : > { %v1667_v33 = vadd.f32 %v1612_v48, %v13231_v54  ;;  %v11543_v36 = vadd.f32 %v9039_v40, %v1669_v62 }
 0x15d   : > { %v9006_v15 = vpop.f32.mrf.mxu0  ;;  %v9044_v23 = vpop.f32.mrf.mxu1 }
 0x15e   : > { %v1670_v38 = vadd.f32 %v9006_v15, %v13232_v9  ;;  %v11546_v44 = vadd.f32 %v1971_v61, %v1667_v33 }
 0x15f   : > { %v11551_v49 = vpop.f32.mrf.mxu0  ;;  %v11553_v37 = vpop.f32.mrf.mxu1 }
 0x160   : > { %v11555_v25 = vadd.f32 %v9040_v12, %v1670_v38 }
 0x161   : > { %v9009_v40 = vpop.f32.mrf.mxu0  ;;  %v11557_v52 = vpop.f32.mrf.mxu1 }
 0x162   : > { %v1673_v6 = vadd.f32 %v9009_v40, %v11299_v3  ;;  %9212 = vmatmul.mubr.msk.bf16.gmra.mxu0 %vm712_vm3, %v8318_v41  ;;  %v9719_v3 = vld [vmem:[%s13174_s3 + $0x38] sm:$0xff]   ;;  %v9722_v41 = vld [vmem:[%s13174_s3 + $0x28] sm:$0xff]  }
 0x163   : > { %v1628_v61 = vpop.f32.mrf.mxu0  ;;  %v11561_v60 = vpop.f32.mrf.mxu1  ;;  %9263 = vmatprep.subr.bf16.mxu0 %v9719_v3 }
 0x164   : > { %v1671_v17 = vadd.f32 %v1628_v61, %v11308_v55  ;;  %v11564_v20 = vadd.f32 %v9043_v47, %v1673_v6  ;;  %v9718_v55 = vld [vmem:[%s13174_s3 + $0x58] sm:$0xff]   ;;  %9264 = vmatpush3.bf16.msra.mxu0 %v9719_v3 }
 0x165   : > { %v9010_v30 = vpop.f32.mrf.mxu0  ;;  %v11566_v22 = vpop.f32.mrf.mxu1  ;;  %9223 = vmatprep.subr.bf16.mxu1 %v9718_v55 }
 0x166   : > { %v1674_v12 = vadd.f32 %v9010_v30, %v11322_v19  ;;  %v11569_v62 = vadd.f32 %v1987_v1, %v1671_v17  ;;  %v9720_v1 = vld [vmem:[%s13174_s3 + $0x30] sm:$0xff]   ;;  %9224 = vmatpush3.bf16.msra.mxu1 %v9718_v55  ;;  %v9803_v17 = vmov 0.0  }
 0x167   : > { %v11574_v48 = vpop.f32.mrf.mxu0  ;;  %v11576_v59 = vpop.f32.mrf.mxu1  ;;  %9265 = vmatprep.subr.bf16.mxu0 %v9720_v1  ;;  %4894 = vst [vmem:[#allocation2 + $0x30] sm:$0xff] %v9803_v17  ;;  %4895 = vst [vmem:[#allocation2 + $0x38] sm:$0xff] %v9803_v17 }
 0x168   : > { %v11578_v5 = vadd.f32 %v9044_v23, %v1674_v12  ;;  %9266 = vmatpush3.bf16.msra.mxu0 %v9720_v1  ;;  %4888 = vst [vmem:[#allocation2] sm:$0xff] %v9803_v17  ;;  %4889 = vst [vmem:[#allocation2 + $0x8] sm:$0xff] %v9803_v17 }
 0x169   : > { %v9049_v47 = vpop.f32.mrf.mxu0  ;;  %v11583_v54 = vpop.f32.mrf.mxu1  ;;  %9267 = vmatprep.subr.bf16.mxu0 %v9722_v41  ;;  %4890 = vst [vmem:[#allocation2 + $0x10] sm:$0x3] %v9803_v17  ;;  %4891 = vst [vmem:[#allocation2 + $0x18] sm:$0xff] %v9803_v17 }
 0x16a   : > { %v11586_v19 = vadd.f32 %v9049_v47, %v11357_v50  ;;  %4892 = vst [vmem:[#allocation2 + $0x20] sm:$0xff] %v9803_v17  ;;  %4893 = vst [vmem:[#allocation2 + $0x28] sm:$0x3] %v9803_v17 }
 0x16b   : > { %v2601_v33 = vpop.f32.mrf.mxu0  ;;  %v11591_v15 = vpop.f32.mrf.mxu1  ;;  %4896 = vst [vmem:[#allocation2 + $0x40] sm:$0x3] %v9803_v17  ;;  %4897 = vst [vmem:[#allocation2 + $0x48] sm:$0xff] %v9803_v17 }
 0x16c   : > { %v11594_v23 = vadd.f32 %v2601_v33, %v11370_v16  ;;  %9268 = vmatpush3.bf16.msra.mxu0 %v9722_v41  ;;  %4898 = vst [vmem:[#allocation2 + $0x50] sm:$0xff] %v9803_v17  ;;  %4899 = vst [vmem:[#allocation2 + $0x58] sm:$0x3] %v9803_v17  ;;  %v9724_v33 = vld [vmem:[%s13174_s3 + $0x48] sm:$0xff]  }
 0x16d   : > { %v9050_v9 = vpop.f32.mrf.mxu0  ;;  %v11596_v38 = vpop.f32.mrf.mxu1  ;;  %4900 = vst [vmem:[#allocation2 + $0x60] sm:$0xff] %v9803_v17  ;;  %4901 = vst [vmem:[#allocation2 + $0x68] sm:$0xff] %v9803_v17 }
 0x16e   : > { %v11599_v50 = vadd.f32 %v9050_v9, %v11383_v4  ;;  %4902 = vst [vmem:[#allocation2 + $0x70] sm:$0x3] %v9803_v17  ;;  %4903 = vst [vmem:[#allocation2 + $0x78] sm:$0xff] %v9803_v17  ;;  %v9721_v4 = vld [vmem:[%s13174_s3 + $0x50] sm:$0xff]   ;;  %v9725_v9 = vld [vmem:[%s13174_s3 + $0x18] sm:$0xff]  }
 0x16f   : > { %v11604_v39 = vpop.f32.mrf.mxu0  ;;  %v11606_v40 = vpop.f32.mrf.mxu1  ;;  %4904 = vst [vmem:[#allocation2 + $0x80] sm:$0xff] %v9803_v17  ;;  %4905 = vst [vmem:[#allocation2 + $0x88] sm:$0x3] %v9803_v17  ;;  %9225 = vmatprep.subr.bf16.mxu1 %v9721_v4 }
 0x170   : > { %4906 = vst [vmem:[#allocation2 + $0x90] sm:$0xff] %v9803_v17  ;;  %4907 = vst [vmem:[#allocation2 + $0x98] sm:$0xff] %v9803_v17  ;;  %9226 = vmatpush3.bf16.msra.mxu1 %v9721_v4  ;;  %v9726_v4 = vld [vmem:[%s13174_s3 + $0x10] sm:$0xff]  }
 0x171   : > { %v9053_v6 = vpop.f32.mrf.mxu0  ;;  %v11608_v16 = vpop.f32.mrf.mxu1  ;;  %4908 = vst [vmem:[#allocation2 + $0xa0] sm:$0x3] %v9803_v17  ;;  %4909 = vst [vmem:[#allocation2 + $0xa8] sm:$0xff] %v9803_v17  ;;  %9227 = vmatprep.subr.bf16.mxu1 %v9724_v33 }
 0x172   : > { %v11611_v61 = vadd.f32 %v9053_v6, %v11396_v63  ;;  %4910 = vst [vmem:[#allocation2 + $0xb0] sm:$0xff] %v9803_v17  ;;  %4911 = vst [vmem:[#allocation2 + $0xb8] sm:$0x3] %v9803_v17  ;;  %v9723_v63 = vld [vmem:[%s13174_s3 + $0x20] sm:$0xff]  }
 0x173   : > { %4912 = vst [vmem:[#allocation2 + $0xc0] sm:$0xff] %v9803_v17  ;;  %4913 = vst [vmem:[#allocation2 + $0xc8] sm:$0xff] %v9803_v17  ;;  %v2617_v30 = vpop.f32.mrf.mxu0  ;;  %v11619_v12 = vpop.f32.mrf.mxu1  ;;  %9269 = vmatprep.subr.bf16.mxu0 %v9723_v63 }
 0x174   : > { %4914 = vst [vmem:[#allocation2 + $0xd0] sm:$0x3] %v9803_v17  ;;  %4915 = vst [vmem:[#allocation2 + $0xd8] sm:$0xff] %v9803_v17  ;;  %v11622_v3 = vadd.f32 %v2617_v30, %v11405_v28  ;;  %9270 = vmatpush3.bf16.msra.mxu0 %v9723_v63  ;;  %9228 = vmatpush3.bf16.msra.mxu1 %v9724_v33  ;;  %v9727_v63 = vld [vmem:[%s13174_s3 + $0x40] sm:$0xff]  }
 0x175   : > { %4916 = vst [vmem:[#allocation2 + $0xe0] sm:$0xff] %v9803_v17  ;;  %4917 = vst [vmem:[#allocation2 + $0xe8] sm:$0x3] %v9803_v17  ;;  %v9054_v55 = vpop.f32.mrf.mxu0  ;;  %v11624_v47 = vpop.f32.mrf.mxu1  ;;  %9271 = vmatprep.subr.bf16.mxu0 %v9725_v9  ;;  %9229 = vmatprep.subr.bf16.mxu1 %v9727_v63  ;;  %v5039_v33 = vld [vmem:[#allocation2 + $0x1] sm:$0xff] }
 0x176   : > { %4918 = vst [vmem:[#allocation2 + $0xf0] sm:$0xff] %v9803_v17  ;;  %4919 = vst [vmem:[#allocation2 + $0xf8] sm:$0xff] %v9803_v17  ;;  %v11627_v1 = vadd.f32 %v9054_v55, %v11412_v18 }
 0x177   : > { %4920 = vst [vmem:[#allocation2 + $0x100] sm:$0x3] %v9803_v17  ;;  %4921 = vst [vmem:[#allocation2 + $0x108] sm:$0xff] %v9803_v17  ;;  %v11635_v28 = vpop.f32.mrf.mxu0  ;;  %v11637_v41 = vpop.f32.mrf.mxu1 }
 0x178   : > { %4922 = vst [vmem:[#allocation2 + $0x110] sm:$0xff] %v9803_v17  ;;  %4923 = vst [vmem:[#allocation2 + $0x118] sm:$0x3] %v9803_v17  ;;  %9272 = vmatpush3.bf16.msra.mxu0 %v9725_v9  ;;  %v5040_v9 = vld [vmem:[#allocation2 + $0x9] sm:$0xff]  ;;  %9230 = vmatpush3.bf16.msra.mxu1 %v9727_v63 }
 0x179   : > { %4924 = vst [vmem:[#allocation2 + $0x120] sm:$0xff] %v9803_v17  ;;  %4925 = vst [vmem:[#allocation2 + $0x128] sm:$0xff] %v9803_v17  ;;  %v9057_v6 = vpop.f32.mrf.mxu0  ;;  %9273 = vmatprep.subr.bf16.mxu0 %v9726_v4 }
 0x17a   : > { %4926 = vst [vmem:[#allocation2 + $0x130] sm:$0x3] %v9803_v17  ;;  %4927 = vst [vmem:[#allocation2 + $0x138] sm:$0xff] %v9803_v17  ;;  %v11642_v18 = vadd.f32 %v9057_v6, %v11423_v21 }
 0x17b   : > { %4928 = vst [vmem:[#allocation2 + $0x140] sm:$0xff] %v9803_v17  ;;  %4929 = vst [vmem:[#allocation2 + $0x148] sm:$0x3] %v9803_v17  ;;  %v2633_v30 = vpop.f32.mrf.mxu0 }
 0x17c   : > { %4930 = vst [vmem:[#allocation2 + $0x150] sm:$0xff] %v9803_v17  ;;  %4931 = vst [vmem:[#allocation2 + $0x158] sm:$0xff] %v9803_v17  ;;  %9274 = vmatpush3.bf16.msra.mxu0 %v9726_v4 }
 0x17d   : > { %4932 = vst [vmem:[#allocation2 + $0x160] sm:$0x3] %v9803_v17  ;;  %4933 = vst [vmem:[#allocation2 + $0x168] sm:$0xff] %v9803_v17  ;;  %v9058_v21 = vpop.f32.mrf.mxu0 }
 0x17e   : > { %4934 = vst [vmem:[#allocation2 + $0x170] sm:$0xff] %v9803_v17  ;;  %4935 = vst [vmem:[#allocation2 + $0x178] sm:$0x3] %v9803_v17 }
 0x17f   : > { %4936 = vst [vmem:[#allocation2 + $0x180] sm:$0xff] %v9803_v17  ;;  %4937 = vst [vmem:[#allocation2 + $0x188] sm:$0xff] %v9803_v17 }
 0x180   : > { %4938 = vst [vmem:[#allocation2 + $0x190] sm:$0x3] %v9803_v17  ;;  %4939 = vst [vmem:[#allocation2 + $0x198] sm:$0xff] %v9803_v17 }
 0x181   : > { %4940 = vst [vmem:[#allocation2 + $0x1a0] sm:$0xff] %v9803_v17  ;;  %4941 = vst [vmem:[#allocation2 + $0x1a8] sm:$0x3] %v9803_v17  ;;  %v11639_v17 = vpop.f32.mrf.mxu1 }
 0x182   : > { %13233 = vst [vmem:[#allocation3_spill] sm:$0xff] %v11619_v12  ;;  %13234 = vst [vmem:[#allocation7_spill] sm:$0xff] %v11624_v47  ;;  %v11658_v47 = vadd.f32 %v9058_v21, %v11438_v26  ;;  %v11663_v12 = vpop.f32.mrf.mxu0  ;;  %v9729_v26 = vld [vmem:[%s13174_s3] sm:$0xff]  }
 0x183   : > { %13235 = vst [vmem:[#allocation4_spill] sm:$0xff] %v11637_v41  ;;  %13236 = vst [vmem:[#allocation11_spill] sm:$0xff] %v11639_v17  ;;  %v11650_v55 = vpop.f32.mrf.mxu1  ;;  %v11653_v41 = vadd.f32 %v2633_v30, %v11430_v10  ;;  %v5071_v17 = vpack.c.bf16 %v5040_v9, %v5039_v33 }
 0x184   : > { %13237 = vst [vmem:[#allocation6_spill] sm:$0xff] %v11650_v55  ;;  %v9728_v55 = vld [vmem:[%s13174_s3 + $0x8] sm:$0xff]   ;;  %v9061_v30 = vpop.f32.mrf.mxu0 }
 0x185   : > { %13238 = vst [vmem:[#allocation13_spill] sm:$0xff] %v11653_v41  ;;  %v11655_v6 = vpop.f32.mrf.mxu1  ;;  %9231 = vmatprep.mubr.bf16.mxu1 %v5071_v17  ;;  %9275 = vmatprep.subr.bf16.mxu0 %v9728_v55  ;;  %v11670_v4 = vadd.f32 %v9061_v30, %v11456_v13 }
 0x186   : > { %13239 = vst [vmem:[#allocation8_spill] sm:$0xff] %v11655_v6  ;;  %9276 = vmatpush3.bf16.msra.mxu0 %v9728_v55  ;;  %v2649_v63 = vpop.f32.mrf.mxu0 }
 0x187   : > { %v11665_v10 = vpop.f32.mrf.mxu1  ;;  %v11678_v9 = vadd.f32 %v2649_v63, %v11463_v43  ;;  %9277 = vmatprep.subr.bf16.mxu0 %v9729_v26 }
 0x188   : > { %13240 = vst [vmem:[#allocation18_spill] sm:$0xff] %v11665_v10  ;;  %v9062_v17 = vpop.f32.mrf.mxu0 }
 0x189   : > { %v11667_v41 = vpop.f32.mrf.mxu1  ;;  %v11683_v55 = vadd.f32 %v9062_v17, %v11471_v45  ;;  %v11699_v45 = vld [vmem:[%s13174_s3 + $0xb8] sm:$0xff]  }
 0x18a   : > { %13241 = vst [vmem:[#allocation9_spill] sm:$0xff] %v11667_v41  ;;  %9278 = vmatpush3.bf16.msra.mxu0 %v9729_v26  ;;  %v11685_v13 = vpop.f32.mrf.mxu0  ;;  %v9804_v41 = vmov 0.0|0.0   ;;  %13248 = vst [vmem:[#allocation23_spill] sm:$0xff] %v11699_v45  ;;  %9311 = vmatprep.subr.bf16.mxu1 %v11699_v45 }
 0x18b   : > { %v11675_v33 = vpop.f32.mrf.mxu1  ;;  %9279 = vmatprep.mubr.bf16.mxu0 %v9804_v41 }
 0x18c   : > { %13242 = vst [vmem:[#allocation15_spill] sm:$0xff] %v11675_v33  ;;  %v9065_v10 = vpop.f32.mrf.mxu0 }
 0x18d   : > { %v11680_v21 = vpop.f32.mrf.mxu1  ;;  %v11692_v43 = vadd.f32 %v9065_v10, %v11488_v51 }
 0x18e   : > { %13243 = vst [vmem:[#allocation20_spill] sm:$0xff] %v11680_v21  ;;  %v2665_v63 = vpop.f32.mrf.mxu0 }
 0x18f   : > { %v11687_v30 = vpop.f32.mrf.mxu1  ;;  %13246 = vst [vmem:[#allocation17_spill] sm:$0xff] %v11692_v43  ;;  %v11702_v26 = vadd.f32 %v2665_v63, %v11496_v7  ;;  %v13313_v43 = vld [vmem:[#allocation12_spill] sm:$0xff] }
 0x190   : > { %13244 = vst [vmem:[#allocation14_spill] sm:$0xff] %v11687_v30  ;;  %v9066_v17 = vpop.f32.mrf.mxu0 }
 0x191   : > { %v11689_v6 = vpop.f32.mrf.mxu1  ;;  %13249 = vst [vmem:[#allocation24_spill] sm:$0xff] %v11702_v26  ;;  %v11708_v41 = vadd.f32 %v9066_v17, %v11503_v42 }
 0x192   : > { %13245 = vst [vmem:[#allocation16_spill] sm:$0xff] %v11689_v6  ;;  %v11710_v51 = vpop.f32.mrf.mxu0 }
 0x193   : > { %v11694_v33 = vpop.f32.mrf.mxu1  ;;  %13251 = vst [vmem:[#allocation28_spill] sm:$0xff] %v11708_v41  ;;  %13252 = vst [vmem:[#allocation29_spill] sm:$0xff] %v11710_v51 }
 0x194   : > { %13247 = vst [vmem:[#allocation22_spill] sm:$0xff] %v11694_v33  ;;  %v9069_v33 = vpop.f32.mrf.mxu0 }
 0x195   : > { %v11704_v30 = vpop.f32.mrf.mxu1  ;;  %v11717_v21 = vadd.f32 %v9069_v33, %v11515_v58 }
 0x196   : > { %13250 = vst [vmem:[#allocation27_spill] sm:$0xff] %v11704_v30  ;;  %v2681_v7 = vpop.f32.mrf.mxu0 }
 0x197   : > { %v11712_v10 = vpop.f32.mrf.mxu1  ;;  %13255 = vst [vmem:[#allocation32_spill] sm:$0xff] %v11717_v21  ;;  %v11722_v30 = vadd.f32 %v2681_v7, %v11526_v24 }
 0x198   : > { %13253 = vst [vmem:[#allocation30_spill] sm:$0xff] %v11712_v10  ;;  %v9070_v45 = vpop.f32.mrf.mxu0 }
 0x199   : > { %v11714_v6 = vpop.f32.mrf.mxu1  ;;  %13257 = vst [vmem:[#allocation34_spill] sm:$0xff] %v11722_v30  ;;  %v11727_v42 = vadd.f32 %v9070_v45, %v11533_v35 }
 0x19a   : > { %13254 = vst [vmem:[#allocation31_spill] sm:$0xff] %v11714_v6  ;;  %v11729_v17 = vpop.f32.mrf.mxu0 }
 0x19b   : > { %v11719_v63 = vpop.f32.mrf.mxu1  ;;  %13259 = vst [vmem:[#allocation36_spill] sm:$0xff] %v11727_v42  ;;  %13260 = vst [vmem:[#allocation37_spill] sm:$0xff] %v11729_v17 }
 0x19c   : > { %13256 = vst [vmem:[#allocation33_spill] sm:$0xff] %v11719_v63  ;;  %v9073_v6 = vpop.f32.mrf.mxu0 }
 0x19d   : > { %v11724_v26 = vpop.f32.mrf.mxu1  ;;  %v11734_v58 = vadd.f32 %v9073_v6, %v11543_v36 }
 0x19e   : > { %13258 = vst [vmem:[#allocation35_spill] sm:$0xff] %v11724_v26  ;;  %v2697_v63 = vpop.f32.mrf.mxu0 }
 0x19f   : > { %v11731_v10 = vpop.f32.mrf.mxu1  ;;  %13262 = vst [vmem:[#allocation39_spill] sm:$0xff] %v11734_v58  ;;  %v11739_v24 = vadd.f32 %v2697_v63, %v11546_v44 }
 0x1a0   : > { %13261 = vst [vmem:[#allocation38_spill] sm:$0xff] %v11731_v10  ;;  %v9074_v26 = vpop.f32.mrf.mxu0 }
 0x1a1   : > { %v11736_v33 = vpop.f32.mrf.mxu1  ;;  %13264 = vst [vmem:[#allocation41_spill] sm:$0xff] %v11739_v24  ;;  %v11744_v35 = vadd.f32 %v9074_v26, %v11555_v25  ;;  %v11764_v25 = vld [vmem:[%s13174_s3 + $0xf8] sm:$0xff]  }
 0x1a2   : > { %13263 = vst [vmem:[#allocation40_spill] sm:$0xff] %v11736_v33  ;;  %v11746_v45 = vpop.f32.mrf.mxu0  ;;  %13273 = vst [vmem:[#allocation50_spill] sm:$0xff] %v11764_v25  ;;  %9359 = vmatprep.subr.bf16.mxu0 %v11764_v25 }
 0x1a3   : > { %v11741_v7 = vpop.f32.mrf.mxu1  ;;  %13266 = vst [vmem:[#allocation43_spill] sm:$0xff] %v11744_v35  ;;  %13267 = vst [vmem:[#allocation44_spill] sm:$0xff] %v11746_v45 }
 0x1a4   : > { %13265 = vst [vmem:[#allocation42_spill] sm:$0xff] %v11741_v7  ;;  %v9077_v10 = vpop.f32.mrf.mxu0 }
 0x1a5   : > { %v11748_v42 = vpop.f32.mrf.mxu1  ;;  %v11751_v36 = vadd.f32 %v9077_v10, %v11564_v20 }
 0x1a6   : > { %13268 = vst [vmem:[#allocation45_spill] sm:$0xff] %v11748_v42  ;;  %v2713_v6 = vpop.f32.mrf.mxu0 }
 0x1a7   : > { %13269 = vst [vmem:[#allocation46_spill] sm:$0xff] %v11751_v36  ;;  %v11753_v33 = vpop.f32.mrf.mxu1  ;;  %v11756_v44 = vadd.f32 %v2713_v6, %v11569_v62 }
 0x1a8   : > { %13270 = vst [vmem:[#allocation47_spill] sm:$0xff] %v11753_v33  ;;  %v9078_v63 = vpop.f32.mrf.mxu0 }
 0x1a9   : > { %13271 = vst [vmem:[#allocation48_spill] sm:$0xff] %v11756_v44  ;;  %v11759_v7 = vadd.f32 %v9078_v63, %v11578_v5  ;;  %v11768_v42 = vpop.f32.mrf.mxu1 }
 0x1aa   : > { %v11766_v26 = vpop.f32.mrf.mxu0 }
 0x1ab   : > { %13272 = vst [vmem:[#allocation49_spill] sm:$0xff] %v11759_v7  ;;  %13274 = vst [vmem:[#allocation51_spill] sm:$0xff] %v11766_v26  ;;  %v11773_v62 = vpop.f32.mrf.mxu1 }
 0x1ac   : > { %v9117_v20 = vpop.f32.mrf.mxu0 }
 0x1ad   : > { %v11779_v63 = vpop.f32.mrf.mxu1 }
 0x1ae   : > { %v11771_v10 = vpop.f32.mrf.mxu0 }
 0x1af   : > { %v11783_v7 = vpop.f32.mrf.mxu1 }
 0x1b0   : > { %v11775_v6 = vpop.f32.mrf.mxu0  ;;  %13275 = vst [vmem:[#allocation52_spill] sm:$0xff] %v11783_v7  ;;  %v13314_v7 = vld [vmem:[#allocation25_spill] sm:$0xff] }
 0x1b1   : > { %v11789_v36 = vpop.f32.mrf.mxu1 }
 0x1b2   : > { %v11777_v5 = vpop.f32.mrf.mxu0  ;;  %13278 = vst [vmem:[#allocation55_spill] sm:$0xff] %v11789_v36 }
 0x1b3   : > { %v11795_v45 = vpop.f32.mrf.mxu1 }
 0x1b4   : > { %v11781_v33 = vpop.f32.mrf.mxu0  ;;  %13281 = vst [vmem:[#allocation58_spill] sm:$0xff] %v11795_v45 }
 0x1b5   : > { %v11801_v17 = vpop.f32.mrf.mxu1 }
 0x1b6   : > { %v11785_v44 = vpop.f32.mrf.mxu0  ;;  %13284 = vst [vmem:[#allocation61_spill] sm:$0xff] %v11801_v17 }
 0x1b7   : > { %13276 = vst [vmem:[#allocation53_spill] sm:$0xff] %v11785_v44  ;;  %v11807_v41 = vpop.f32.mrf.mxu1 }
 0x1b8   : > { %v11787_v26 = vpop.f32.mrf.mxu0  ;;  %13287 = vst [vmem:[#allocation64_spill] sm:$0xff] %v11807_v41 }
 0x1b9   : > { %13277 = vst [vmem:[#allocation54_spill] sm:$0xff] %v11787_v26 }
 0x1ba   : > { %v11791_v25 = vpop.f32.mrf.mxu0 }
 0x1bb   : > { %13279 = vst [vmem:[#allocation56_spill] sm:$0xff] %v11791_v25  ;;  %v11813_v25 = vpop.f32.mrf.mxu1 }
 0x1bc   : > { %v11793_v35 = vpop.f32.mrf.mxu0  ;;  %13290 = vst [vmem:[#allocation67_spill] sm:$0xff] %v11813_v25 }
 0x1bd   : > { %13280 = vst [vmem:[#allocation57_spill] sm:$0xff] %v11793_v35 }
 0x1be   : > { %v11797_v24 = vpop.f32.mrf.mxu0 }
 0x1bf   : > { %13282 = vst [vmem:[#allocation59_spill] sm:$0xff] %v11797_v24  ;;  %v11819_v24 = vpop.f32.mrf.mxu1 }
 0x1c0   : > { %v11799_v58 = vpop.f32.mrf.mxu0  ;;  %13293 = vst [vmem:[#allocation70_spill] sm:$0xff] %v11819_v24 }
 0x1c1   : > { %13283 = vst [vmem:[#allocation60_spill] sm:$0xff] %v11799_v58 }
 0x1c2   : > { %v11803_v30 = vpop.f32.mrf.mxu0 }
 0x1c3   : > { %13285 = vst [vmem:[#allocation62_spill] sm:$0xff] %v11803_v30  ;;  %v11825_v30 = vpop.f32.mrf.mxu1 }
 0x1c4   : > { %v11805_v21 = vpop.f32.mrf.mxu0  ;;  %13296 = vst [vmem:[#allocation73_spill] sm:$0xff] %v11825_v30 }
 0x1c5   : > { %13286 = vst [vmem:[#allocation63_spill] sm:$0xff] %v11805_v21 }
 0x1c6   : > { %v11809_v26 = vpop.f32.mrf.mxu0 }
 0x1c7   : > { %13288 = vst [vmem:[#allocation65_spill] sm:$0xff] %v11809_v26  ;;  %v11831_v26 = vpop.f32.mrf.mxu1 }
 0x1c8   : > { %v11811_v36 = vpop.f32.mrf.mxu0  ;;  %13299 = vst [vmem:[#allocation76_spill] sm:$0xff] %v11831_v26  ;;  %v13310_v26 = vld [vmem:[#allocation10_spill] sm:$0xff] }
 0x1c9   : > { %13289 = vst [vmem:[#allocation66_spill] sm:$0xff] %v11811_v36 }
 0x1ca   : > { %v11815_v35 = vpop.f32.mrf.mxu0 }
 0x1cb   : > { %13291 = vst [vmem:[#allocation68_spill] sm:$0xff] %v11815_v35  ;;  %v11837_v35 = vpop.f32.mrf.mxu1 }
 0x1cc   : > { %v11817_v45 = vpop.f32.mrf.mxu0  ;;  %13302 = vst [vmem:[#allocation79_spill] sm:$0xff] %v11837_v35  ;;  %v13312_v35 = vld [vmem:[#allocation19_spill] sm:$0xff] }
 0x1cd   : > { %13292 = vst [vmem:[#allocation69_spill] sm:$0xff] %v11817_v45 }
 0x1ce   : > { %v11821_v58 = vpop.f32.mrf.mxu0 }
 0x1cf   : > { %13294 = vst [vmem:[#allocation71_spill] sm:$0xff] %v11821_v58  ;;  %v11843_v58 = vpop.f32.mrf.mxu1 }
 0x1d0   : > { %v11823_v17 = vpop.f32.mrf.mxu0  ;;  %13305 = vst [vmem:[#allocation82_spill] sm:$0xff] %v11843_v58  ;;  %v13316_v58 = vld [vmem:[#allocation26_spill] sm:$0xff] }
 0x1d1   : > { %13295 = vst [vmem:[#allocation72_spill] sm:$0xff] %v11823_v17 }
 0x1d2   : > { %v11827_v21 = vpop.f32.mrf.mxu0 }
 0x1d3   : > { %13297 = vst [vmem:[#allocation74_spill] sm:$0xff] %v11827_v21  ;;  %v11849_v21 = vpop.f32.mrf.mxu1 }
 0x1d4   : > { %v11829_v41 = vpop.f32.mrf.mxu0  ;;  %13308 = vst [vmem:[#allocation85_spill] sm:$0xff] %v11849_v21 }
 0x1d5   : > { %13298 = vst [vmem:[#allocation75_spill] sm:$0xff] %v11829_v41 }
 0x1d6   : > { %v11833_v36 = vpop.f32.mrf.mxu0 }
 0x1d7   : > { %13300 = vst [vmem:[#allocation77_spill] sm:$0xff] %v11833_v36  ;;  %v13311_v36 = vld [vmem:[#allocation5_spill] sm:$0xff] }
 0x1d8   : > { %v11835_v25 = vpop.f32.mrf.mxu0  ;;  %v1159_v51 = vadd.f32 %v13311_v36, %v13310_v26  ;;  %v11868_v36 = vpop.f32.mrf.mxu1 }
 0x1d9   : > { %13301 = vst [vmem:[#allocation78_spill] sm:$0xff] %v11835_v25 }
 0x1da   : > { %v11839_v45 = vpop.f32.mrf.mxu0  ;;  %v1660_v21 = vadd.f32 %v11498_v57, %v1159_v51 }
 0x1db   : > { %13303 = vst [vmem:[#allocation80_spill] sm:$0xff] %v11839_v45  ;;  %v1175_v45 = vadd.f32 %v13313_v43, %v13312_v35  ;;  %v2007_v43 = vadd.f32 %v11375_v31, %v11410_v56  ;;  %v2015_v31 = vadd.f32 %v11432_v46, %v11469_v14  ;;  %v3204_v14 = vadd.f32 %v11583_v54, %v11611_v61 }
 0x1dc   : > { %v11841_v24 = vpop.f32.mrf.mxu0  ;;  %v2019_v56 = vadd.f32 %v11465_v27, %v1660_v21  ;;  %v3208_v54 = vadd.f32 %v11608_v16, %v11642_v18  ;;  %v13319_v21 = vld [vmem:[#allocation7_spill] sm:$0xff] }
 0x1dd   : > { %13304 = vst [vmem:[#allocation81_spill] sm:$0xff] %v11841_v24  ;;  %v13315_v24 = vld [vmem:[#allocation21_spill] sm:$0xff]  ;;  %v2733_v51 = vadd.f32 %v11635_v28, %v2007_v43  ;;  %v13321_v16 = vld [vmem:[#allocation11_spill] sm:$0xff]  ;;  %v13326_v43 = vld [vmem:[#allocation52_spill] sm:$0xff] }
 0x1de   : > { %v11845_v17 = vpop.f32.mrf.mxu0  ;;  %v1191_v44 = vadd.f32 %v13315_v24, %v13314_v7  ;;  %v1664_v24 = vadd.f32 %v11528_v34, %v1175_v45  ;;  %v3201_v34 = vadd.f32 %v11566_v22, %v11599_v50  ;;  %v11937_v18 = vadd.f32 %v13321_v16, %v11670_v4 }
 0x1df   : > { %13306 = vst [vmem:[#allocation83_spill] sm:$0xff] %v11845_v17  ;;  %v1207_v17 = vadd.f32 %v13316_v58, %v11330_v8 }
 0x1e0   : > { %v11847_v30 = vpop.f32.mrf.mxu0  ;;  %v1668_v7 = vadd.f32 %v11551_v49, %v1191_v44  ;;  %v3560_v50 = vadd.f32 %v11775_v6, %v3201_v34  ;;  %v13322_v44 = vld [vmem:[#allocation6_spill] sm:$0xff]  ;;  %v13325_v6 = vld [vmem:[#allocation53_spill] sm:$0xff] }
 0x1e1   : > { %13307 = vst [vmem:[#allocation84_spill] sm:$0xff] %v11847_v30  ;;  %v2003_v30 = vadd.f32 %v11336_v2, %v11380_v0  ;;  %v1672_v8 = vadd.f32 %v11574_v48, %v1207_v17  ;;  %v3198_v2 = vadd.f32 %v11561_v60, %v11594_v23  ;;  %v11891_v60 = vpop.f32.mrf.mxu1  ;;  %v11896_v23 = vadd.f32 %v11500_v53, %v1664_v24  ;;  %v13331_v34 = vld [vmem:[#allocation54_spill] sm:$0xff] }
 0x1e2   : > { %v11851_v41 = vpop.f32.mrf.mxu0  ;;  %v3202_v53 = vadd.f32 %v11591_v15, %v11622_v3  ;;  %v4286_v58 = vadd.f32 %v11779_v63, %v3560_v50 }
 0x1e3   : > { %13309 = vst [vmem:[#allocation86_spill] sm:$0xff] %v11851_v41  ;;  %v3200_v41 = vadd.f32 %v11557_v52, %v11586_v19  ;;  %v2729_v0 = vadd.f32 %v11604_v39, %v2003_v30  ;;  %v2011_v19 = vadd.f32 %v11407_v29, %v11436_v32  ;;  %v3557_v49 = vadd.f32 %v11771_v10, %v3198_v2  ;;  %v11925_v3 = vpop.f32.mrf.mxu1  ;;  %v13320_v30 = vld [vmem:[#allocation4_spill] sm:$0xff] }
 0x1e4   : > { %v11855_v25 = vpop.f32.mrf.mxu0  ;;  %v11899_v29 = vadd.f32 %v11530_v11, %v1668_v7  ;;  %v11902_v32 = vadd.f32 %v11553_v37, %v1672_v8  ;;  %v3205_v11 = vadd.f32 %v11596_v38, %v11627_v1  ;;  %v3203_v37 = vadd.f32 %v11606_v40, %v2733_v51  ;;  %v13317_v1 = vld [vmem:[#allocation13_spill] sm:$0xff]  ;;  %v13318_v40 = vld [vmem:[#allocation3_spill] sm:$0xff] }
 0x1e5   : > { %v3559_v57 = vadd.f32 %v9117_v20, %v3200_v41  ;;  %v2737_v46 = vadd.f32 %v11663_v12, %v2011_v19  ;;  %v3199_v27 = vadd.f32 %v11576_v59, %v2729_v0  ;;  %v2741_v39 = vadd.f32 %v11685_v13, %v2015_v31  ;;  %v11919_v59 = vld [vmem:[%s13173_s2] ss:$0 sm:$0xff]  ;;  %v11954_v63 = vpop.f32.mrf.mxu1  ;;  %v13330_v51 = vld [vmem:[#allocation55_spill] sm:$0xff] }
 0x1e6   : > { %v11870_v26 = vpop.f32.mrf.mxu0  ;;  %v4283_v61 = vadd.f32 %v11773_v62, %v3557_v49  ;;  %v3206_v28 = vadd.f32 %v13318_v40, %v13317_v1  ;;  %v3209_v13 = vadd.f32 %v13319_v21, %v11658_v47  ;;  %v11943_v20 = vadd.f32 %v13322_v44, %v11678_v9  ;;  %v13323_v47 = vld [vmem:[#allocation8_spill] sm:$0xff]  ;;  %v13324_v62 = vld [vmem:[#allocation18_spill] sm:$0xff]  ;;  %v13327_v9 = vld [vmem:[#allocation17_spill] sm:$0xff] }
 0x1e7   : > { %v4285_v22 = vadd.f32 %v11768_v42, %v3559_v57  ;;  %v3558_v15 = vadd.f32 %v11777_v5, %v3199_v27  ;;  %v11932_v41 = vadd.f32 %v13320_v30, %v2737_v46  ;;  %v3563_v42 = vadd.f32 %v11781_v33, %v3204_v14  ;;  %v13328_v0 = vld [vmem:[#allocation9_spill] sm:$0xff]  ;;  %v13337_v40 = vld [vmem:[#allocation56_spill] sm:$0xff]  ;;  %v11977_v30 = vpop.f32.mrf.mxu1 }
 0x1e8   : > { %v11880_v52 = vpop.f32.mrf.mxu0  ;;  %v11947_v10 = vadd.f32 %v13323_v47, %v11683_v55  ;;  %v11950_v33 = vadd.f32 %v13324_v62, %v2741_v39  ;;  %v3561_v5 = vadd.f32 %v13325_v6, %v3202_v53  ;;  %v11959_v57 = vadd.f32 %v13328_v0, %v13327_v9  ;;  %v13329_v55 = vld [vmem:[#allocation29_spill] sm:$0xff]  ;;  %v13332_v53 = vld [vmem:[#allocation24_spill] sm:$0xff]  ;;  %v13333_v39 = vld [vmem:[#allocation15_spill] sm:$0xff] }
 0x1e9   : > { %v4284_v24 = vadd.f32 %v13326_v43, %v3558_v15  ;;  %v2745_v19 = vadd.f32 %v13329_v55, %v2019_v56  ;;  %v4289_v31 = vadd.f32 %v13330_v51, %v3563_v42  ;;  %v3564_v49 = vadd.f32 %v13331_v34, %v3205_v11  ;;  %v13335_v15 = vld [vmem:[#allocation20_spill] sm:$0xff]  ;;  %v13336_v56 = vld [vmem:[#allocation58_spill] sm:$0xff]  ;;  %v13341_v6 = vld [vmem:[#allocation61_spill] sm:$0xff] }
 0x1ea   : > { %v11893_v48 = vpop.f32.mrf.mxu0  ;;  %v4287_v1 = vadd.f32 %v13336_v56, %v3561_v5  ;;  %v3562_v21 = vadd.f32 %v13337_v40, %v3203_v37  ;;  %v13339_v44 = vld [vmem:[#allocation32_spill] sm:$0xff]  ;;  %v13342_v37 = vld [vmem:[#allocation57_spill] sm:$0xff]  ;;  %v13343_v9 = vld [vmem:[#allocation34_spill] sm:$0xff] }
 0x1eb   : > { %v13340_v47 = vld [vmem:[#allocation16_spill] sm:$0xff]  ;;  %v4290_v5 = vadd.f32 %v13341_v6, %v3564_v49  ;;  %v13344_v0 = vld [vmem:[#allocation22_spill] sm:$0xff] }
 0x1ec   : > { %v9185_v12 = vpop.f32.mrf.mxu0  ;;  %v11986_v62 = vadd.f32 %v13340_v47, %v13339_v44  ;;  %v11993_v55 = vadd.f32 %v13344_v0, %v13343_v9  ;;  %v13352_v44 = vld [vmem:[#allocation70_spill] sm:$0xff] }
 0x1ed   : > { %v4755_v38 = vadd.f32 %v9185_v12, %v4285_v22  ;;  %v11969_v12 = vadd.f32 %v13333_v39, %v13332_v53  ;;  %v13353_v6 = vld [vmem:[#allocation62_spill] sm:$0xff] }
 0x1ee   : > { %v4626_v17 = vpop.f32.mrf.mxu0 }
 0x1ef   : > { %v4794_v35 = vadd.f32 %v11919_v59, %v4755_v38  ;;  %v4753_v45 = vadd.f32 %v4626_v17, %v4283_v61  ;;  %v13334_v61 = vld [vmem:[#allocation28_spill] sm:$0xff] }
 0x1f0   : > { %v9186_v4 = vpop.f32.mrf.mxu0  ;;  %v11973_v38 = vadd.f32 %v13335_v15, %v13334_v61  ;;  %v13348_v61 = vld [vmem:[#allocation36_spill] sm:$0xff]  ;;  %v13349_v15 = vld [vmem:[#allocation27_spill] sm:$0xff] }
 0x1f1   : > { %v4826_v7 = vmax.f32 %v4794_v35, 0.0  ;;  %v4792_v8 = vadd.f32 %v11919_v59, %v4753_v45  ;;  %v4756_v2 = vadd.f32 %v9186_v4, %v4286_v58  ;;  %v13338_v35 = vld [vmem:[#allocation14_spill] sm:$0xff]  ;;  %v3567_v4 = vadd.f32 %v13342_v37, %v3208_v54  ;;  %v11999_v54 = vpop.f32.mrf.mxu1  ;;  %v13354_v37 = vld [vmem:[#allocation63_spill] sm:$0xff] }
 0x1f2   : > { %v4629_v46 = vpop.f32.mrf.mxu0  ;;  %v11982_v45 = vadd.f32 %v13338_v35, %v2745_v19  ;;  %v13345_v19 = vld [vmem:[#allocation37_spill] sm:$0xff]  ;;  %v12004_v56 = vadd.f32 %v13349_v15, %v13348_v61 }
 0x1f3   : > { %v11964_v27 = vmin.f32 %v4826_v7, 6.0  ;;  %v4824_v14 = vmax.f32 %v4792_v8, 0.0  ;;  %v4795_v22 = vadd.f32 %v11919_v59, %v4756_v2  ;;  %v4754_v50 = vadd.f32 %v4629_v46, %v4284_v24  ;;  %v13347_v46 = vld [vmem:[#allocation59_spill] sm:$0xff]  ;;  %v13361_v61 = vld [vmem:[#allocation41_spill] sm:$0xff] }
 0x1f4   : > { %v9189_v11 = vpop.f32.mrf.mxu0  ;;  %v2749_v51 = vadd.f32 %v13345_v19, %v11896_v23  ;;  %v3565_v49 = vadd.f32 %v13347_v46, %v3206_v28  ;;  %v13351_v23 = vld [vmem:[#allocation60_spill] sm:$0xff]  ;;  %v13357_v19 = vld [vmem:[#allocation31_spill] sm:$0xff]  ;;  %v13359_v46 = vld [vmem:[#allocation65_spill] sm:$0xff] }
 0x1f5   : > { %4945 = vst [vmem:[#allocation2 + $0x31] sm:$0xff] %v11964_v27  ;;  %v4856_v42 = vmin.f32 %v4824_v14, 6.0  ;;  %v4827_v17 = vmax.f32 %v4795_v22, 0.0  ;;  %v4793_v16 = vadd.f32 %v11919_v59, %v4754_v50  ;;  %v4759_v58 = vadd.f32 %v9189_v11, %v4289_v31  ;;  %v13346_v31 = vld [vmem:[#allocation64_spill] sm:$0xff]  ;;  %v13362_v15 = vld [vmem:[#allocation33_spill] sm:$0xff] }
 0x1f6   : > { %v4642_v43 = vpop.f32.mrf.mxu0  ;;  %v4288_v34 = vadd.f32 %v13346_v31, %v3562_v21  ;;  %v3568_v11 = vadd.f32 %v13351_v23, %v3209_v13  ;;  %v4291_v47 = vadd.f32 %v13352_v44, %v3565_v49  ;;  %v13358_v31 = vld [vmem:[#allocation73_spill] sm:$0xff]  ;;  %v3569_v49 = vadd.f32 %v13359_v46, %v11943_v20  ;;  %v13364_v20 = vld [vmem:[#allocation76_spill] sm:$0xff] }
 0x1f7   : > { %4943 = vst [vmem:[#allocation2 + $0x19] sm:$0xff] %v4856_v42  ;;  %v4859_v24 = vmin.f32 %v4827_v17, 6.0  ;;  %v4825_v7 = vmax.f32 %v4793_v16, 0.0  ;;  %v4798_v8 = vadd.f32 %v11919_v59, %v4759_v58  ;;  %v4757_v2 = vadd.f32 %v4642_v43, %v4287_v1  ;;  %v13350_v1 = vld [vmem:[#allocation67_spill] sm:$0xff] }
 0x1f8   : > { %v9190_v14 = vpop.f32.mrf.mxu0  ;;  %v4293_v40 = vadd.f32 %v13350_v1, %v3567_v4  ;;  %v3571_v4 = vadd.f32 %v13354_v37, %v11937_v18  ;;  %v13356_v18 = vld [vmem:[#allocation39_spill] sm:$0xff]  ;;  %v12041_v1 = vadd.f32 %v13362_v15, %v13361_v61 }
 0x1f9   : > { %4946 = vst [vmem:[#allocation2 + $0x39] sm:$0xff] %v4859_v24  ;;  %v4857_v22 = vmin.f32 %v4825_v7, 6.0  ;;  %v4830_v50 = vmax.f32 %v4798_v8, 0.0  ;;  %v4796_v53 = vadd.f32 %v11919_v59, %v4757_v2  ;;  %v4760_v39 = vadd.f32 %v9190_v14, %v4290_v5 }
 0x1fa   : > { %v4645_v21 = vpop.f32.mrf.mxu0  ;;  %v5073_v28 = vpack.c.bf16 %v4859_v24, %v11964_v27  ;;  %v3566_v5 = vadd.f32 %v13353_v6, %v11932_v41  ;;  %v9731_v27 = vld [vmem:[%s13174_s3 + $0xb0] sm:$0xff]   ;;  %v12020_v24 = vpop.f32.mrf.mxu1  ;;  %v13355_v41 = vld [vmem:[#allocation30_spill] sm:$0xff] }
 0x1fb   : > { %4944 = vst [vmem:[#allocation2 + $0x21] sm:$0xff] %v4857_v22  ;;  %v12009_v17 = vmin.f32 %v4830_v50, 6.0  ;;  %v4828_v16 = vmax.f32 %v4796_v53, 0.0  ;;  %v4799_v58 = vadd.f32 %v11919_v59, %v4760_v39  ;;  %v4758_v35 = vadd.f32 %v4645_v21, %v4288_v34  ;;  %v13365_v21 = vld [vmem:[#allocation79_spill] sm:$0xff] }
 0x1fc   : > { %v9193_v43 = vpop.f32.mrf.mxu0  ;;  %v5072_v13 = vpack.c.bf16 %v4857_v22, %v4856_v42  ;;  %v12027_v0 = vadd.f32 %v13355_v41, %v2749_v51  ;;  %v12031_v42 = vadd.f32 %v13357_v19, %v13356_v18  ;;  %v4294_v34 = vadd.f32 %v13358_v31, %v3568_v11  ;;  %v13360_v51 = vld [vmem:[#allocation23_spill] sm:$0xff]  ;;  %v12050_v44 = vpop.f32.mrf.mxu1 }
 0x1fd   : > { %4949 = vst [vmem:[#allocation2 + $0x61] sm:$0xff] %v12009_v17  ;;  %v12023_v7 = vmin.f32 %v4828_v16, 6.0  ;;  %v4831_v8 = vmax.f32 %v4799_v58, 0.0  ;;  %v4797_v2 = vadd.f32 %v11919_v59, %v4758_v35  ;;  %v4763_v9 = vadd.f32 %v9193_v43, %v4293_v40  ;;  %v13363_v40 = vld [vmem:[#allocation44_spill] sm:$0xff]  ;;  %v9732_v35 = vld [vmem:[%s13174_s3 + $0xa8] sm:$0xff]  }
 0x1fe   : > { %v4658_v14 = vpop.f32.mrf.mxu0  ;;  %9232 = vmatmul.mubr.bf16.vlgmr.msra.gmra.mxu1 %v5072_v13  ;;  %v2753_v23 = vadd.f32 %v13363_v40, %v11899_v29  ;;  %v4292_v11 = vadd.f32 %v13364_v20, %v3566_v5  ;;  %v4297_v16 = vadd.f32 %v13365_v21, %v3571_v4  ;;  %v13366_v29 = vld [vmem:[#allocation66_spill] sm:$0xff]  ;;  %v9736_v40 = vld [vmem:[%s13174_s3 + $0xf0] sm:$0xff]   ;;  %v13372_v21 = vld [vmem:[#allocation85_spill] sm:$0xff] }
 0x1ff   : > { %4947 = vst [vmem:[#allocation2 + $0x49] sm:$0xff] %v12023_v7  ;;  %v4863_v22 = vmin.f32 %v4831_v8, 6.0  ;;  %v4829_v50 = vmax.f32 %v4797_v2, 0.0  ;;  %v4802_v53 = vadd.f32 %v11919_v59, %v4763_v9  ;;  %v4761_v39 = vadd.f32 %v4658_v14, %v4291_v47  ;;  %9312 = vmatpush3.bf16.msra.mxu1 %v13360_v51  ;;  %9235 = vmatprep.mubr.bf16.mxu1 %v5073_v28  ;;  %v13367_v13 = vld [vmem:[#allocation82_spill] sm:$0xff]  ;;  %v13368_v8 = vld [vmem:[#allocation68_spill] sm:$0xff]  ;;  %v13371_v20 = vld [vmem:[#allocation35_spill] sm:$0xff] }
 0x200   : > { %v9194_v58 = vpop.f32.mrf.mxu0  ;;  %9313 = vmatprep.subr.bf16.mxu1 %v9731_v27  ;;  %v4980_v43 = vld [vmem:[#allocation2 + $0x38] sm:$0xff]  ;;  %v3572_v5 = vadd.f32 %v13366_v29, %v11947_v10  ;;  %v4295_v4 = vadd.f32 %v13367_v13, %v3569_v49  ;;  %v3570_v2 = vadd.f32 %v13368_v8, %v11950_v33  ;;  %v13369_v10 = vld [vmem:[#allocation69_spill] sm:$0xff]  ;;  %v13374_v13 = vld [vmem:[#allocation38_spill] sm:$0xff] }
 0x201   : > { %4950 = vst [vmem:[#allocation2 + $0x69] sm:$0xff] %v4863_v22  ;;  %v4861_v28 = vmin.f32 %v4829_v50, 6.0  ;;  %v4834_v47 = vmax.f32 %v4802_v53, 0.0  ;;  %v4800_v6 = vadd.f32 %v11919_v59, %v4761_v39  ;;  %v4764_v37 = vadd.f32 %v9194_v58, %v4294_v34  ;;  %v4977_v14 = vld [vmem:[#allocation2 + $0x18] sm:$0xff]  ;;  %v4979_v50 = vld [vmem:[#allocation2 + $0x30] sm:$0xff] }
 0x202   : > { %v4661_v9 = vpop.f32.mrf.mxu0  ;;  %v4978_v41 = vld [vmem:[#allocation2 + $0x20] sm:$0xff]  ;;  %v5075_v18 = vpack.c.bf16 %v4863_v22, %v12009_v17  ;;  %v3575_v49 = vadd.f32 %v13369_v10, %v11959_v57  ;;  %v12066_v33 = vpack.c.bf16 %v4980_v43, %v4979_v50  ;;  %v12069_v22 = vpop.f32.mrf.mxu1  ;;  %v4298_v58 = vadd.f32 %v13372_v21, %v3572_v5  ;;  %v13377_v50 = vld [vmem:[#allocation74_spill] sm:$0xff] }
 0x203   : > { %4948 = vst [vmem:[#allocation2 + $0x51] sm:$0xff] %v4861_v28  ;;  %v12059_v19 = vmin.f32 %v4834_v47, 6.0  ;;  %v4832_v31 = vmax.f32 %v4800_v6, 0.0  ;;  %v4803_v46 = vadd.f32 %v11919_v59, %v4764_v37  ;;  %v4762_v34 = vadd.f32 %v4661_v9, %v4292_v11  ;;  %9314 = vmatpush3.bf16.msra.mxu1 %v9731_v27  ;;  %v9733_v57 = vld [vmem:[%s13174_s3 + $0xa0] sm:$0xff]  }
 0x204   : > { %v9197_v53 = vpop.f32.mrf.mxu0  ;;  %v12064_v39 = vpack.c.bf16 %v4978_v41, %v4977_v14  ;;  %v5074_v17 = vpack.c.bf16 %v4861_v28, %v12023_v7  ;;  %9315 = vmatprep.subr.bf16.mxu1 %v9732_v35  ;;  %v13370_v7 = vld [vmem:[#allocation43_spill] sm:$0xff]  ;;  %v12095_v5 = vadd.f32 %v13374_v13, %v2753_v23  ;;  %v4301_v8 = vadd.f32 %v11891_v60, %v3575_v49  ;;  %v13375_v41 = vld [vmem:[#allocation50_spill] sm:$0xff]  ;;  %v13376_v23 = vld [vmem:[#allocation72_spill] sm:$0xff] }
 0x205   : > { %4953 = vst [vmem:[#allocation2 + $0x91] sm:$0xff] %v12059_v19  ;;  %v12072_v51 = vmin.f32 %v4832_v31, 6.0  ;;  %v4835_v61 = vmax.f32 %v4803_v46, 0.0  ;;  %v4801_v27 = vadd.f32 %v11919_v59, %v4762_v34  ;;  %v4767_v15 = vadd.f32 %v9197_v53, %v4297_v16  ;;  %v13373_v28 = vld [vmem:[#allocation71_spill] sm:$0xff]  ;;  %v12100_v31 = vpop.f32.mrf.mxu1  ;;  %v9738_v60 = vld [vmem:[%s13174_s3 + $0xe8] sm:$0xff]   ;;  %v4983_v21 = vld [vmem:[#allocation2 + $0x60] sm:$0xff] }
 0x206   : > { %v12083_v11 = vadd.f32 %v13371_v20, %v13370_v7  ;;  %v3573_v47 = vadd.f32 %v13373_v28, %v11969_v12  ;;  %9280 = vmatmul.mubr.bf16.vlgmr.msra.gmra.mxu0 %v12064_v39  ;;  %v4674_v16 = vpop.f32.mrf.mxu0  ;;  %9236 = vmatmul.mubr.bf16.gmra.mxu1 %v5074_v17  ;;  %v4296_v12 = vadd.f32 %v11868_v36, %v3570_v2  ;;  %v9734_v36 = vld [vmem:[%s13174_s3 + $0x98] sm:$0xff]   ;;  %v4981_v20 = vld [vmem:[#allocation2 + $0x48] sm:$0xff] }
 0x207   : > { %4951 = vst [vmem:[#allocation2 + $0x79] sm:$0xff] %v12072_v51  ;;  %v12090_v6 = vmin.f32 %v4835_v61, 6.0  ;;  %v4833_v37 = vmax.f32 %v4801_v27, 0.0  ;;  %v4806_v43 = vadd.f32 %v11919_v59, %v4767_v15  ;;  %v4765_v29 = vadd.f32 %v4674_v16, %v4295_v4  ;;  %9283 = vmatprep.mubr.bf16.mxu0 %v12066_v33  ;;  %9239 = vmatprep.mubr.bf16.mxu1 %v5075_v18  ;;  %v12125_v28 = vpop.f32.mrf.mxu1 }
 0x208   : > { %v9198_v9 = vpop.f32.mrf.mxu0  ;;  %9316 = vmatpush3.bf16.msra.mxu1 %v9732_v35  ;;  %9360 = vmatpush3.bf16.msra.mxu0 %v13375_v41  ;;  %v4984_v14 = vld [vmem:[#allocation2 + $0x68] sm:$0xff]  ;;  %v3576_v35 = vadd.f32 %v13376_v23, %v11973_v38  ;;  %v4299_v2 = vadd.f32 %v11925_v3, %v3573_v47  ;;  %v3574_v10 = vadd.f32 %v13377_v50, %v11982_v45 }
 0x209   : > { %4954 = vst [vmem:[#allocation2 + $0x99] sm:$0xff] %v12090_v6  ;;  %v4865_v46 = vmin.f32 %v4833_v37, 6.0  ;;  %v4838_v4 = vmax.f32 %v4806_v43, 0.0  ;;  %v4804_v34 = vadd.f32 %v11919_v59, %v4765_v29  ;;  %v4768_v18 = vadd.f32 %v9198_v9, %v4298_v58  ;;  %9317 = vmatprep.subr.bf16.mxu1 %v9733_v57  ;;  %9361 = vmatprep.subr.bf16.mxu0 %v9736_v40  ;;  %v9737_v37 = vld [vmem:[%s13174_s3 + $0x90] sm:$0xff]   ;;  %v13379_v29 = vld [vmem:[#allocation77_spill] sm:$0xff]  ;;  %v12155_v23 = vpop.f32.mrf.mxu1 }
 0x20a   : > { %v4677_v49 = vpop.f32.mrf.mxu0  ;;  %v4982_v53 = vld [vmem:[#allocation2 + $0x50] sm:$0xff]  ;;  %v5077_v17 = vpack.c.bf16 %v12090_v6, %v12059_v19  ;;  %v12122_v3 = vpack.c.bf16 %v4984_v14, %v4983_v21  ;;  %v3577_v13 = vadd.f32 %v13379_v29, %v11993_v55  ;;  %v4300_v55 = vadd.f32 %v11977_v30, %v3574_v10  ;;  %v9740_v30 = vld [vmem:[%s13174_s3 + $0x88] sm:$0xff]   ;;  %v13383_v10 = vld [vmem:[#allocation80_spill] sm:$0xff] }
 0x20b   : > { %4952 = vst [vmem:[#allocation2 + $0x81] sm:$0xff] %v4865_v46  ;;  %v12117_v61 = vmin.f32 %v4838_v4, 6.0  ;;  %v4836_v27 = vmax.f32 %v4804_v34, 0.0  ;;  %v4807_v15 = vadd.f32 %v11919_v59, %v4768_v18  ;;  %v4766_v7 = vadd.f32 %v4677_v49, %v4296_v12  ;;  %v13382_v34 = vld [vmem:[#allocation78_spill] sm:$0xff] }
 0x20c   : > { %v9201_v38 = vpop.f32.mrf.mxu0  ;;  %v12120_v58 = vpack.c.bf16 %v4982_v53, %v4981_v20  ;;  %v5076_v45 = vpack.c.bf16 %v4865_v46, %v12072_v51  ;;  %9318 = vmatpush3.bf16.msra.mxu1 %v9733_v57  ;;  %9362 = vmatpush3.bf16.msra.mxu0 %v9736_v40  ;;  %v9739_v51 = vld [vmem:[%s13174_s3 + $0xe0] sm:$0xff]   ;;  %v4302_v57 = vadd.f32 %v11954_v63, %v3576_v35  ;;  %v13378_v40 = vld [vmem:[#allocation75_spill] sm:$0xff]  ;;  %v13380_v63 = vld [vmem:[#allocation46_spill] sm:$0xff] }
 0x20d   : > { %4957 = vst [vmem:[#allocation2 + $0xc1] sm:$0xff] %v12117_v61  ;;  %v12128_v19 = vmin.f32 %v4836_v27, 6.0  ;;  %v4839_v47 = vmax.f32 %v4807_v15, 0.0  ;;  %v4805_v16 = vadd.f32 %v11919_v59, %v4766_v7  ;;  %v4771_v6 = vadd.f32 %v9201_v38, %v4301_v8  ;;  %9319 = vmatprep.subr.bf16.mxu1 %v9734_v36  ;;  %9363 = vmatprep.subr.bf16.mxu0 %v9738_v60 }
 0x20e   : > { %v3579_v43 = vadd.f32 %v13378_v40, %v11986_v62  ;;  %9284 = vmatmul.mubr.bf16.gmra.mxu0 %v12120_v58  ;;  %v4690_v12 = vpop.f32.mrf.mxu0  ;;  %9240 = vmatmul.mubr.bf16.gmra.mxu1 %v5076_v45  ;;  %v13381_v62 = vld [vmem:[#allocation40_spill] sm:$0xff]  ;;  %v3580_v18 = vadd.f32 %v13382_v34, %v12004_v56 }
 0x20f   : > { %4955 = vst [vmem:[#allocation2 + $0xa9] sm:$0xff] %v12128_v19  ;;  %v12144_v8 = vmin.f32 %v4839_v47, 6.0  ;;  %v4837_v9 = vmax.f32 %v4805_v16, 0.0  ;;  %v4810_v41 = vadd.f32 %v11919_v59, %v4771_v6  ;;  %v4769_v46 = vadd.f32 %v4690_v12, %v4299_v2  ;;  %9287 = vmatprep.mubr.bf16.mxu0 %v12122_v3  ;;  %9243 = vmatprep.mubr.bf16.mxu1 %v5077_v17  ;;  %v9741_v56 = vld [vmem:[%s13174_s3 + $0xd8] sm:$0xff]   ;;  %v4987_v16 = vld [vmem:[#allocation2 + $0x90] sm:$0xff] }
 0x210   : > { %v12150_v4 = vadd.f32 %v13381_v62, %v13380_v63  ;;  %v9202_v14 = vpop.f32.mrf.mxu0  ;;  %9320 = vmatpush3.bf16.msra.mxu1 %v9734_v36  ;;  %9364 = vmatpush3.bf16.msra.mxu0 %v9738_v60  ;;  %v4988_v53 = vld [vmem:[#allocation2 + $0x98] sm:$0xff]  ;;  %v4305_v36 = vadd.f32 %v11999_v54, %v3579_v43  ;;  %v4303_v60 = vadd.f32 %v12020_v24, %v3577_v13  ;;  %v9742_v13 = vld [vmem:[%s13174_s3 + $0xd0] sm:$0xff]  }
 0x211   : > { %4958 = vst [vmem:[#allocation2 + $0xc9] sm:$0xff] %v12144_v8  ;;  %v4869_v35 = vmin.f32 %v4837_v9, 6.0  ;;  %v4842_v2 = vmax.f32 %v4810_v41, 0.0  ;;  %v4808_v50 = vadd.f32 %v11919_v59, %v4769_v46  ;;  %v4772_v49 = vadd.f32 %v9202_v14, %v4302_v57  ;;  %9321 = vmatprep.subr.bf16.mxu1 %v9737_v37  ;;  %9365 = vmatprep.subr.bf16.mxu0 %v9739_v51  ;;  %v4985_v47 = vld [vmem:[#allocation2 + $0x78] sm:$0xff]  ;;  %v12179_v57 = vpop.f32.mrf.mxu1 }
 0x212   : > { %v3578_v17 = vadd.f32 %v13383_v10, %v12027_v0  ;;  %v4693_v27 = vpop.f32.mrf.mxu0  ;;  %v4986_v15 = vld [vmem:[#allocation2 + $0x80] sm:$0xff]  ;;  %v5079_v7 = vpack.c.bf16 %v12144_v8, %v12117_v61  ;;  %v12176_v24 = vpack.c.bf16 %v4988_v53, %v4987_v16  ;;  %v13385_v8 = vld [vmem:[#allocation83_spill] sm:$0xff]  ;;  %v13387_v34 = vld [vmem:[#allocation84_spill] sm:$0xff] }
 0x213   : > { %4956 = vst [vmem:[#allocation2 + $0xb1] sm:$0xff] %v4869_v35  ;;  %v12171_v20 = vmin.f32 %v4842_v2, 6.0  ;;  %v4840_v21 = vmax.f32 %v4808_v50, 0.0  ;;  %v4811_v38 = vadd.f32 %v11919_v59, %v4772_v49  ;;  %v4770_v45 = vadd.f32 %v4693_v27, %v4300_v55 }
 0x214   : > { %v9205_v54 = vpop.f32.mrf.mxu0  ;;  %v12174_v6 = vpack.c.bf16 %v4986_v15, %v4985_v47  ;;  %v5078_v0 = vpack.c.bf16 %v4869_v35, %v12128_v19  ;;  %9322 = vmatpush3.bf16.msra.mxu1 %v9737_v37  ;;  %9366 = vmatpush3.bf16.msra.mxu0 %v9739_v51  ;;  %v9743_v19 = vld [vmem:[%s13174_s3 + $0x80] sm:$0xff]   ;;  %v4306_v37 = vadd.f32 %v12050_v44, %v3580_v18  ;;  %v12207_v35 = vpop.f32.mrf.mxu1 }
 0x215   : > { %4961 = vst [vmem:[#allocation2 + $0xf1] sm:$0xff] %v12171_v20  ;;  %v12182_v61 = vmin.f32 %v4840_v21, 6.0  ;;  %v4843_v40 = vmax.f32 %v4811_v38, 0.0  ;;  %v4809_v43 = vadd.f32 %v11919_v59, %v4770_v45  ;;  %v4775_v29 = vadd.f32 %v9205_v54, %v4305_v36  ;;  %9323 = vmatprep.subr.bf16.mxu1 %v9740_v30  ;;  %9367 = vmatprep.subr.bf16.mxu0 %v9741_v56  ;;  %v13384_v51 = vld [vmem:[#allocation81_spill] sm:$0xff] }
 0x216   : > { %v3583_v12 = vadd.f32 %v13384_v51, %v12031_v42  ;;  %v3581_v9 = vadd.f32 %v13385_v8, %v12041_v1  ;;  %9288 = vmatmul.mubr.bf16.gmra.mxu0 %v12174_v6  ;;  %v4706_v41 = vpop.f32.mrf.mxu0  ;;  %9244 = vmatmul.mubr.bf16.gmra.mxu1 %v5078_v0  ;;  %v13386_v42 = vld [vmem:[#allocation51_spill] sm:$0xff]  ;;  %v4304_v1 = vadd.f32 %v12069_v22, %v3578_v17  ;;  %v12217_v22 = vld [vmem:[%s13174_s3 + $0x138] sm:$0xff]   ;;  %v4989_v45 = vld [vmem:[#allocation2 + $0xa8] sm:$0xff]  ;;  %v4268_v54 = vpop.f32.mrf.mxu1 }
 0x217   : > { %4959 = vst [vmem:[#allocation2 + $0xd9] sm:$0xff] %v12182_v61  ;;  %v12198_v46 = vmin.f32 %v4843_v40, 6.0  ;;  %v4841_v63 = vmax.f32 %v4809_v43, 0.0  ;;  %v4814_v62 = vadd.f32 %v11919_v59, %v4775_v29  ;;  %v4773_v55 = vadd.f32 %v4706_v41, %v4303_v60  ;;  %9291 = vmatprep.mubr.bf16.mxu0 %v12176_v24  ;;  %9247 = vmatprep.mubr.bf16.mxu1 %v5079_v7  ;;  %v4991_v47 = vld [vmem:[#allocation2 + $0xc0] sm:$0xff] }
 0x218   : > { %v2757_v44 = vadd.f32 %v13386_v42, %v11902_v32  ;;  %v3584_v18 = vadd.f32 %v13387_v34, %v12083_v11  ;;  %v9206_v14 = vpop.f32.mrf.mxu0  ;;  %9324 = vmatpush3.bf16.msra.mxu1 %v9740_v30  ;;  %9368 = vmatpush3.bf16.msra.mxu0 %v9741_v56  ;;  %v4992_v36 = vld [vmem:[#allocation2 + $0xc8] sm:$0xff]  ;;  %v4309_v11 = vadd.f32 %v12100_v31, %v3583_v12  ;;  %v9745_v29 = vld [vmem:[%s13174_s3 + $0xc0] sm:$0xff]   ;;  %v9180_v34 = vpop.f32.mrf.mxu1 }
 0x219   : > { %4962 = vst [vmem:[#allocation2 + $0xf9] sm:$0xff] %v12198_v46  ;;  %v4873_v2 = vmin.f32 %v4841_v63, 6.0  ;;  %v4846_v50 = vmax.f32 %v4814_v62, 0.0  ;;  %v4812_v49 = vadd.f32 %v11919_v59, %v4773_v55  ;;  %v4776_v53 = vadd.f32 %v9206_v14, %v4306_v37  ;;  %9369 = vmatprep.subr.bf16.mxu0 %v9742_v13  ;;  %9325 = vmatprep.subr.bf16.mxu1 %v9743_v19  ;;  %v9744_v32 = vld [vmem:[%s13174_s3 + $0xc8] sm:$0xff]   ;;  %v13389_v37 = vld [vmem:[#allocation48_spill] sm:$0xff]  ;;  %v13391_v63 = vld [vmem:[#allocation49_spill] sm:$0xff] }
 0x21a   : > { %v4307_v30 = vadd.f32 %v12125_v28, %v3581_v9  ;;  %v13388_v56 = vld [vmem:[#allocation86_spill] sm:$0xff]  ;;  %v4709_v10 = vpop.f32.mrf.mxu0  ;;  %v4990_v17 = vld [vmem:[#allocation2 + $0xb0] sm:$0xff]  ;;  %v5081_v27 = vpack.c.bf16 %v12198_v46, %v12171_v20  ;;  %v12230_v28 = vpack.c.bf16 %v4992_v36, %v4991_v47  ;;  %v3587_v51 = vadd.f32 %v11855_v25, %v12150_v4  ;;  %v13392_v62 = vld [vmem:[#allocation45_spill] sm:$0xff] }
 0x21b   : > { %v3582_v60 = vadd.f32 %v13388_v56, %v12095_v5  ;;  %4960 = vst [vmem:[#allocation2 + $0xe1] sm:$0xff] %v4873_v2  ;;  %v12225_v15 = vmin.f32 %v4846_v50, 6.0  ;;  %v4844_v7 = vmax.f32 %v4812_v49, 0.0  ;;  %v4815_v21 = vadd.f32 %v11919_v59, %v4776_v53  ;;  %v13393_v55 = vld [vmem:[#allocation47_spill] sm:$0xff] }
 0x21c   : > { %v4774_v38 = vadd.f32 %v4709_v10, %v4304_v1  ;;  %v9209_v31 = vpop.f32.mrf.mxu0  ;;  %v12228_v16 = vpack.c.bf16 %v4990_v17, %v4989_v45  ;;  %v5080_v5 = vpack.c.bf16 %v4873_v2, %v12182_v61  ;;  %9370 = vmatpush3.bf16.msra.mxu0 %v9742_v13  ;;  %9326 = vmatpush3.bf16.msra.mxu1 %v9743_v19  ;;  %v13390_v61 = vld [vmem:[#allocation42_spill] sm:$0xff] }
 0x21d   : > { %4965 = vst [vmem:[#allocation2 + $0x121] sm:$0xff] %v12225_v15  ;;  %v12234_v20 = vmin.f32 %v4844_v7, 6.0  ;;  %v4847_v0 = vmax.f32 %v4815_v21, 0.0  ;;  %v4779_v43 = vadd.f32 %v9209_v31, %v4309_v11  ;;  %9371 = vmatprep.subr.bf16.mxu0 %v9744_v32  ;;  %9407 = vmatprep.subr.bf16.mxu1 %v12217_v22  ;;  %v3226_v13 = vadd.f32 %v13390_v61, %v13389_v37 }
 0x21e   : > { %v4813_v40 = vadd.f32 %v11919_v59, %v4774_v38  ;;  %v4310_v19 = vadd.f32 %v12155_v23, %v3584_v18  ;;  %9292 = vmatmul.mubr.bf16.gmra.mxu0 %v12228_v16  ;;  %v4722_v12 = vpop.f32.mrf.mxu0  ;;  %9248 = vmatmul.mubr.bf16.gmra.mxu1 %v5080_v5  ;;  %v3229_v23 = vadd.f32 %v13392_v62, %v13391_v63  ;;  %v4993_v17 = vld [vmem:[#allocation2 + $0xd8] sm:$0xff] }
 0x21f   : > { %4963 = vst [vmem:[#allocation2 + $0x109] sm:$0xff] %v12234_v20  ;;  %v4879_v8 = vmin.f32 %v4847_v0, 6.0  ;;  %v4818_v41 = vadd.f32 %v11919_v59, %v4779_v43  ;;  %v4777_v46 = vadd.f32 %v4722_v12, %v4307_v30  ;;  %9295 = vmatprep.mubr.bf16.mxu0 %v12230_v28  ;;  %9251 = vmatprep.mubr.bf16.mxu1 %v5081_v27  ;;  %v4995_v27 = vld [vmem:[#allocation2 + $0xf0] sm:$0xff] }
 0x220   : > { %v4845_v9 = vmax.f32 %v4813_v40, 0.0  ;;  %v3227_v42 = vadd.f32 %v13393_v55, %v2757_v44  ;;  %v4308_v25 = vadd.f32 %v12179_v57, %v3582_v60  ;;  %v3585_v4 = vadd.f32 %v11870_v26, %v3226_v13  ;;  %v9210_v1 = vpop.f32.mrf.mxu0  ;;  %9372 = vmatpush3.bf16.msra.mxu0 %v9744_v32  ;;  %v4996_v49 = vld [vmem:[#allocation2 + $0xf8] sm:$0xff] }
 0x221   : > { %4966 = vst [vmem:[#allocation2 + $0x129] sm:$0xff] %v4879_v8  ;;  %v4850_v14 = vmax.f32 %v4818_v41, 0.0  ;;  %v4816_v2 = vadd.f32 %v11919_v59, %v4777_v46  ;;  %v4780_v50 = vadd.f32 %v9210_v1, %v4310_v19  ;;  %9373 = vmatprep.subr.bf16.mxu0 %v9745_v29  ;;  %v12261_v44 = vld [vmem:[%s13174_s3 + $0x178] sm:$0xff]   ;;  %v4313_v57 = vadd.f32 %v12207_v35, %v3587_v51 }
 0x222   : > { %v12255_v18 = vmin.f32 %v4845_v9, 6.0  ;;  %v3588_v26 = vadd.f32 %v11880_v52, %v3229_v23  ;;  %v3586_v53 = vadd.f32 %v11893_v48, %v3227_v42  ;;  %v4725_v36 = vpop.f32.mrf.mxu0  ;;  %v4994_v32 = vld [vmem:[#allocation2 + $0xe0] sm:$0xff]  ;;  %v5083_v11 = vpack.c.bf16 %v4879_v8, %v12225_v15  ;;  %v4271_v15 = vpop.f32.mrf.mxu1 }
 0x223   : > { %v4882_v30 = vmin.f32 %v4850_v14, 6.0  ;;  %v4848_v56 = vmax.f32 %v4816_v2, 0.0  ;;  %v4819_v60 = vadd.f32 %v11919_v59, %v4780_v50  ;;  %v4778_v10 = vadd.f32 %v4725_v36, %v4308_v25 }
 0x224   : > { %4964 = vst [vmem:[#allocation2 + $0x111] sm:$0xff] %v12255_v18  ;;  %v4311_v7 = vadd.f32 %v4268_v54, %v3585_v4  ;;  %v9213_v21 = vpop.f32.mrf.mxu0  ;;  %v12269_v35 = vpack.c.bf16 %v4994_v32, %v4993_v17  ;;  %v12271_v52 = vpack.c.bf16 %v4996_v49, %v4995_v27  ;;  %v5082_v48 = vpack.c.bf16 %v12255_v18, %v12234_v20  ;;  %v4999_v25 = vld [vmem:[#allocation2 + $0x120] sm:$0xff] }
 0x225   : > { %9374 = vmatpush3.bf16.msra.mxu0 %v9745_v29  ;;  %4969 = vst [vmem:[#allocation2 + $0x151] sm:$0xff] %v4882_v30  ;;  %v4880_v38 = vmin.f32 %v4848_v56, 6.0  ;;  %v4851_v45 = vmax.f32 %v4819_v60, 0.0  ;;  %v4817_v47 = vadd.f32 %v11919_v59, %v4778_v10  ;;  %v4783_v31 = vadd.f32 %v9213_v21, %v4313_v57  ;;  %v5522_v57 = vld [vmem:[#allocation2 + $0x2] sm:$0xff]  ;;  %v5524_v17 = vld [vmem:[#allocation2 + $0x1a] sm:$0xff] }
 0x226   : > { %9455 = vmatprep.subr.bf16.mxu0 %v12261_v44  ;;  %v4314_v5 = vadd.f32 %v9180_v34, %v3588_v26  ;;  %9296 = vmatmul.mubr.bf16.gmra.mxu0 %v12269_v35  ;;  %v4738_v54 = vpop.f32.mrf.mxu0  ;;  %v4312_v29 = vadd.f32 %v4271_v15, %v3586_v53  ;;  %v4997_v55 = vld [vmem:[#allocation2 + $0x108] sm:$0xff]  ;;  %v5526_v15 = vld [vmem:[#allocation2 + $0x32] sm:$0xff] }
 0x227   : > { %9252 = vmatmul.mubr.bf16.gmra.mxu1 %v5082_v48  ;;  %4967 = vst [vmem:[#allocation2 + $0x139] sm:$0xff] %v4880_v38  ;;  %v4883_v0 = vmin.f32 %v4851_v45, 6.0  ;;  %v4849_v40 = vmax.f32 %v4817_v47, 0.0  ;;  %v4822_v20 = vadd.f32 %v11919_v59, %v4783_v31  ;;  %v4781_v43 = vadd.f32 %v4738_v54, %v4311_v7  ;;  %9299 = vmatprep.mubr.bf16.mxu0 %v12271_v52  ;;  %v5523_v26 = vld [vmem:[#allocation2 + $0xa] sm:$0xff]  ;;  %v5525_v27 = vld [vmem:[#allocation2 + $0x22] sm:$0xff] }
 0x228   : > { %9255 = vmatprep.mubr.bf16.mxu1 %v5083_v11  ;;  %v9214_v37 = vpop.f32.mrf.mxu0  ;;  %v5000_v9 = vld [vmem:[#allocation2 + $0x128] sm:$0xff]  ;;  %v5554_v56 = vpack.c.bf16 %v5523_v26, %v5522_v57  ;;  %v12306_v45 = vpack.c.bf16 %v5525_v27, %v5524_v17  ;;  %v9747_v47 = vld [vmem:[%s13174_s3 + $0x130] sm:$0xff]   ;;  %v5543_v57 = vld [vmem:[#allocation2 + $0xfa] sm:$0xff] }
 0x229   : > { %4970 = vst [vmem:[#allocation2 + $0x159] sm:$0xff] %v4883_v0  ;;  %v4881_v61 = vmin.f32 %v4849_v40, 6.0  ;;  %v4854_v13 = vmax.f32 %v4822_v20, 0.0  ;;  %v4820_v19 = vadd.f32 %v11919_v59, %v4781_v43  ;;  %v4784_v51 = vadd.f32 %v9214_v37, %v4314_v5  ;;  %v9748_v5 = vld [vmem:[%s13174_s3 + $0x128] sm:$0xff]   ;;  %v9750_v37 = vld [vmem:[%s13174_s3 + $0x118] sm:$0xff]  }
 0x22a   : > { %v4741_v12 = vpop.f32.mrf.mxu0  ;;  %v5085_v41 = vpack.c.bf16 %v4883_v0, %v4882_v30  ;;  %v12287_v2 = vpack.c.bf16 %v5000_v9, %v4999_v25  ;;  %v5528_v54 = vld [vmem:[#allocation2 + $0x4a] sm:$0xff]  ;;  %v5529_v0 = vld [vmem:[#allocation2 + $0x52] sm:$0xff]  ;;  %v5530_v40 = vld [vmem:[#allocation2 + $0x62] sm:$0xff] }
 0x22b   : > { %v4998_v8 = vld [vmem:[#allocation2 + $0x110] sm:$0xff]  ;;  %4968 = vst [vmem:[#allocation2 + $0x141] sm:$0xff] %v4881_v61  ;;  %v4886_v46 = vmin.f32 %v4854_v13, 6.0  ;;  %v4852_v63 = vmax.f32 %v4820_v19, 0.0  ;;  %v4823_v62 = vadd.f32 %v11919_v59, %v4784_v51  ;;  %v4782_v23 = vadd.f32 %v4741_v12, %v4312_v29  ;;  %v5533_v13 = vld [vmem:[#allocation2 + $0x82] sm:$0xff]  ;;  %v5535_v51 = vld [vmem:[#allocation2 + $0x9a] sm:$0xff] }
 0x22c   : > { %v12282_v42 = vpack.c.bf16 %v4998_v8, %v4997_v55  ;;  %v12284_v4 = vpack.c.bf16 %v4881_v61, %v4880_v38  ;;  %v5003_v60 = vld [vmem:[#allocation2 + $0x150] sm:$0xff]  ;;  %v5527_v38 = vld [vmem:[#allocation2 + $0x3a] sm:$0xff]  ;;  %v12321_v43 = vpack.c.bf16 %v5529_v0, %v5528_v54  ;;  %v9756_v9 = vld [vmem:[%s13174_s3 + $0x108] sm:$0xff]  }
 0x22d   : > { %4973 = vst [vmem:[#allocation2 + $0x181] sm:$0xff] %v4886_v46  ;;  %v4884_v1 = vmin.f32 %v4852_v63, 6.0  ;;  %v4855_v34 = vmax.f32 %v4823_v62, 0.0  ;;  %v4821_v14 = vadd.f32 %v11919_v59, %v4782_v23  ;;  %v12313_v31 = vpack.c.bf16 %v5527_v38, %v5526_v15  ;;  %v5531_v20 = vld [vmem:[#allocation2 + $0x6a] sm:$0xff]  ;;  %v5532_v61 = vld [vmem:[#allocation2 + $0x7a] sm:$0xff]  ;;  %v5534_v19 = vld [vmem:[#allocation2 + $0x92] sm:$0xff] }
 0x22e   : > { %9300 = vmatmul.mubr.bf16.gmra.mxu0 %v12282_v42  ;;  %v5001_v36 = vld [vmem:[#allocation2 + $0x138] sm:$0xff]  ;;  %v12323_v29 = vpack.c.bf16 %v5531_v20, %v5530_v40  ;;  %v12344_v12 = vpack.c.bf16 %v5535_v51, %v5534_v19  ;;  %v9755_v8 = vld [vmem:[%s13174_s3 + $0x160] sm:$0xff]   ;;  %v5539_v62 = vld [vmem:[#allocation2 + $0xca] sm:$0xff] }
 0x22f   : > { %9256 = vmatmul.mubr.bf16.gmra.mxu1 %v12284_v4  ;;  %4971 = vst [vmem:[#allocation2 + $0x169] sm:$0xff] %v4884_v1  ;;  %v12291_v50 = vmin.f32 %v4855_v34, 6.0  ;;  %v4853_v49 = vmax.f32 %v4821_v14, 0.0  ;;  %9303 = vmatprep.mubr.bf16.mxu0 %v12287_v2  ;;  %v5537_v46 = vld [vmem:[#allocation2 + $0xb2] sm:$0xff]  ;;  %v5538_v63 = vld [vmem:[#allocation2 + $0xc2] sm:$0xff]  ;;  %v5540_v34 = vld [vmem:[#allocation2 + $0xda] sm:$0xff] }
 0x230   : > { %9259 = vmatprep.mubr.bf16.mxu1 %v5085_v41  ;;  %v5004_v32 = vld [vmem:[#allocation2 + $0x158] sm:$0xff]  ;;  %v5536_v41 = vld [vmem:[#allocation2 + $0xaa] sm:$0xff]  ;;  %v9759_v25 = vld [vmem:[%s13174_s3 + $0x100] sm:$0xff]  }
 0x231   : > { %4974 = vst [vmem:[#allocation2 + $0x189] sm:$0xff] %v12291_v50  ;;  %v4885_v53 = vmin.f32 %v4853_v49, 6.0  ;;  %v12299_v10 = vpack.c.bf16 %v5004_v32, %v5003_v60  ;;  %v12362_v23 = vpack.c.bf16 %v5537_v46, %v5536_v41  ;;  %v9758_v55 = vld [vmem:[%s13174_s3 + $0x150] sm:$0xff]   ;;  %v5541_v14 = vld [vmem:[#allocation2 + $0xe2] sm:$0xff]  ;;  %v9767_v32 = vld [vmem:[%s13174_s3 + $0x1f8] sm:$0xff]  }
 0x232   : > { %v5002_v59 = vld [vmem:[#allocation2 + $0x140] sm:$0xff]  ;;  %v5542_v49 = vld [vmem:[#allocation2 + $0xf2] sm:$0xff]  ;;  %v12382_v26 = vpack.c.bf16 %v5541_v14, %v5540_v34  ;;  %v5547_v60 = vld [vmem:[#allocation2 + $0x12a] sm:$0xff] }
 0x233   : > { %4972 = vst [vmem:[#allocation2 + $0x171] sm:$0xff] %v4885_v53  ;;  %v12295_v11 = vpack.c.bf16 %v5002_v59, %v5001_v36  ;;  %v12297_v30 = vpack.c.bf16 %v4885_v53, %v4884_v1  ;;  %v9760_v1 = vld [vmem:[%s13174_s3 + $0x148] sm:$0xff]   ;;  %v9761_v53 = vld [vmem:[%s13174_s3 + $0x140] sm:$0xff]   ;;  %v5545_v59 = vld [vmem:[#allocation2 + $0x112] sm:$0xff] }
 0x234   : > { %v5544_v36 = vld [vmem:[#allocation2 + $0x10a] sm:$0xff]  ;;  %v5549_v27 = vld [vmem:[#allocation2 + $0x142] sm:$0xff]  ;;  %v6134_v54 = vld [vmem:[#allocation2 + $0x19] sm:$0xff] }
 0x235   : > { %v12396_v17 = vpack.c.bf16 %v5545_v59, %v5544_v36  ;;  %v6137_v40 = vld [vmem:[#allocation2 + $0x39] sm:$0xff]  ;;  %v6143_v19 = vld [vmem:[#allocation2 + $0x81] sm:$0xff]  ;;  %v9768_v41 = vld [vmem:[%s13174_s3 + $0x1f0] sm:$0xff]  }
 0x236   : > { %9304 = vmatmul.mubr.bf16.gmra.mxu0 %v12295_v11  ;;  %v5005_v7 = vld [vmem:[#allocation2 + $0x168] sm:$0xff]  ;;  %v5858_v20 = vld [vmem:[#allocation2 + $0x180] sm:$0xff]  ;;  %v9774_v59 = vld [vmem:[%s13174_s3 + $0x1d0] sm:$0xff]  }
 0x237   : > { %9260 = vmatmul.mubr.bf16.gmra.mxu1 %v12297_v30  ;;  %9307 = vmatprep.mubr.bf16.mxu0 %v12299_v10  ;;  %v6140_v51 = vld [vmem:[#allocation2 + $0x61] sm:$0xff]  ;;  %v6145_v46 = vld [vmem:[#allocation2 + $0x99] sm:$0xff]  ;;  %v6149_v14 = vld [vmem:[#allocation2 + $0xc9] sm:$0xff] }
 0x238   : > { %9327 = vmatprep.mubr.bf16.mxu1 %v5554_v56  ;;  %v5546_v56 = vld [vmem:[#allocation2 + $0x122] sm:$0xff] }
 0x239   : > { %v9771_v34 = vld [vmem:[%s13174_s3 + $0x1e0] sm:$0xff]  }
 0x23a   : > { %v5006_v21 = vld [vmem:[#allocation2 + $0x170] sm:$0xff] }
 0x23b   : > { %v12304_v48 = vpack.c.bf16 %v5006_v21, %v5005_v7  ;;  %v5550_v7 = vld [vmem:[#allocation2 + $0x152] sm:$0xff]  ;;  %v5551_v21 = vld [vmem:[#allocation2 + $0x15a] sm:$0xff] }
 0x23c   : > { %v12406_v38 = vpack.c.bf16 %v5551_v21, %v5550_v7  ;;  %v9777_v21 = vld [vmem:[%s13174_s3 + $0x1c0] sm:$0xff]  }
 0x23e   : > { %9308 = vmatmul.mubr.bf16.gmra.mxu0 %v12304_v48 }
 0x23f   : > { %9328 = vmatmul.mubr.bf16.vlgmr.msra.gmra.mxu1 %v12306_v45  ;;  %9375 = vmatprep.mubr.bf16.mxu0 %v12064_v39  ;;  %v9749_v39 = vld [vmem:[%s13174_s3 + $0x120] sm:$0xff]  }
 0x240   : > { %9408 = vmatpush3.bf16.msra.mxu1 %v12217_v22  ;;  %9331 = vmatprep.mubr.bf16.mxu1 %v12313_v31  ;;  %v9752_v22 = vld [vmem:[%s13174_s3 + $0x170] sm:$0xff]  }
 0x241   : > { %9409 = vmatprep.subr.bf16.mxu1 %v9747_v47 }
 0x244   : > { %9410 = vmatpush3.bf16.msra.mxu1 %v9747_v47  ;;  %v6135_v47 = vld [vmem:[#allocation2 + $0x21] sm:$0xff] }
 0x245   : > { %9411 = vmatprep.subr.bf16.mxu1 %v9748_v5  ;;  %v6166_v0 = vpack.c.bf16 %v6135_v47, %v6134_v54 }
 0x246   : > { %9376 = vmatmul.mubr.bf16.vlgmr.msra.gmra.mxu0 %v12066_v33  ;;  %v9754_v33 = vld [vmem:[%s13174_s3 + $0x168] sm:$0xff]  }
 0x247   : > { %9332 = vmatmul.mubr.bf16.gmra.mxu1 %v12321_v43  ;;  %9379 = vmatprep.mubr.bf16.mxu0 %v12120_v58  ;;  %v12342_v58 = vpack.c.bf16 %v5533_v13, %v5532_v61  ;;  %v9763_v61 = vld [vmem:[%s13174_s3 + $0x1b0] sm:$0xff]  }
 0x248   : > { %9335 = vmatprep.mubr.bf16.mxu1 %v12323_v29  ;;  %9412 = vmatpush3.bf16.msra.mxu1 %v9748_v5  ;;  %v6138_v13 = vld [vmem:[#allocation2 + $0x49] sm:$0xff] }
 0x249   : > { %9456 = vmatpush3.bf16.msra.mxu0 %v12261_v44  ;;  %9413 = vmatprep.subr.bf16.mxu1 %v9749_v39  ;;  %v9753_v44 = vld [vmem:[%s13174_s3 + $0x110] sm:$0xff]  }
 0x24a   : > { %9457 = vmatprep.subr.bf16.mxu0 %v9752_v22 }
 0x24c   : > { %9414 = vmatpush3.bf16.msra.mxu1 %v9749_v39  ;;  %v6139_v39 = vld [vmem:[#allocation2 + $0x51] sm:$0xff] }
 0x24d   : > { %9458 = vmatpush3.bf16.msra.mxu0 %v9752_v22  ;;  %9415 = vmatprep.subr.bf16.mxu1 %v9750_v37 }
 0x24e   : > { %9459 = vmatprep.subr.bf16.mxu0 %v9754_v33  ;;  %9380 = vmatmul.mubr.bf16.gmra.mxu0 %v12122_v3  ;;  %v9757_v3 = vld [vmem:[%s13174_s3 + $0x158] sm:$0xff]  }
 0x24f   : > { %9336 = vmatmul.mubr.bf16.gmra.mxu1 %v12342_v58  ;;  %9383 = vmatprep.mubr.bf16.mxu0 %v12174_v6  ;;  %v12364_v6 = vpack.c.bf16 %v5539_v62, %v5538_v63  ;;  %v9770_v63 = vld [vmem:[%s13174_s3 + $0x1e8] sm:$0xff]   ;;  %v6144_v62 = vld [vmem:[#allocation2 + $0x91] sm:$0xff] }
 0x250   : > { %9339 = vmatprep.mubr.bf16.mxu1 %v12344_v12  ;;  %9416 = vmatpush3.bf16.msra.mxu1 %v9750_v37 }
 0x251   : > { %9460 = vmatpush3.bf16.msra.mxu0 %v9754_v33  ;;  %9417 = vmatprep.subr.bf16.mxu1 %v9753_v44  ;;  %v6141_v33 = vld [vmem:[#allocation2 + $0x69] sm:$0xff] }
 0x252   : > { %9461 = vmatprep.subr.bf16.mxu0 %v9755_v8 }
 0x254   : > { %9418 = vmatpush3.bf16.msra.mxu1 %v9753_v44  ;;  %v12433_v44 = vpack.c.bf16 %v6141_v33, %v6140_v51  ;;  %v6753_v51 = vld [vmem:[#allocation2 + $0x78] sm:$0xff] }
 0x255   : > { %9462 = vmatpush3.bf16.msra.mxu0 %v9755_v8  ;;  %9419 = vmatprep.subr.bf16.mxu1 %v9756_v9  ;;  %v6142_v8 = vld [vmem:[#allocation2 + $0x79] sm:$0xff] }
 0x256   : > { %9463 = vmatprep.subr.bf16.mxu0 %v9757_v3  ;;  %9384 = vmatmul.mubr.bf16.gmra.mxu0 %v12176_v24  ;;  %v9762_v24 = vld [vmem:[%s13174_s3 + $0x1b8] sm:$0xff]  }
 0x257   : > { %9340 = vmatmul.mubr.bf16.gmra.mxu1 %v12362_v23  ;;  %9387 = vmatprep.mubr.bf16.mxu0 %v12228_v16  ;;  %v12384_v16 = vpack.c.bf16 %v5543_v57, %v5542_v49  ;;  %v9773_v49 = vld [vmem:[%s13174_s3 + $0x1d8] sm:$0xff]   ;;  %v6148_v57 = vld [vmem:[#allocation2 + $0xc1] sm:$0xff] }
 0x258   : > { %9343 = vmatprep.mubr.bf16.mxu1 %v12364_v6  ;;  %9420 = vmatpush3.bf16.msra.mxu1 %v9756_v9  ;;  %v12435_v9 = vpack.c.bf16 %v6143_v19, %v6142_v8  ;;  %v6756_v19 = vld [vmem:[#allocation2 + $0x98] sm:$0xff] }
 0x259   : > { %9464 = vmatpush3.bf16.msra.mxu0 %v9757_v3  ;;  %9421 = vmatprep.subr.bf16.mxu1 %v9759_v25  ;;  %v9766_v3 = vld [vmem:[%s13174_s3 + $0x198] sm:$0xff]  }
 0x25a   : > { %9465 = vmatprep.subr.bf16.mxu0 %v9758_v55 }
 0x25c   : > { %9422 = vmatpush3.bf16.msra.mxu1 %v9759_v25 }
 0x25d   : > { %9466 = vmatpush3.bf16.msra.mxu0 %v9758_v55  ;;  %9503 = vmatprep.subr.bf16.mxu1 %v9762_v24  ;;  %v12453_v55 = vpack.c.bf16 %v6145_v46, %v6144_v62 }
 0x25e   : > { %9467 = vmatprep.subr.bf16.mxu0 %v9760_v1  ;;  %9388 = vmatmul.mubr.bf16.gmra.mxu0 %v12230_v28  ;;  %v12398_v28 = vpack.c.bf16 %v5547_v60, %v5546_v56  ;;  %v6153_v56 = vld [vmem:[#allocation2 + $0xf9] sm:$0xff]  ;;  %v9776_v60 = vld [vmem:[%s13174_s3 + $0x1c8] sm:$0xff]  }
 0x25f   : > { %9344 = vmatmul.mubr.bf16.gmra.mxu1 %v12382_v26  ;;  %9391 = vmatprep.mubr.bf16.mxu0 %v12269_v35  ;;  %v5548_v35 = vld [vmem:[#allocation2 + $0x13a] sm:$0xff] }
 0x260   : > { %9347 = vmatprep.mubr.bf16.mxu1 %v12384_v16  ;;  %v12404_v15 = vpack.c.bf16 %v5549_v27, %v5548_v35  ;;  %v9778_v35 = vld [vmem:[%s13174_s3 + $0x238] sm:$0xff]  }
 0x261   : > { %9468 = vmatpush3.bf16.msra.mxu0 %v9760_v1  ;;  %v9769_v1 = vld [vmem:[%s13174_s3 + $0x190] sm:$0xff]  }
 0x262   : > { %9469 = vmatprep.subr.bf16.mxu0 %v9761_v53  ;;  %v6152_v27 = vld [vmem:[#allocation2 + $0xf1] sm:$0xff] }
 0x263   : > { %v12495_v7 = vpack.c.bf16 %v6153_v56, %v6152_v27 }
 0x265   : > { %9470 = vmatpush3.bf16.msra.mxu0 %v9761_v53  ;;  %v12473_v53 = vpack.c.bf16 %v6149_v14, %v6148_v57  ;;  %v9782_v14 = vld [vmem:[%s13174_s3 + $0x218] sm:$0xff]   ;;  %v6757_v57 = vld [vmem:[#allocation2 + $0xa8] sm:$0xff] }
 0x266   : > { %9551 = vmatprep.subr.bf16.mxu0 %v9767_v32  ;;  %9392 = vmatmul.mubr.bf16.gmra.mxu0 %v12271_v52  ;;  %v5552_v52 = vld [vmem:[#allocation2 + $0x16a] sm:$0xff] }
 0x267   : > { %9348 = vmatmul.mubr.bf16.gmra.mxu1 %v12396_v17  ;;  %9395 = vmatprep.mubr.bf16.mxu0 %v12282_v42  ;;  %v5553_v42 = vld [vmem:[#allocation2 + $0x172] sm:$0xff] }
 0x268   : > { %9351 = vmatprep.mubr.bf16.mxu1 %v12398_v28  ;;  %v12412_v5 = vpack.c.bf16 %v5553_v42, %v5552_v52  ;;  %v6157_v52 = vld [vmem:[#allocation2 + $0x129] sm:$0xff]  ;;  %v6156_v42 = vld [vmem:[#allocation2 + $0x121] sm:$0xff] }
 0x269   : > { %v12505_v47 = vpack.c.bf16 %v6157_v52, %v6156_v42 }
 0x26e   : > { %9396 = vmatmul.mubr.bf16.gmra.mxu0 %v12287_v2  ;;  %v5859_v2 = vld [vmem:[#allocation2 + $0x188] sm:$0xff] }
 0x26f   : > { %9352 = vmatmul.mubr.bf16.gmra.mxu1 %v12404_v15  ;;  %9399 = vmatprep.mubr.bf16.mxu0 %v12295_v11  ;;  %v6136_v11 = vld [vmem:[#allocation2 + $0x31] sm:$0xff]  ;;  %v12417_v22 = vpack.c.bf16 %v5859_v2, %v5858_v20  ;;  %v6752_v20 = vld [vmem:[#allocation2 + $0x68] sm:$0xff] }
 0x270   : > { %9355 = vmatprep.mubr.bf16.mxu1 %v12406_v38  ;;  %v12419_v37 = vpack.c.bf16 %v6137_v40, %v6136_v11  ;;  %v6471_v2 = vld [vmem:[#allocation2 + $0x18a] sm:$0xff] }
 0x271   : > { %v6750_v40 = vld [vmem:[#allocation2 + $0x50] sm:$0xff] }
 0x276   : > { %9400 = vmatmul.mubr.bf16.gmra.mxu0 %v12299_v10  ;;  %v12426_v10 = vpack.c.bf16 %v6139_v39, %v6138_v13  ;;  %v6751_v39 = vld [vmem:[#allocation2 + $0x60] sm:$0xff]  ;;  %v9780_v13 = vld [vmem:[%s13174_s3 + $0x228] sm:$0xff]  }
 0x277   : > { %9356 = vmatmul.mubr.bf16.gmra.mxu1 %v12412_v5  ;;  %9403 = vmatprep.mubr.bf16.mxu0 %v12304_v48  ;;  %v9764_v48 = vld [vmem:[%s13174_s3 + $0x1a8] sm:$0xff]  }
 0x278   : > { %9423 = vmatprep.mubr.bf16.mxu1 %v6166_v0  ;;  %v6747_v0 = vld [vmem:[#allocation2 + $0x30] sm:$0xff] }
 0x27e   : > { %9404 = vmatmul.mubr.bf16.gmra.mxu0 %v12417_v22 }
 0x27f   : > { %9424 = vmatmul.mubr.bf16.vlgmr.msra.gmra.mxu1 %v12419_v37  ;;  %9471 = vmatprep.mubr.bf16.mxu0 %v12306_v45  ;;  %v9765_v45 = vld [vmem:[%s13174_s3 + $0x1a0] sm:$0xff]  }
 0x280   : > { %9504 = vmatpush3.bf16.msra.mxu1 %v9762_v24  ;;  %9427 = vmatprep.mubr.bf16.mxu1 %v12426_v10  ;;  %v9772_v24 = vld [vmem:[%s13174_s3 + $0x188] sm:$0xff]  }
 0x281   : > { %9505 = vmatprep.subr.bf16.mxu1 %v9763_v61 }
 0x284   : > { %9506 = vmatpush3.bf16.msra.mxu1 %v9763_v61  ;;  %v6781_v61 = vpack.c.bf16 %v6752_v20, %v6751_v39 }
 0x285   : > { %9507 = vmatprep.subr.bf16.mxu1 %v9764_v48 }
 0x286   : > { %9472 = vmatmul.mubr.bf16.vlgmr.msra.gmra.mxu0 %v12313_v31  ;;  %v6147_v31 = vld [vmem:[#allocation2 + $0xb1] sm:$0xff] }
 0x287   : > { %9428 = vmatmul.mubr.bf16.gmra.mxu1 %v12433_v44  ;;  %9475 = vmatprep.mubr.bf16.mxu0 %v12321_v43  ;;  %v6146_v43 = vld [vmem:[#allocation2 + $0xa9] sm:$0xff] }
 0x288   : > { %9431 = vmatprep.mubr.bf16.mxu1 %v12435_v9  ;;  %9508 = vmatpush3.bf16.msra.mxu1 %v9764_v48  ;;  %v12455_v25 = vpack.c.bf16 %v6147_v31, %v6146_v43  ;;  %v6754_v48 = vld [vmem:[#allocation2 + $0x80] sm:$0xff] }
 0x289   : > { %9552 = vmatpush3.bf16.msra.mxu0 %v9767_v32  ;;  %9509 = vmatprep.subr.bf16.mxu1 %v9765_v45  ;;  %v9775_v32 = vld [vmem:[%s13174_s3 + $0x180] sm:$0xff]  }
 0x28a   : > { %9553 = vmatprep.subr.bf16.mxu0 %v9768_v41 }
 0x28c   : > { %9510 = vmatpush3.bf16.msra.mxu1 %v9765_v45  ;;  %v6782_v45 = vpack.c.bf16 %v6754_v48, %v6753_v51 }
 0x28d   : > { %9554 = vmatpush3.bf16.msra.mxu0 %v9768_v41  ;;  %9511 = vmatprep.subr.bf16.mxu1 %v9766_v3  ;;  %v6755_v41 = vld [vmem:[#allocation2 + $0x90] sm:$0xff] }
 0x28e   : > { %9555 = vmatprep.subr.bf16.mxu0 %v9770_v63  ;;  %9476 = vmatmul.mubr.bf16.gmra.mxu0 %v12323_v29  ;;  %v6151_v29 = vld [vmem:[#allocation2 + $0xe1] sm:$0xff]  ;;  %v6783_v46 = vpack.c.bf16 %v6756_v19, %v6755_v41 }
 0x28f   : > { %9432 = vmatmul.mubr.bf16.gmra.mxu1 %v12453_v55  ;;  %9479 = vmatprep.mubr.bf16.mxu0 %v12342_v58  ;;  %v6150_v58 = vld [vmem:[#allocation2 + $0xd9] sm:$0xff] }
 0x290   : > { %9435 = vmatprep.mubr.bf16.mxu1 %v12455_v25  ;;  %9512 = vmatpush3.bf16.msra.mxu1 %v9766_v3  ;;  %v12475_v36 = vpack.c.bf16 %v6151_v29, %v6150_v58 }
 0x291   : > { %9556 = vmatpush3.bf16.msra.mxu0 %v9770_v63  ;;  %9513 = vmatprep.subr.bf16.mxu1 %v9769_v1 }
 0x292   : > { %9557 = vmatprep.subr.bf16.mxu0 %v9771_v34 }
 0x294   : > { %9514 = vmatpush3.bf16.msra.mxu1 %v9769_v1 }
 0x295   : > { %9558 = vmatpush3.bf16.msra.mxu0 %v9771_v34  ;;  %9515 = vmatprep.subr.bf16.mxu1 %v9772_v24  ;;  %v6758_v34 = vld [vmem:[#allocation2 + $0xb0] sm:$0xff] }
 0x296   : > { %9559 = vmatprep.subr.bf16.mxu0 %v9773_v49  ;;  %9480 = vmatmul.mubr.bf16.gmra.mxu0 %v12344_v12  ;;  %v12493_v12 = vld [vmem:[#allocation2 + $0x109] sm:$0xff] }
 0x297   : > { %9436 = vmatmul.mubr.bf16.gmra.mxu1 %v12473_v53  ;;  %9483 = vmatprep.mubr.bf16.mxu0 %v12362_v23  ;;  %v6176_v23 = vpack.c.bf16 %v12255_v18, %v12493_v12  ;;  %v6161_v18 = vld [vmem:[#allocation2 + $0x159] sm:$0xff] }
 0x298   : > { %9439 = vmatprep.mubr.bf16.mxu1 %v12475_v36  ;;  %9516 = vmatpush3.bf16.msra.mxu1 %v9772_v24 }
 0x299   : > { %9560 = vmatpush3.bf16.msra.mxu0 %v9773_v49  ;;  %9517 = vmatprep.subr.bf16.mxu1 %v9775_v32  ;;  %v6760_v49 = vld [vmem:[#allocation2 + $0xc8] sm:$0xff] }
 0x29a   : > { %9561 = vmatprep.subr.bf16.mxu0 %v9774_v59 }
 0x29c   : > { %9518 = vmatpush3.bf16.msra.mxu1 %v9775_v32  ;;  %v6759_v32 = vld [vmem:[#allocation2 + $0xc0] sm:$0xff] }
 0x29d   : > { %9562 = vmatpush3.bf16.msra.mxu0 %v9774_v59  ;;  %9599 = vmatprep.subr.bf16.mxu1 %v9778_v35  ;;  %v6784_v59 = vpack.c.bf16 %v6758_v34, %v6757_v57  ;;  %v6770_v57 = vld [vmem:[#allocation2 + $0x140] sm:$0xff] }
 0x29e   : > { %9563 = vmatprep.subr.bf16.mxu0 %v9776_v60  ;;  %9484 = vmatmul.mubr.bf16.gmra.mxu0 %v12364_v6  ;;  %v6160_v6 = vld [vmem:[#allocation2 + $0x151] sm:$0xff] }
 0x29f   : > { %9440 = vmatmul.mubr.bf16.gmra.mxu1 %v12495_v7  ;;  %9487 = vmatprep.mubr.bf16.mxu0 %v12382_v26  ;;  %v12511_v54 = vpack.c.bf16 %v6161_v18, %v6160_v6  ;;  %v12517_v26 = vld [vmem:[#allocation2 + $0x181] sm:$0xff] }
 0x2a0   : > { %9443 = vmatprep.mubr.bf16.mxu1 %v6176_v23  ;;  %v6762_v6 = vld [vmem:[#allocation2 + $0xe0] sm:$0xff] }
 0x2a1   : > { %9564 = vmatpush3.bf16.msra.mxu0 %v9776_v60  ;;  %v6785_v60 = vpack.c.bf16 %v6760_v49, %v6759_v32  ;;  %v7072_v49 = vld [vmem:[#allocation2 + $0x111] sm:$0xff] }
 0x2a2   : > { %9565 = vmatprep.subr.bf16.mxu0 %v9777_v21 }
 0x2a5   : > { %9566 = vmatpush3.bf16.msra.mxu0 %v9777_v21 }
 0x2a6   : > { %9488 = vmatmul.mubr.bf16.gmra.mxu0 %v12384_v16  ;;  %v6748_v16 = vld [vmem:[#allocation2 + $0x38] sm:$0xff] }
 0x2a7   : > { %9444 = vmatmul.mubr.bf16.gmra.mxu1 %v12505_v47  ;;  %9491 = vmatprep.mubr.bf16.mxu0 %v12396_v17  ;;  %v6181_v17 = vpack.c.bf16 %v12291_v50, %v12517_v26  ;;  %v9779_v50 = vld [vmem:[%s13174_s3 + $0x230] sm:$0xff]  }
 0x2a8   : > { %9447 = vmatprep.mubr.bf16.mxu1 %v12284_v4  ;;  %v6779_v4 = vpack.c.bf16 %v6748_v16, %v6747_v0  ;;  %v9784_v16 = vld [vmem:[%s13174_s3 + $0x208] sm:$0xff]   ;;  %v6764_v0 = vld [vmem:[#allocation2 + $0xf8] sm:$0xff] }
 0x2ae   : > { %9492 = vmatmul.mubr.bf16.gmra.mxu0 %v12398_v28  ;;  %v6470_v28 = vld [vmem:[#allocation2 + $0x182] sm:$0xff] }
 0x2af   : > { %9448 = vmatmul.mubr.bf16.gmra.mxu1 %v12511_v54  ;;  %9495 = vmatprep.mubr.bf16.mxu0 %v12404_v15  ;;  %v6749_v15 = vld [vmem:[#allocation2 + $0x48] sm:$0xff] }
 0x2b0   : > { %9451 = vmatprep.mubr.bf16.mxu1 %v12297_v30  ;;  %v12523_v30 = vpack.c.bf16 %v6471_v2, %v6470_v28  ;;  %v6780_v11 = vpack.c.bf16 %v6750_v40, %v6749_v15  ;;  %v6761_v28 = vld [vmem:[#allocation2 + $0xd8] sm:$0xff]  ;;  %v6763_v15 = vld [vmem:[#allocation2 + $0xf0] sm:$0xff] }
 0x2b1   : > { %v6786_v40 = vpack.c.bf16 %v6762_v6, %v6761_v28 }
 0x2b6   : > { %9496 = vmatmul.mubr.bf16.gmra.mxu0 %v12406_v38 }
 0x2b7   : > { %9452 = vmatmul.mubr.bf16.gmra.mxu1 %v6181_v17  ;;  %9499 = vmatprep.mubr.bf16.mxu0 %v12412_v5 }
 0x2b8   : > { %9519 = vmatprep.mubr.bf16.mxu1 %v6779_v4 }
 0x2be   : > { %9500 = vmatmul.mubr.bf16.gmra.mxu0 %v12523_v30  ;;  %v9233_v38 = vpop.f32.mrf.mxu1 }
 0x2bf   : > { %9520 = vmatmul.mubr.bf16.vlgmr.msra.gmra.mxu1 %v6780_v11  ;;  %9567 = vmatprep.mubr.bf16.mxu0 %v12419_v37  ;;  %v9781_v37 = vld [vmem:[%s13174_s3 + $0x220] sm:$0xff]   ;;  %v6787_v11 = vpack.c.bf16 %v6764_v0, %v6763_v15 }
 0x2c0   : > { %9600 = vmatpush3.bf16.msra.mxu1 %v9778_v35  ;;  %9523 = vmatprep.mubr.bf16.mxu1 %v6781_v61  ;;  %v5186_v5 = vpop.f32.mrf.mxu1  ;;  %v9783_v35 = vld [vmem:[%s13174_s3 + $0x210] sm:$0xff]  }
 0x2c1   : > { %9601 = vmatprep.subr.bf16.mxu1 %v9779_v50 }
 0x2c2   : > { %v9234_v33 = vpop.f32.mrf.mxu1 }
 0x2c4   : > { %9602 = vmatpush3.bf16.msra.mxu1 %v9779_v50  ;;  %v5189_v8 = vpop.f32.mrf.mxu1  ;;  %v9785_v50 = vld [vmem:[%s13174_s3 + $0x200] sm:$0xff]  }
 0x2c5   : > { %9603 = vmatprep.subr.bf16.mxu1 %v9780_v13 }
 0x2c6   : > { %v9281_v3 = vpop.f32.mrf.mxu0  ;;  %9568 = vmatmul.mubr.bf16.vlgmr.msra.gmra.mxu0 %v12426_v10  ;;  %v9237_v63 = vpop.f32.mrf.mxu1 }
 0x2c7   : > { %9524 = vmatmul.mubr.bf16.gmra.mxu1 %v6782_v45  ;;  %v12537_v31 = vadd.f32 %v9281_v3, %v9233_v38  ;;  %9571 = vmatprep.mubr.bf16.mxu0 %v12433_v44  ;;  %v6767_v3 = vld [vmem:[#allocation2 + $0x120] sm:$0xff] }
 0x2c8   : > { %9527 = vmatprep.mubr.bf16.mxu1 %v6783_v46  ;;  %v5395_v62 = vpop.f32.mrf.mxu0  ;;  %v5202_v43 = vpop.f32.mrf.mxu1  ;;  %9604 = vmatpush3.bf16.msra.mxu1 %v9780_v13 }
 0x2c9   : > { %v12540_v1 = vadd.f32 %v5395_v62, %v5186_v5  ;;  %9605 = vmatprep.subr.bf16.mxu1 %v9781_v37 }
 0x2ca   : > { %v9282_v24 = vpop.f32.mrf.mxu0  ;;  %v9238_v10 = vpop.f32.mrf.mxu1 }
 0x2cb   : > { %v12545_v29 = vadd.f32 %v9282_v24, %v9234_v33  ;;  %v6766_v33 = vld [vmem:[#allocation2 + $0x110] sm:$0xff] }
 0x2cc   : > { %v5398_v58 = vpop.f32.mrf.mxu0  ;;  %v5205_v44 = vpop.f32.mrf.mxu1  ;;  %9606 = vmatpush3.bf16.msra.mxu1 %v9781_v37 }
 0x2cd   : > { %v12547_v56 = vadd.f32 %v5398_v58, %v5189_v8  ;;  %9607 = vmatprep.subr.bf16.mxu1 %v9782_v14  ;;  %v6768_v8 = vld [vmem:[#allocation2 + $0x128] sm:$0xff] }
 0x2ce   : > { %v9285_v27 = vpop.f32.mrf.mxu0  ;;  %9572 = vmatmul.mubr.bf16.gmra.mxu0 %v12435_v9  ;;  %v9241_v23 = vpop.f32.mrf.mxu1 }
 0x2cf   : > { %9528 = vmatmul.mubr.bf16.gmra.mxu1 %v6784_v59  ;;  %v12553_v21 = vadd.f32 %v9285_v27, %v9237_v63  ;;  %9575 = vmatprep.mubr.bf16.mxu0 %v12453_v55  ;;  %v6789_v63 = vpack.c.bf16 %v6768_v8, %v6767_v3  ;;  %v6772_v59 = vld [vmem:[#allocation2 + $0x158] sm:$0xff]  ;;  %v7082_v3 = vld [vmem:[#allocation2 + $0x189] sm:$0xff] }
 0x2d0   : > { %9531 = vmatprep.mubr.bf16.mxu1 %v6785_v60  ;;  %v5411_v52 = vpop.f32.mrf.mxu0  ;;  %v5218_v42 = vpop.f32.mrf.mxu1  ;;  %9608 = vmatpush3.bf16.msra.mxu1 %v9782_v14  ;;  %v6769_v60 = vld [vmem:[#allocation2 + $0x138] sm:$0xff] }
 0x2d1   : > { %v12556_v18 = vadd.f32 %v5411_v52, %v5202_v43  ;;  %9609 = vmatprep.subr.bf16.mxu1 %v9783_v35  ;;  %v6771_v52 = vld [vmem:[#allocation2 + $0x150] sm:$0xff] }
 0x2d2   : > { %v9286_v17 = vpop.f32.mrf.mxu0  ;;  %v9242_v9 = vpop.f32.mrf.mxu1 }
 0x2d3   : > { %v12561_v4 = vadd.f32 %v9286_v17, %v9238_v10 }
 0x2d4   : > { %v5414_v2 = vpop.f32.mrf.mxu0  ;;  %v5221_v55 = vpop.f32.mrf.mxu1  ;;  %9610 = vmatpush3.bf16.msra.mxu1 %v9783_v35  ;;  %v7094_v35 = vpack.c.bf16 %v7072_v49, %v12493_v12  ;;  %v7076_v12 = vld [vmem:[#allocation2 + $0x141] sm:$0xff] }
 0x2d5   : > { %v12563_v20 = vadd.f32 %v5414_v2, %v5205_v44  ;;  %9611 = vmatprep.subr.bf16.mxu1 %v9784_v16  ;;  %v6774_v2 = vld [vmem:[#allocation2 + $0x170] sm:$0xff] }
 0x2d6   : > { %v9289_v39 = vpop.f32.mrf.mxu0  ;;  %9576 = vmatmul.mubr.bf16.gmra.mxu0 %v12455_v25  ;;  %v9245_v38 = vpop.f32.mrf.mxu1  ;;  %v6765_v25 = vld [vmem:[#allocation2 + $0x108] sm:$0xff] }
 0x2d7   : > { %9532 = vmatmul.mubr.bf16.gmra.mxu1 %v6786_v40  ;;  %v12569_v61 = vadd.f32 %v9289_v39, %v9241_v23  ;;  %9579 = vmatprep.mubr.bf16.mxu0 %v12473_v53  ;;  %v6788_v37 = vpack.c.bf16 %v6766_v33, %v6765_v25  ;;  %v6790_v23 = vpack.c.bf16 %v6770_v57, %v6769_v60  ;;  %v7079_v57 = vld [vmem:[#allocation2 + $0x169] sm:$0xff] }
 0x2d8   : > { %9535 = vmatprep.mubr.bf16.mxu1 %v6787_v11  ;;  %v5427_v5 = vpop.f32.mrf.mxu0  ;;  %v5234_v13 = vpop.f32.mrf.mxu1  ;;  %9612 = vmatpush3.bf16.msra.mxu1 %v9784_v16  ;;  %v7075_v11 = vld [vmem:[#allocation2 + $0x139] sm:$0xff] }
 0x2d9   : > { %v12572_v48 = vadd.f32 %v5427_v5, %v5218_v42  ;;  %9613 = vmatprep.subr.bf16.mxu1 %v9785_v50  ;;  %v6791_v42 = vpack.c.bf16 %v6772_v59, %v6771_v52  ;;  %v7084_v52 = vld [vmem:[#allocation2 + $0x1a1] sm:$0xff] }
 0x2da   : > { %v9290_v19 = vpop.f32.mrf.mxu0  ;;  %v9246_v51 = vpop.f32.mrf.mxu1 }
 0x2db   : > { %v12574_v45 = vadd.f32 %v9290_v19, %v9242_v9 }
 0x2dc   : > { %v5430_v41 = vpop.f32.mrf.mxu0  ;;  %v5237_v46 = vpop.f32.mrf.mxu1  ;;  %9614 = vmatpush3.bf16.msra.mxu1 %v9785_v50  ;;  %v6773_v50 = vld [vmem:[#allocation2 + $0x168] sm:$0xff] }
 0x2dd   : > { %v12576_v53 = vadd.f32 %v5430_v41, %v5221_v55 }
 0x2de   : > { %v9293_v62 = vpop.f32.mrf.mxu0  ;;  %9580 = vmatmul.mubr.bf16.gmra.mxu0 %v12475_v36  ;;  %v9249_v43 = vpop.f32.mrf.mxu1 }
 0x2df   : > { %9536 = vmatmul.mubr.bf16.gmra.mxu1 %v6788_v37  ;;  %v12579_v34 = vadd.f32 %v9293_v62, %v9245_v38  ;;  %9583 = vmatprep.mubr.bf16.mxu0 %v12495_v7  ;;  %v7096_v38 = vpack.c.bf16 %v7076_v12, %v7075_v11  ;;  %v9794_v62 = vld [vmem:[#allocation2] sm:$0xff] }
 0x2e0   : > { %9539 = vmatprep.mubr.bf16.mxu1 %v6789_v63  ;;  %v5443_v14 = vpop.f32.mrf.mxu0  ;;  %v5250_v24 = vpop.f32.mrf.mxu1 }
 0x2e1   : > { %v12582_v10 = vadd.f32 %v5443_v14, %v5234_v13  ;;  %v6792_v13 = vpack.c.bf16 %v6774_v2, %v6773_v50  ;;  %v7359_v14 = vld [vmem:[#allocation2 + $0x32] sm:$0xff] }
 0x2e2   : > { %v9294_v58 = vpop.f32.mrf.mxu0  ;;  %v9250_v44 = vpop.f32.mrf.mxu1 }
 0x2e3   : > { %v12584_v32 = vadd.f32 %v9294_v58, %v9246_v51 }
 0x2e4   : > { %v5446_v36 = vpop.f32.mrf.mxu0  ;;  %v5253_v27 = vpop.f32.mrf.mxu1 }
 0x2e5   : > { %v12587_v7 = vadd.f32 %v5446_v36, %v5237_v46  ;;  %v7080_v46 = vld [vmem:[#allocation2 + $0x171] sm:$0xff] }
 0x2e6   : > { %v9297_v6 = vpop.f32.mrf.mxu0  ;;  %9584 = vmatmul.mubr.bf16.gmra.mxu0 %v7094_v35 }
 0x2e7   : > { %v9253_v16 = vpop.f32.mrf.mxu1  ;;  %9540 = vmatmul.mubr.bf16.gmra.mxu1 %v6790_v23  ;;  %v12589_v17 = vadd.f32 %v9297_v6, %v9249_v43  ;;  %9587 = vmatprep.mubr.bf16.mxu0 %v12505_v47  ;;  %v6794_v43 = vpack.c.bf16 %v9794_v62, %v9794_v62  ;;  %v7083_v23 = vld [vmem:[#allocation2 + $0x199] sm:$0xff] }
 0x2e8   : > { %9543 = vmatprep.mubr.bf16.mxu1 %v6791_v42  ;;  %v5459_v9 = vpop.f32.mrf.mxu0  ;;  %v7100_v2 = vpack.c.bf16 %v7084_v52, %v7083_v23  ;;  %v7365_v62 = vld [vmem:[#allocation2 + $0x7a] sm:$0xff] }
 0x2e9   : > { %v5266_v0 = vpop.f32.mrf.mxu1  ;;  %v12592_v28 = vadd.f32 %v5459_v9, %v5250_v24  ;;  %v7360_v24 = vld [vmem:[#allocation2 + $0x3a] sm:$0xff]  ;;  %v7361_v9 = vld [vmem:[#allocation2 + $0x4a] sm:$0xff] }
 0x2ea   : > { %v9298_v55 = vpop.f32.mrf.mxu0  ;;  %v7391_v60 = vpack.c.bf16 %v7360_v24, %v7359_v14 }
 0x2eb   : > { %v9254_v40 = vpop.f32.mrf.mxu1  ;;  %v12594_v15 = vadd.f32 %v9298_v55, %v9250_v44  ;;  %v7098_v44 = vpack.c.bf16 %v7080_v46, %v7079_v57  ;;  %v7363_v55 = vld [vmem:[#allocation2 + $0x62] sm:$0xff]  ;;  %v7367_v57 = vld [vmem:[#allocation2 + $0x92] sm:$0xff] }
 0x2ec   : > { %v5462_v39 = vpop.f32.mrf.mxu0 }
 0x2ed   : > { %v5269_v5 = vpop.f32.mrf.mxu1  ;;  %v12596_v33 = vadd.f32 %v5462_v39, %v5253_v27 }
 0x2ee   : > { %v9301_v47 = vpop.f32.mrf.mxu0  ;;  %9588 = vmatmul.mubr.bf16.gmra.mxu0 %v7096_v38 }
 0x2ef   : > { %v9257_v19 = vpop.f32.mrf.mxu1  ;;  %9544 = vmatmul.mubr.bf16.gmra.mxu1 %v6792_v13  ;;  %v12598_v51 = vadd.f32 %v9301_v47, %v9253_v16  ;;  %9591 = vmatprep.mubr.bf16.mxu0 %v12511_v54 }
 0x2f0   : > { %9547 = vmatprep.mubr.bf16.mxu1 %v12417_v22  ;;  %v5475_v8 = vpop.f32.mrf.mxu0  ;;  %v7099_v22 = vpack.c.bf16 %v7082_v3, %v12517_v26 }
 0x2f1   : > { %v5282_v25 = vpop.f32.mrf.mxu1  ;;  %v12602_v41 = vadd.f32 %v5475_v8, %v5266_v0  ;;  %v7362_v0 = vld [vmem:[#allocation2 + $0x52] sm:$0xff] }
 0x2f2   : > { %v9302_v37 = vpop.f32.mrf.mxu0  ;;  %v7392_v38 = vpack.c.bf16 %v7362_v0, %v7361_v9 }
 0x2f3   : > { %v9258_v63 = vpop.f32.mrf.mxu1  ;;  %v12604_v49 = vadd.f32 %v9302_v37, %v9254_v40  ;;  %v7364_v40 = vld [vmem:[#allocation2 + $0x6a] sm:$0xff] }
 0x2f4   : > { %v5478_v58 = vpop.f32.mrf.mxu0  ;;  %v7393_v13 = vpack.c.bf16 %v7364_v40, %v7363_v55 }
 0x2f5   : > { %v5285_v54 = vpop.f32.mrf.mxu1  ;;  %v12606_v59 = vadd.f32 %v5478_v58, %v5269_v5  ;;  %v7368_v58 = vld [vmem:[#allocation2 + $0x9a] sm:$0xff] }
 0x2f6   : > { %v9305_v36 = vpop.f32.mrf.mxu0  ;;  %9592 = vmatmul.mubr.bf16.gmra.mxu0 %v7098_v44  ;;  %v7395_v23 = vpack.c.bf16 %v7368_v58, %v7367_v57  ;;  %v7373_v57 = vld [vmem:[#allocation2 + $0xda] sm:$0xff]  ;;  %v7374_v58 = vld [vmem:[#allocation2 + $0xe2] sm:$0xff] }
 0x2f7   : > { %v9261_v35 = vpop.f32.mrf.mxu1  ;;  %9548 = vmatmul.mubr.bf16.gmra.mxu1 %v6794_v43  ;;  %v12609_v27 = vadd.f32 %v9305_v36, %v9257_v19  ;;  %9595 = vmatprep.mubr.bf16.mxu0 %v7099_v22  ;;  %v7366_v43 = vld [vmem:[#allocation2 + $0x82] sm:$0xff] }
 0x2f8   : > { %9615 = vmatprep.mubr.bf16.mxu1 %v7391_v60  ;;  %v5491_v42 = vpop.f32.mrf.mxu0 }
 0x2f9   : > { %v5298_v6 = vpop.f32.mrf.mxu1  ;;  %v12611_v16 = vadd.f32 %v5491_v42, %v5282_v25 }
 0x2fa   : > { %v9306_v12 = vpop.f32.mrf.mxu0 }
 0x2fb   : > { %v9262_v26 = vpop.f32.mrf.mxu1  ;;  %v12613_v11 = vadd.f32 %v9306_v12, %v9258_v63 }
 0x2fc   : > { %v5494_v50 = vpop.f32.mrf.mxu0 }
 0x2fd   : > { %v5301_v39 = vpop.f32.mrf.mxu1  ;;  %v12615_v5 = vadd.f32 %v5494_v50, %v5285_v54  ;;  %v7372_v50 = vld [vmem:[#allocation2 + $0xca] sm:$0xff] }
 0x2fe   : > { %v9309_v47 = vpop.f32.mrf.mxu0  ;;  %9596 = vmatmul.mubr.bf16.gmra.mxu0 %v7100_v2  ;;  %v7369_v2 = vld [vmem:[#allocation2 + $0xaa] sm:$0xff] }
 0x2ff   : > { %v9329_v19 = vpop.f32.mrf.mxu1  ;;  %9616 = vmatmul.mubr.bf16.vlgmr.msra.gmra.mxu1 %v7392_v38  ;;  %v12617_v8 = vadd.f32 %v9309_v47, %v9261_v35 }
 0x300   : > { %v5798_v25 = vadd.f32 %v9329_v19, %v12537_v31  ;;  %9619 = vmatprep.mubr.bf16.mxu1 %v7393_v13  ;;  %v5507_v46 = vpop.f32.mrf.mxu0  ;;  %v7394_v31 = vpack.c.bf16 %v7366_v43, %v7365_v62 }
 0x301   : > { %v5669_v37 = vpop.f32.mrf.mxu1  ;;  %v12620_v3 = vadd.f32 %v5507_v46, %v5298_v6 }
 0x302   : > { %v5796_v63 = vadd.f32 %v5669_v37, %v12540_v1  ;;  %v9310_v14 = vpop.f32.mrf.mxu0 }
 0x303   : > { %v9330_v24 = vpop.f32.mrf.mxu1  ;;  %v12623_v44 = vadd.f32 %v9310_v14, %v9262_v26  ;;  %v7370_v26 = vld [vmem:[#allocation2 + $0xb2] sm:$0xff] }
 0x304   : > { %v5799_v54 = vadd.f32 %v9330_v24, %v12545_v29  ;;  %v5510_v22 = vpop.f32.mrf.mxu0 }
 0x305   : > { %v5672_v60 = vpop.f32.mrf.mxu1  ;;  %v12626_v36 = vadd.f32 %v5510_v22, %v5301_v39 }
 0x306   : > { %v5797_v35 = vadd.f32 %v5672_v60, %v12547_v56  ;;  %v9377_v52 = vpop.f32.mrf.mxu0  ;;  %v7371_v56 = vld [vmem:[#allocation2 + $0xc2] sm:$0xff]  ;;  %v7376_v60 = vld [vmem:[#allocation2 + $0xfa] sm:$0xff] }
 0x307   : > { %v9333_v1 = vpop.f32.mrf.mxu1  ;;  %9620 = vmatmul.mubr.bf16.gmra.mxu1 %v7394_v31  ;;  %v12629_v42 = vadd.f32 %v9377_v52, %v5798_v25  ;;  %v7397_v46 = vpack.c.bf16 %v7372_v50, %v7371_v56  ;;  %v7377_v56 = vld [vmem:[#allocation2 + $0x10a] sm:$0xff]  ;;  %v7378_v50 = vld [vmem:[#allocation2 + $0x112] sm:$0xff] }
 0x308   : > { %v5802_v6 = vadd.f32 %v9333_v1, %v12553_v21  ;;  %9623 = vmatprep.mubr.bf16.mxu1 %v7395_v23  ;;  %v5975_v9 = vpop.f32.mrf.mxu0  ;;  %v7396_v21 = vpack.c.bf16 %v7370_v26, %v7369_v2 }
 0x309   : > { %v5685_v0 = vpop.f32.mrf.mxu1  ;;  %v12632_v12 = vadd.f32 %v5975_v9, %v5796_v63 }
 0x30a   : > { %v5800_v29 = vadd.f32 %v5685_v0, %v12556_v18  ;;  %v9378_v55 = vpop.f32.mrf.mxu0 }
 0x30b   : > { %v9334_v40 = vpop.f32.mrf.mxu1  ;;  %v12635_v39 = vadd.f32 %v9378_v55, %v5799_v54 }
 0x30c   : > { %v5803_v38 = vadd.f32 %v9334_v40, %v12561_v4  ;;  %v5978_v13 = vpop.f32.mrf.mxu0 }
 0x30d   : > { %v5688_v47 = vpop.f32.mrf.mxu1  ;;  %v12638_v19 = vadd.f32 %v5978_v13, %v5797_v35 }
 0x30e   : > { %v5801_v25 = vadd.f32 %v5688_v47, %v12563_v20  ;;  %v9381_v37 = vpop.f32.mrf.mxu0  ;;  %v7375_v20 = vld [vmem:[#allocation2 + $0xf2] sm:$0xff]  ;;  %v7380_v47 = vld [vmem:[#allocation2 + $0x12a] sm:$0xff] }
 0x30f   : > { %v9337_v18 = vpop.f32.mrf.mxu1  ;;  %9624 = vmatmul.mubr.bf16.gmra.mxu1 %v7396_v21  ;;  %v12641_v63 = vadd.f32 %v9381_v37, %v5802_v6  ;;  %v7399_v9 = vpack.c.bf16 %v7376_v60, %v7375_v20  ;;  %v7381_v20 = vld [vmem:[#allocation2 + $0x13a] sm:$0xff]  ;;  %v7382_v60 = vld [vmem:[#allocation2 + $0x142] sm:$0xff] }
 0x310   : > { %v5806_v62 = vadd.f32 %v9337_v18, %v12569_v61  ;;  %9627 = vmatprep.mubr.bf16.mxu1 %v7397_v46  ;;  %v5991_v43 = vpop.f32.mrf.mxu0  ;;  %v7398_v61 = vpack.c.bf16 %v7374_v58, %v7373_v57 }
 0x311   : > { %v5701_v14 = vpop.f32.mrf.mxu1  ;;  %v12644_v24 = vadd.f32 %v5991_v43, %v5800_v29 }
 0x312   : > { %v5804_v4 = vadd.f32 %v5701_v14, %v12572_v48  ;;  %v9382_v54 = vpop.f32.mrf.mxu0 }
 0x313   : > { %v9338_v22 = vpop.f32.mrf.mxu1  ;;  %v12647_v31 = vadd.f32 %v9382_v54, %v5803_v38 }
 0x314   : > { %v5807_v35 = vadd.f32 %v9338_v22, %v12574_v45  ;;  %v5994_v23 = vpop.f32.mrf.mxu0 }
 0x315   : > { %v5704_v52 = vpop.f32.mrf.mxu1  ;;  %v12650_v1 = vadd.f32 %v5994_v23, %v5801_v25 }
 0x316   : > { %v5805_v6 = vadd.f32 %v5704_v52, %v12576_v53  ;;  %v9385_v0 = vpop.f32.mrf.mxu0  ;;  %v7379_v53 = vld [vmem:[#allocation2 + $0x122] sm:$0xff]  ;;  %v7384_v52 = vld [vmem:[#allocation2 + $0x15a] sm:$0xff] }
 0x317   : > { %v9341_v48 = vpop.f32.mrf.mxu1  ;;  %9628 = vmatmul.mubr.bf16.gmra.mxu1 %v7398_v61  ;;  %v12653_v29 = vadd.f32 %v9385_v0, %v5806_v62  ;;  %v7401_v43 = vpack.c.bf16 %v7380_v47, %v7379_v53  ;;  %v7385_v53 = vld [vmem:[#allocation2 + $0x16a] sm:$0xff]  ;;  %v7386_v47 = vld [vmem:[#allocation2 + $0x172] sm:$0xff] }
 0x318   : > { %v5810_v2 = vadd.f32 %v9341_v48, %v12579_v34  ;;  %9631 = vmatprep.mubr.bf16.mxu1 %v7399_v9  ;;  %v6007_v26 = vpop.f32.mrf.mxu0  ;;  %v7400_v34 = vpack.c.bf16 %v7378_v50, %v7377_v56 }
 0x319   : > { %v5717_v55 = vpop.f32.mrf.mxu1  ;;  %v12656_v40 = vadd.f32 %v6007_v26, %v5804_v4 }
 0x31a   : > { %v5808_v45 = vadd.f32 %v5717_v55, %v12582_v10  ;;  %v9386_v38 = vpop.f32.mrf.mxu0 }
 0x31b   : > { %v9342_v13 = vpop.f32.mrf.mxu1  ;;  %v12659_v21 = vadd.f32 %v9386_v38, %v5807_v35 }
 0x31c   : > { %v5811_v25 = vadd.f32 %v9342_v13, %v12584_v32  ;;  %v6010_v46 = vpop.f32.mrf.mxu0 }
 0x31d   : > { %v5720_v37 = vpop.f32.mrf.mxu1  ;;  %v12662_v18 = vadd.f32 %v6010_v46, %v5805_v6 }
 0x31e   : > { %v5809_v62 = vadd.f32 %v5720_v37, %v12587_v7  ;;  %v9389_v14 = vpop.f32.mrf.mxu0  ;;  %v7383_v7 = vld [vmem:[#allocation2 + $0x152] sm:$0xff] }
 0x31f   : > { %v9345_v10 = vpop.f32.mrf.mxu1  ;;  %9632 = vmatmul.mubr.bf16.gmra.mxu1 %v7400_v34  ;;  %v12665_v4 = vadd.f32 %v9389_v14, %v5810_v2  ;;  %v7403_v26 = vpack.c.bf16 %v7384_v52, %v7383_v7 }
 0x320   : > { %v5814_v57 = vadd.f32 %v9345_v10, %v12589_v17  ;;  %9635 = vmatprep.mubr.bf16.mxu1 %v7401_v43  ;;  %v6023_v58 = vpop.f32.mrf.mxu0  ;;  %v7402_v17 = vpack.c.bf16 %v7382_v60, %v7381_v20  ;;  %v7404_v43 = vpack.c.bf16 %v7386_v47, %v7385_v53 }
 0x321   : > { %v5733_v54 = vpop.f32.mrf.mxu1  ;;  %v12668_v22 = vadd.f32 %v6023_v58, %v5808_v45 }
 0x322   : > { %v5812_v32 = vadd.f32 %v5733_v54, %v12592_v28  ;;  %v9390_v35 = vpop.f32.mrf.mxu0  ;;  %v7389_v54 = vld [vmem:[#allocation2 + $0x19a] sm:$0xff] }
 0x323   : > { %v9346_v23 = vpop.f32.mrf.mxu1  ;;  %v12671_v61 = vadd.f32 %v9390_v35, %v5811_v25 }
 0x324   : > { %v5815_v6 = vadd.f32 %v9346_v23, %v12594_v15  ;;  %v6026_v9 = vpop.f32.mrf.mxu0 }
 0x325   : > { %v5736_v0 = vpop.f32.mrf.mxu1  ;;  %v12674_v48 = vadd.f32 %v6026_v9, %v5809_v62 }
 0x326   : > { %v5813_v2 = vadd.f32 %v5736_v0, %v12596_v33  ;;  %v9393_v55 = vpop.f32.mrf.mxu0 }
 0x327   : > { %v9349_v28 = vpop.f32.mrf.mxu1  ;;  %9636 = vmatmul.mubr.bf16.gmra.mxu1 %v7402_v17  ;;  %v12677_v45 = vadd.f32 %v9393_v55, %v5814_v57 }
 0x328   : > { %v5818_v56 = vadd.f32 %v9349_v28, %v12598_v51  ;;  %9639 = vmatprep.mubr.bf16.mxu1 %v7403_v26  ;;  %v6039_v50 = vpop.f32.mrf.mxu0 }
 0x329   : > { %v5749_v38 = vpop.f32.mrf.mxu1  ;;  %v12680_v13 = vadd.f32 %v6039_v50, %v5812_v32  ;;  %v7390_v32 = vld [vmem:[#allocation2 + $0x1a2] sm:$0xff] }
 0x32a   : > { %v5816_v15 = vadd.f32 %v5749_v38, %v12602_v41  ;;  %v9394_v25 = vpop.f32.mrf.mxu0 }
 0x32b   : > { %v9350_v46 = vpop.f32.mrf.mxu1  ;;  %v12683_v33 = vadd.f32 %v9394_v25, %v5815_v6 }
 0x32c   : > { %v5819_v37 = vadd.f32 %v9350_v46, %v12604_v49  ;;  %v6042_v34 = vpop.f32.mrf.mxu0 }
 0x32d   : > { %v5752_v62 = vpop.f32.mrf.mxu1  ;;  %v12686_v14 = vadd.f32 %v6042_v34, %v5813_v2 }
 0x32e   : > { %v5817_v51 = vadd.f32 %v5752_v62, %v12606_v59  ;;  %v9397_v10 = vpop.f32.mrf.mxu0  ;;  %v7406_v59 = vpack.c.bf16 %v7390_v32, %v7389_v54 }
 0x32f   : > { %v9353_v57 = vpop.f32.mrf.mxu1  ;;  %9640 = vmatmul.mubr.bf16.gmra.mxu1 %v7404_v43  ;;  %v12689_v58 = vadd.f32 %v9397_v10, %v5818_v56 }
 0x330   : > { %v5822_v41 = vadd.f32 %v9353_v57, %v12609_v27  ;;  %9643 = vmatprep.mubr.bf16.mxu1 %v12523_v30  ;;  %v6055_v20 = vpop.f32.mrf.mxu0 }
 0x331   : > { %v5765_v49 = vpop.f32.mrf.mxu1  ;;  %v12693_v60 = vadd.f32 %v6055_v20, %v5816_v15 }
 0x332   : > { %v5820_v35 = vadd.f32 %v5765_v49, %v12611_v16  ;;  %v9398_v23 = vpop.f32.mrf.mxu0 }
 0x333   : > { %v9354_v7 = vpop.f32.mrf.mxu1  ;;  %v12696_v52 = vadd.f32 %v9398_v23, %v5819_v37 }
 0x334   : > { %v5823_v6 = vadd.f32 %v9354_v7, %v12613_v11  ;;  %v6058_v9 = vpop.f32.mrf.mxu0 }
 0x335   : > { %v5768_v0 = vpop.f32.mrf.mxu1  ;;  %v12699_v27 = vadd.f32 %v6058_v9, %v5817_v51 }
 0x336   : > { %v5821_v30 = vadd.f32 %v5768_v0, %v12615_v5  ;;  %v9401_v17 = vpop.f32.mrf.mxu0 }
 0x337   : > { %v9357_v2 = vpop.f32.mrf.mxu1  ;;  %9644 = vmatmul.mubr.bf16.gmra.mxu1 %v7406_v59  ;;  %v12702_v26 = vadd.f32 %v9401_v17, %v5822_v41 }
 0x338   : > { %v5826_v16 = vadd.f32 %v9357_v2, %v12617_v8  ;;  %v6071_v55 = vpop.f32.mrf.mxu0 }
 0x339   : > { %v5781_v28 = vpop.f32.mrf.mxu1  ;;  %v12705_v56 = vadd.f32 %v6071_v55, %v5820_v35 }
 0x33a   : > { %v5824_v50 = vadd.f32 %v5781_v28, %v12620_v3  ;;  %v9402_v11 = vpop.f32.mrf.mxu0 }
 0x33b   : > { %v9358_v38 = vpop.f32.mrf.mxu1  ;;  %v12708_v15 = vadd.f32 %v9402_v11, %v5823_v6 }
 0x33c   : > { %v5827_v53 = vadd.f32 %v9358_v38, %v12623_v44  ;;  %v6074_v5 = vpop.f32.mrf.mxu0 }
 0x33d   : > { %v5784_v47 = vpop.f32.mrf.mxu1  ;;  %v12711_v25 = vadd.f32 %v6074_v5, %v5821_v30 }
 0x33e   : > { %v5825_v46 = vadd.f32 %v5784_v47, %v12626_v36  ;;  %v9405_v37 = vpop.f32.mrf.mxu0 }
 0x33f   : > { %v9425_v8 = vpop.f32.mrf.mxu1  ;;  %v12714_v34 = vadd.f32 %v9405_v37, %v5826_v16 }
 0x340   : > { %v12717_v62 = vadd.f32 %v9425_v8, %v12629_v42  ;;  %v6087_v3 = vpop.f32.mrf.mxu0 }
 0x341   : > { %v6281_v43 = vpop.f32.mrf.mxu1  ;;  %v12719_v51 = vadd.f32 %v6087_v3, %v5824_v50 }
 0x342   : > { %v12722_v10 = vadd.f32 %v6281_v43, %v12632_v12  ;;  %v9406_v44 = vpop.f32.mrf.mxu0 }
 0x343   : > { %v9426_v57 = vpop.f32.mrf.mxu1  ;;  %v12724_v41 = vadd.f32 %v9406_v44, %v5827_v53 }
 0x344   : > { %v12727_v36 = vadd.f32 %v9426_v57, %v12635_v39  ;;  %v6090_v54 = vpop.f32.mrf.mxu0 }
 0x345   : > { %v6284_v32 = vpop.f32.mrf.mxu1  ;;  %v12729_v20 = vadd.f32 %v6090_v54, %v5825_v46 }
 0x346   : > { %v12732_v42 = vadd.f32 %v6284_v32, %v12638_v19  ;;  %v12734_v49 = vpop.f32.mrf.mxu0 }
 0x347   : > { %v9429_v35 = vpop.f32.mrf.mxu1 }
 0x348   : > { %v12737_v12 = vadd.f32 %v9429_v35, %v12641_v63  ;;  %v12739_v23 = vpop.f32.mrf.mxu0 }
 0x349   : > { %v6297_v7 = vpop.f32.mrf.mxu1 }
 0x34a   : > { %v12742_v59 = vadd.f32 %v6297_v7, %v12644_v24  ;;  %v12744_v39 = vpop.f32.mrf.mxu0 }
 0x34b   : > { %v9430_v6 = vpop.f32.mrf.mxu1 }
 0x34c   : > { %v12747_v9 = vadd.f32 %v9430_v6, %v12647_v31  ;;  %v12749_v19 = vpop.f32.mrf.mxu0 }
 0x34d   : > { %v6300_v0 = vpop.f32.mrf.mxu1 }
 0x34e   : > { %v12752_v30 = vadd.f32 %v6300_v0, %v12650_v1  ;;  %v12754_v63 = vpop.f32.mrf.mxu0 }
 0x34f   : > { %v9433_v17 = vpop.f32.mrf.mxu1 }
 0x350   : > { %v12757_v2 = vadd.f32 %v9433_v17, %v12653_v29  ;;  %v12759_v24 = vpop.f32.mrf.mxu0 }
 0x351   : > { %v6313_v16 = vpop.f32.mrf.mxu1 }
 0x352   : > { %v12762_v55 = vadd.f32 %v6313_v16, %v12656_v40  ;;  %v12764_v31 = vpop.f32.mrf.mxu0 }
 0x353   : > { %v9434_v28 = vpop.f32.mrf.mxu1 }
 0x354   : > { %v12767_v50 = vadd.f32 %v9434_v28, %v12659_v21  ;;  %v12769_v1 = vpop.f32.mrf.mxu0 }
 0x355   : > { %v6316_v11 = vpop.f32.mrf.mxu1 }
 0x356   : > { %v12772_v38 = vadd.f32 %v6316_v11, %v12662_v18  ;;  %v12774_v29 = vpop.f32.mrf.mxu0 }
 0x357   : > { %v9437_v53 = vpop.f32.mrf.mxu1 }
 0x358   : > { %v12777_v5 = vadd.f32 %v9437_v53, %v12665_v4  ;;  %v12779_v40 = vpop.f32.mrf.mxu0 }
 0x359   : > { %v6329_v47 = vpop.f32.mrf.mxu1 }
 0x35a   : > { %v12782_v46 = vadd.f32 %v6329_v47, %v12668_v22  ;;  %v12784_v21 = vpop.f32.mrf.mxu0 }
 0x35b   : > { %v9438_v37 = vpop.f32.mrf.mxu1 }
 0x35c   : > { %v12787_v8 = vadd.f32 %v9438_v37, %v12671_v61  ;;  %v12789_v18 = vpop.f32.mrf.mxu0 }
 0x35d   : > { %v6332_v3 = vpop.f32.mrf.mxu1 }
 0x35e   : > { %v12792_v43 = vadd.f32 %v6332_v3, %v12674_v48  ;;  %v12794_v4 = vpop.f32.mrf.mxu0 }
 0x35f   : > { %v9441_v44 = vpop.f32.mrf.mxu1 }
 0x360   : > { %13394 = vst [vmem:[#allocation10_spill] sm:$0xff] %v12792_v43  ;;  %v12797_v57 = vadd.f32 %v9441_v44, %v12677_v45  ;;  %v12799_v22 = vpop.f32.mrf.mxu0 }
 0x361   : > { %v6345_v54 = vpop.f32.mrf.mxu1 }
 0x362   : > { %13395 = vst [vmem:[#allocation5_spill] sm:$0xff] %v12797_v57  ;;  %v12802_v32 = vadd.f32 %v6345_v54, %v12680_v13  ;;  %v12804_v61 = vpop.f32.mrf.mxu0 }
 0x363   : > { %13397 = vst [vmem:[#allocation12_spill] sm:$0xff] %v12804_v61  ;;  %v9442_v35 = vpop.f32.mrf.mxu1 }
 0x364   : > { %13396 = vst [vmem:[#allocation19_spill] sm:$0xff] %v12802_v32  ;;  %v12807_v7 = vadd.f32 %v9442_v35, %v12683_v33  ;;  %v12809_v48 = vpop.f32.mrf.mxu0 }
 0x365   : > { %13399 = vst [vmem:[#allocation21_spill] sm:$0xff] %v12809_v48  ;;  %v6348_v6 = vpop.f32.mrf.mxu1 }
 0x366   : > { %13398 = vst [vmem:[#allocation25_spill] sm:$0xff] %v12807_v7  ;;  %v12812_v0 = vadd.f32 %v6348_v6, %v12686_v14  ;;  %v12814_v45 = vpop.f32.mrf.mxu0 }
 0x367   : > { %13401 = vst [vmem:[#allocation13_spill] sm:$0xff] %v12814_v45  ;;  %v9445_v17 = vpop.f32.mrf.mxu1 }
 0x368   : > { %13400 = vst [vmem:[#allocation26_spill] sm:$0xff] %v12812_v0  ;;  %v12817_v16 = vadd.f32 %v9445_v17, %v12689_v58  ;;  %v12819_v13 = vpop.f32.mrf.mxu0 }
 0x369   : > { %13403 = vst [vmem:[#allocation7_spill] sm:$0xff] %v12819_v13  ;;  %v6361_v28 = vpop.f32.mrf.mxu1 }
 0x36a   : > { %13402 = vst [vmem:[#allocation3_spill] sm:$0xff] %v12817_v16  ;;  %v12822_v11 = vadd.f32 %v6361_v28, %v12693_v60  ;;  %v12824_v33 = vpop.f32.mrf.mxu0 }
 0x36b   : > { %13405 = vst [vmem:[#allocation11_spill] sm:$0xff] %v12824_v33  ;;  %v9446_v53 = vpop.f32.mrf.mxu1 }
 0x36c   : > { %13404 = vst [vmem:[#allocation4_spill] sm:$0xff] %v12822_v11  ;;  %v12827_v47 = vadd.f32 %v9446_v53, %v12696_v52  ;;  %v12829_v14 = vpop.f32.mrf.mxu0 }
 0x36d   : > { %13407 = vst [vmem:[#allocation8_spill] sm:$0xff] %v12829_v14  ;;  %v6364_v37 = vpop.f32.mrf.mxu1 }
 0x36e   : > { %13406 = vst [vmem:[#allocation6_spill] sm:$0xff] %v12827_v47  ;;  %v12832_v3 = vadd.f32 %v6364_v37, %v12699_v27  ;;  %v12834_v58 = vpop.f32.mrf.mxu0 }
 0x36f   : > { %13409 = vst [vmem:[#allocation53_spill] sm:$0xff] %v12834_v58  ;;  %v9449_v44 = vpop.f32.mrf.mxu1 }
 0x370   : > { %13408 = vst [vmem:[#allocation18_spill] sm:$0xff] %v12832_v3  ;;  %v12837_v54 = vadd.f32 %v9449_v44, %v12702_v26  ;;  %v12839_v60 = vpop.f32.mrf.mxu0 }
 0x371   : > { %13411 = vst [vmem:[#allocation17_spill] sm:$0xff] %v12839_v60  ;;  %v6377_v35 = vpop.f32.mrf.mxu1 }
 0x372   : > { %13410 = vst [vmem:[#allocation52_spill] sm:$0xff] %v12837_v54  ;;  %v12842_v6 = vadd.f32 %v6377_v35, %v12705_v56  ;;  %v12844_v52 = vpop.f32.mrf.mxu0 }
 0x373   : > { %13413 = vst [vmem:[#allocation29_spill] sm:$0xff] %v12844_v52  ;;  %v9450_v17 = vpop.f32.mrf.mxu1 }
 0x374   : > { %13412 = vst [vmem:[#allocation9_spill] sm:$0xff] %v12842_v6  ;;  %v12847_v28 = vadd.f32 %v9450_v17, %v12708_v15  ;;  %v12849_v27 = vpop.f32.mrf.mxu0 }
 0x375   : > { %13415 = vst [vmem:[#allocation54_spill] sm:$0xff] %v12849_v27  ;;  %v6380_v53 = vpop.f32.mrf.mxu1 }
 0x376   : > { %13414 = vst [vmem:[#allocation55_spill] sm:$0xff] %v12847_v28  ;;  %v12852_v37 = vadd.f32 %v6380_v53, %v12711_v25  ;;  %v12854_v26 = vpop.f32.mrf.mxu0 }
 0x377   : > { %13417 = vst [vmem:[#allocation15_spill] sm:$0xff] %v12854_v26  ;;  %v9453_v44 = vpop.f32.mrf.mxu1 }
 0x378   : > { %13416 = vst [vmem:[#allocation24_spill] sm:$0xff] %v12852_v37  ;;  %v12857_v54 = vadd.f32 %v9453_v44, %v12714_v34  ;;  %v12859_v56 = vpop.f32.mrf.mxu0 }
 0x379   : > { %13419 = vst [vmem:[#allocation20_spill] sm:$0xff] %v12859_v56  ;;  %v6393_v35 = vpop.f32.mrf.mxu1 }
 0x37a   : > { %13418 = vst [vmem:[#allocation28_spill] sm:$0xff] %v12857_v54  ;;  %v12862_v6 = vadd.f32 %v6393_v35, %v12719_v51  ;;  %v12864_v15 = vpop.f32.mrf.mxu0 }
 0x37b   : > { %13421 = vst [vmem:[#allocation56_spill] sm:$0xff] %v12864_v15  ;;  %v9454_v17 = vpop.f32.mrf.mxu1 }
 0x37c   : > { %13420 = vst [vmem:[#allocation58_spill] sm:$0xff] %v12862_v6  ;;  %v12867_v28 = vadd.f32 %v9454_v17, %v12724_v41  ;;  %v12869_v25 = vpop.f32.mrf.mxu0 }
 0x37d   : > { %13423 = vst [vmem:[#allocation32_spill] sm:$0xff] %v12869_v25  ;;  %v6396_v53 = vpop.f32.mrf.mxu1 }
 0x37e   : > { %13422 = vst [vmem:[#allocation14_spill] sm:$0xff] %v12867_v28  ;;  %v12872_v37 = vadd.f32 %v6396_v53, %v12729_v20  ;;  %v12874_v34 = vpop.f32.mrf.mxu0 }
 0x37f   : > { %13425 = vst [vmem:[#allocation61_spill] sm:$0xff] %v12874_v34  ;;  %v9521_v44 = vpop.f32.mrf.mxu1 }
 0x380   : > { %13424 = vst [vmem:[#allocation16_spill] sm:$0xff] %v12872_v37  ;;  %v12876_v54 = vpop.f32.mrf.mxu0 }
 0x381   : > { %13426 = vst [vmem:[#allocation57_spill] sm:$0xff] %v12876_v54  ;;  %v6894_v56 = vpop.f32.mrf.mxu1 }
 0x382   : > { %v12878_v51 = vpop.f32.mrf.mxu0 }
 0x383   : > { %13427 = vst [vmem:[#allocation34_spill] sm:$0xff] %v12878_v51  ;;  %v9522_v35 = vpop.f32.mrf.mxu1 }
 0x384   : > { %v12880_v6 = vpop.f32.mrf.mxu0 }
 0x385   : > { %13428 = vst [vmem:[#allocation22_spill] sm:$0xff] %v12880_v6  ;;  %v12882_v15 = vpop.f32.mrf.mxu1 }
 0x386   : > { %v9569_v41 = vpop.f32.mrf.mxu0 }
 0x387   : > { %v12884_v17 = vpop.f32.mrf.mxu1 }
 0x388   : > { %v7200_v28 = vpop.f32.mrf.mxu0 }
 0x389   : > { %v12886_v25 = vpop.f32.mrf.mxu1 }
 0x38a   : > { %v9570_v20 = vpop.f32.mrf.mxu0 }
 0x38b   : > { %v12888_v53 = vpop.f32.mrf.mxu1 }
 0x38c   : > { %v7203_v37 = vpop.f32.mrf.mxu0 }
 0x38d   : > { %v12890_v34 = vpop.f32.mrf.mxu1 }
 0x38e   : > { %v12892_v54 = vpop.f32.mrf.mxu0 }
 0x38f   : > { %v12894_v51 = vpop.f32.mrf.mxu1 }
 0x390   : > { %v12896_v26 = vpop.f32.mrf.mxu0 }
 0x391   : > { %v12898_v6 = vpop.f32.mrf.mxu1 }
 0x392   : > { %v12902_v3 = vpop.f32.mrf.mxu0 }
 0x393   : > { %v12900_v27 = vpop.f32.mrf.mxu1 }
 0x394   : > { %v12908_v60 = vpop.f32.mrf.mxu0 }
 0x395   : > { %v12904_v52 = vpop.f32.mrf.mxu1 }
 0x396   : > { %v12914_v16 = vpop.f32.mrf.mxu0 }
 0x397   : > { %v12906_v47 = vpop.f32.mrf.mxu1 }
 0x398   : > { %v12920_v33 = vpop.f32.mrf.mxu0 }
 0x399   : > { %v12910_v11 = vpop.f32.mrf.mxu1 }
 0x39a   : > { %13429 = vst [vmem:[#allocation37_spill] sm:$0xff] %v12910_v11  ;;  %v12926_v32 = vpop.f32.mrf.mxu0 }
 0x39b   : > { %v12912_v58 = vpop.f32.mrf.mxu1 }
 0x39c   : > { %13430 = vst [vmem:[#allocation64_spill] sm:$0xff] %v12912_v58  ;;  %v12932_v48 = vpop.f32.mrf.mxu0 }
 0x39d   : > { %v12916_v14 = vpop.f32.mrf.mxu1 }
 0x39e   : > { %13431 = vst [vmem:[#allocation59_spill] sm:$0xff] %v12916_v14  ;;  %v12938_v14 = vpop.f32.mrf.mxu0 }
 0x39f   : > { %v12918_v0 = vpop.f32.mrf.mxu1  ;;  %13439 = vst [vmem:[#allocation30_spill] sm:$0xff] %v12938_v14 }
 0x3a0   : > { %13432 = vst [vmem:[#allocation36_spill] sm:$0xff] %v12918_v0 }
 0x3a1   : > { %v12922_v7 = vpop.f32.mrf.mxu1 }
 0x3a2   : > { %13433 = vst [vmem:[#allocation27_spill] sm:$0xff] %v12922_v7  ;;  %v12944_v7 = vpop.f32.mrf.mxu0 }
 0x3a3   : > { %v12924_v13 = vpop.f32.mrf.mxu1  ;;  %13442 = vst [vmem:[#allocation73_spill] sm:$0xff] %v12944_v7 }
 0x3a4   : > { %13434 = vst [vmem:[#allocation67_spill] sm:$0xff] %v12924_v13 }
 0x3a5   : > { %v12928_v45 = vpop.f32.mrf.mxu1 }
 0x3a6   : > { %13435 = vst [vmem:[#allocation60_spill] sm:$0xff] %v12928_v45 }
 0x3a7   : > { %v12930_v57 = vpop.f32.mrf.mxu1 }
 0x3a8   : > { %13436 = vst [vmem:[#allocation70_spill] sm:$0xff] %v12930_v57  ;;  %v12950_v57 = vpop.f32.mrf.mxu0 }
 0x3a9   : > { %v12934_v58 = vpop.f32.mrf.mxu1  ;;  %13445 = vst [vmem:[#allocation41_spill] sm:$0xff] %v12950_v57 }
 0x3aa   : > { %13437 = vst [vmem:[#allocation62_spill] sm:$0xff] %v12934_v58 }
 0x3ab   : > { %v12936_v43 = vpop.f32.mrf.mxu1 }
 0x3ac   : > { %13438 = vst [vmem:[#allocation63_spill] sm:$0xff] %v12936_v43  ;;  %v12956_v43 = vpop.f32.mrf.mxu0 }
 0x3ad   : > { %v12940_v0 = vpop.f32.mrf.mxu1  ;;  %13448 = vst [vmem:[#allocation76_spill] sm:$0xff] %v12956_v43 }
 0x3ae   : > { %13440 = vst [vmem:[#allocation39_spill] sm:$0xff] %v12940_v0 }
 0x3af   : > { %v12942_v11 = vpop.f32.mrf.mxu1 }
 0x3b0   : > { %13441 = vst [vmem:[#allocation31_spill] sm:$0xff] %v12942_v11  ;;  %v6716_v11 = vadd.f32 %v12734_v49, %v12717_v62  ;;  %v12976_v62 = vld [vmem:[%s13175_s4] ss:$0 sm:$0xff] }
 0x3b1   : > { %v12946_v13 = vpop.f32.mrf.mxu1 }
 0x3b2   : > { %13443 = vst [vmem:[#allocation65_spill] sm:$0xff] %v12946_v13  ;;  %v6714_v13 = vadd.f32 %v12739_v23, %v12722_v10  ;;  %v7023_v7 = vadd.f32 %v9521_v44, %v6716_v11  ;;  %v6715_v10 = vadd.f32 %v12749_v19, %v12732_v42  ;;  %v6720_v44 = vadd.f32 %v12754_v63, %v12737_v12 }
 0x3b3   : > { %v12948_v45 = vpop.f32.mrf.mxu1 }
 0x3b4   : > { %13444 = vst [vmem:[#allocation23_spill] sm:$0xff] %v12948_v45  ;;  %v12966_v45 = vpop.f32.mrf.mxu0  ;;  %v7021_v43 = vadd.f32 %v6894_v56, %v6714_v13 }
 0x3b5   : > { %v12952_v61 = vpop.f32.mrf.mxu1 }
 0x3b6   : > { %13446 = vst [vmem:[#allocation33_spill] sm:$0xff] %v12952_v61  ;;  %v7329_v61 = vadd.f32 %v9569_v41, %v7023_v7  ;;  %v7327_v49 = vadd.f32 %v7200_v28, %v7021_v43  ;;  %v7022_v7 = vadd.f32 %v12882_v15, %v6715_v10  ;;  %v6718_v43 = vadd.f32 %v12759_v24, %v12742_v59 }
 0x3b7   : > { %v12954_v58 = vpop.f32.mrf.mxu1 }
 0x3b8   : > { %13447 = vst [vmem:[#allocation44_spill] sm:$0xff] %v12954_v58  ;;  %v6717_v58 = vadd.f32 %v12744_v39, %v12727_v36  ;;  %v7328_v63 = vadd.f32 %v7203_v37, %v7022_v7  ;;  %v6719_v37 = vadd.f32 %v12769_v1, %v12752_v30 }
 0x3b9   : > { %v12958_v14 = vpop.f32.mrf.mxu1 }
 0x3ba   : > { %13449 = vst [vmem:[#allocation79_spill] sm:$0xff] %v12958_v14  ;;  %v7024_v23 = vadd.f32 %v9522_v35, %v6717_v58  ;;  %v6721_v58 = vadd.f32 %v12764_v31, %v12747_v9  ;;  %v7025_v35 = vadd.f32 %v12886_v25, %v6718_v43  ;;  %v6724_v25 = vadd.f32 %v12774_v29, %v12757_v2 }
 0x3bb   : > { %v12962_v0 = vpop.f32.mrf.mxu1  ;;  %v7026_v30 = vadd.f32 %v12890_v34, %v6719_v37  ;;  %v6725_v34 = vadd.f32 %v12784_v21, %v12767_v50 }
 0x3bc   : > { %v7330_v39 = vadd.f32 %v9570_v20, %v7024_v23  ;;  %v7028_v9 = vadd.f32 %v12888_v53, %v6721_v58  ;;  %v6722_v53 = vadd.f32 %v12779_v40, %v12762_v55  ;;  %v7031_v2 = vadd.f32 %v12894_v51, %v6724_v25  ;;  %v13458_v25 = vld [vmem:[#allocation5_spill] sm:$0xff] }
 0x3bd   : > { %v12968_v57 = vpop.f32.mrf.mxu1  ;;  %v6723_v51 = vadd.f32 %v12789_v18, %v12772_v38  ;;  %v7032_v50 = vadd.f32 %v12900_v27, %v6725_v34  ;;  %v6726_v27 = vadd.f32 %v12799_v22, %v12782_v46  ;;  %v13463_v34 = vld [vmem:[#allocation7_spill] sm:$0xff] }
 0x3be   : > { %13450 = vst [vmem:[#allocation66_spill] sm:$0xff] %v12968_v57  ;;  %v12982_v57 = vpop.f32.mrf.mxu0  ;;  %v7029_v55 = vadd.f32 %v12898_v6, %v6722_v53  ;;  %v6728_v6 = vadd.f32 %v12794_v4, %v12777_v5 }
 0x3bf   : > { %v9617_v14 = vpop.f32.mrf.mxu1  ;;  %v7030_v38 = vadd.f32 %v12904_v52, %v6723_v51  ;;  %v13451_v52 = vld [vmem:[#allocation12_spill] sm:$0xff] }
 0x3c0   : > { %v7635_v11 = vadd.f32 %v9617_v14, %v7329_v61  ;;  %v7027_v61 = vadd.f32 %v12884_v17, %v6720_v44  ;;  %v12998_v28 = vpop.f32.mrf.mxu0  ;;  %v7331_v17 = vadd.f32 %v12896_v26, %v7025_v35  ;;  %v7035_v5 = vadd.f32 %v12906_v47, %v6728_v6  ;;  %v13453_v35 = vld [vmem:[#allocation37_spill] sm:$0xff]  ;;  %v13454_v47 = vld [vmem:[#allocation10_spill] sm:$0xff] }
 0x3c1   : > { %v7506_v36 = vpop.f32.mrf.mxu1  ;;  %v7033_v46 = vadd.f32 %v13453_v35, %v6726_v27 }
 0x3c2   : > { %v7674_v42 = vadd.f32 %v12976_v62, %v7635_v11  ;;  %v7633_v19 = vadd.f32 %v7506_v36, %v7327_v49  ;;  %v7333_v15 = vadd.f32 %v12892_v54, %v7027_v61  ;;  %v13012_v20 = vpop.f32.mrf.mxu0  ;;  %v7334_v49 = vadd.f32 %v12902_v3, %v7028_v9  ;;  %v13457_v9 = vld [vmem:[#allocation64_spill] sm:$0xff] }
 0x3c3   : > { %v9618_v12 = vpop.f32.mrf.mxu1  ;;  %v7332_v11 = vadd.f32 %v12908_v60, %v7026_v30  ;;  %v7336_v61 = vadd.f32 %v12932_v48, %v7030_v38  ;;  %v13468_v38 = vld [vmem:[#allocation27_spill] sm:$0xff] }
 0x3c4   : > { %7706 = vst [vmem:[%s12987_s19 + $0x10] sm:$0xff] %v7674_v42  ;;  %v7672_v13 = vadd.f32 %v12976_v62, %v7633_v19  ;;  %v7636_v14 = vadd.f32 %v9618_v12, %v7330_v39  ;;  %v13026_v44 = vpop.f32.mrf.mxu0  ;;  %v7337_v39 = vadd.f32 %v12914_v16, %v7031_v2  ;;  %v7335_v42 = vadd.f32 %v12920_v33, %v7029_v55  ;;  %v13464_v55 = vld [vmem:[#allocation76_spill] sm:$0xff] }
 0x3c5   : > { %v7509_v56 = vpop.f32.mrf.mxu1  ;;  %v7338_v12 = vadd.f32 %v12926_v32, %v7032_v50  ;;  %v13466_v50 = vld [vmem:[#allocation25_spill] sm:$0xff] }
 0x3c6   : > { %7704 = vst [vmem:[%s12987_s19] sm:$0xff] %v7672_v13  ;;  %v7675_v59 = vadd.f32 %v12976_v62, %v7636_v14  ;;  %v7634_v24 = vadd.f32 %v7509_v56, %v7328_v63  ;;  %v13040_v19 = vpop.f32.mrf.mxu0  ;;  %v6729_v13 = vadd.f32 %v13451_v52, %v12787_v8  ;;  %v13452_v56 = vld [vmem:[#allocation30_spill] sm:$0xff]  ;;  %v13471_v52 = vld [vmem:[#allocation67_spill] sm:$0xff] }
 0x3c7   : > { %v9621_v41 = vpop.f32.mrf.mxu1 }
 0x3c8   : > { %7707 = vst [vmem:[%s12987_s19 + $0x18] sm:$0xff] %v7675_v59  ;;  %v7673_v31 = vadd.f32 %v12976_v62, %v7634_v24  ;;  %v7639_v54 = vadd.f32 %v9621_v41, %v7333_v15  ;;  %v13054_v14 = vpop.f32.mrf.mxu0  ;;  %v7341_v15 = vadd.f32 %v13452_v56, %v7035_v5  ;;  %v13455_v59 = vld [vmem:[#allocation21_spill] sm:$0xff]  ;;  %v7036_v8 = vadd.f32 %v13457_v9, %v6729_v13  ;;  %v13472_v56 = vld [vmem:[#allocation3_spill] sm:$0xff] }
 0x3c9   : > { %v7522_v10 = vpop.f32.mrf.mxu1  ;;  %v6727_v24 = vadd.f32 %v13455_v59, %v13454_v47  ;;  %v13456_v41 = vld [vmem:[#allocation73_spill] sm:$0xff]  ;;  %v13474_v47 = vld [vmem:[#allocation60_spill] sm:$0xff] }
 0x3ca   : > { %7705 = vst [vmem:[%s12987_s19 + $0x8] sm:$0xff] %v7673_v31  ;;  %v7678_v1 = vadd.f32 %v12976_v62, %v7639_v54  ;;  %v7637_v26 = vadd.f32 %v7522_v10, %v7331_v17  ;;  %v7339_v17 = vadd.f32 %v13456_v41, %v7033_v46  ;;  %v13459_v10 = vld [vmem:[#allocation13_spill] sm:$0xff]  ;;  %v13068_v30 = vpop.f32.mrf.mxu0 }
 0x3cb   : > { %v9622_v23 = vpop.f32.mrf.mxu1  ;;  %v13476_v41 = vld [vmem:[#allocation17_spill] sm:$0xff] }
 0x3cc   : > { %7710 = vst [vmem:[%s12987_s19 + $0x30] sm:$0xff] %v7678_v1  ;;  %v7676_v29 = vadd.f32 %v12976_v62, %v7637_v26  ;;  %v7640_v3 = vadd.f32 %v9622_v23, %v7334_v49  ;;  %v6732_v49 = vadd.f32 %v13459_v10, %v13458_v25  ;;  %v13460_v26 = vld [vmem:[#allocation41_spill] sm:$0xff]  ;;  %v13461_v23 = vld [vmem:[#allocation59_spill] sm:$0xff]  ;;  %v9593_v6 = vpop.f32.mrf.mxu0  ;;  %v13478_v10 = vld [vmem:[#allocation6_spill] sm:$0xff] }
 0x3cd   : > { %v7525_v36 = vpop.f32.mrf.mxu1  ;;  %v7342_v53 = vadd.f32 %v13460_v26, %v7036_v8 }
 0x3ce   : > { %7708 = vst [vmem:[%s12987_s19 + $0x20] sm:$0xff] %v7676_v29  ;;  %v7679_v40 = vadd.f32 %v12976_v62, %v7640_v3  ;;  %v7638_v60 = vadd.f32 %v7525_v36, %v7332_v11  ;;  %v7034_v11 = vadd.f32 %v13461_v23, %v6727_v24  ;;  %v13462_v3 = vld [vmem:[#allocation19_spill] sm:$0xff]  ;;  %v7296_v46 = vpop.f32.mrf.mxu0 }
 0x3cf   : > { %v9625_v7 = vpop.f32.mrf.mxu1  ;;  %v6730_v36 = vadd.f32 %v13463_v34, %v13462_v3  ;;  %v13481_v3 = vld [vmem:[#allocation18_spill] sm:$0xff] }
 0x3d0   : > { %7711 = vst [vmem:[%s12987_s19 + $0x38] sm:$0xff] %v7679_v40  ;;  %v7677_v21 = vadd.f32 %v12976_v62, %v7638_v60  ;;  %v7643_v16 = vadd.f32 %v9625_v7, %v7337_v39  ;;  %v7340_v40 = vadd.f32 %v13464_v55, %v7034_v11  ;;  %v13465_v60 = vld [vmem:[#allocation36_spill] sm:$0xff]  ;;  %v9594_v26 = vpop.f32.mrf.mxu0  ;;  %v13480_v11 = vld [vmem:[#allocation62_spill] sm:$0xff] }
 0x3d1   : > { %v7538_v43 = vpop.f32.mrf.mxu1  ;;  %v7039_v51 = vadd.f32 %v13465_v60, %v6732_v49  ;;  %v13479_v49 = vld [vmem:[#allocation29_spill] sm:$0xff]  ;;  %v13482_v34 = vld [vmem:[#allocation54_spill] sm:$0xff] }
 0x3d2   : > { %7709 = vst [vmem:[%s12987_s19 + $0x28] sm:$0xff] %v7677_v21  ;;  %v7682_v18 = vadd.f32 %v12976_v62, %v7643_v16  ;;  %v7641_v33 = vadd.f32 %v7538_v43, %v7335_v42  ;;  %v13467_v21 = vld [vmem:[#allocation11_spill] sm:$0xff] }
 0x3d3   : > { %v9626_v63 = vpop.f32.mrf.mxu1  ;;  %v6733_v16 = vadd.f32 %v13467_v21, %v13466_v50  ;;  %v7299_v21 = vpop.f32.mrf.mxu0 }
 0x3d4   : > { %7714 = vst [vmem:[%s12987_s19 + $0x50] sm:$0xff] %v7682_v18  ;;  %v7680_v4 = vadd.f32 %v12976_v62, %v7641_v33  ;;  %v7644_v32 = vadd.f32 %v9626_v63, %v7338_v12  ;;  %v7345_v12 = vadd.f32 %v12966_v45, %v7039_v51  ;;  %v7037_v18 = vadd.f32 %v13468_v38, %v6730_v36  ;;  %v13469_v63 = vld [vmem:[#allocation26_spill] sm:$0xff] }
 0x3d5   : > { %v7541_v58 = vpop.f32.mrf.mxu1  ;;  %v7040_v13 = vadd.f32 %v13471_v52, %v6733_v16  ;;  %v6735_v36 = vadd.f32 %v13482_v34, %v13481_v3  ;;  %v13501_v34 = vld [vmem:[#allocation44_spill] sm:$0xff] }
 0x3d6   : > { %7712 = vst [vmem:[%s12987_s19 + $0x40] sm:$0xff] %v7680_v4  ;;  %v7683_v22 = vadd.f32 %v12976_v62, %v7644_v32  ;;  %v7642_v48 = vadd.f32 %v7541_v58, %v7336_v61  ;;  %v13470_v61 = vld [vmem:[#allocation8_spill] sm:$0xff]  ;;  %v7343_v32 = vadd.f32 %v12982_v57, %v7037_v18 }
 0x3d7   : > { %v9629_v37 = vpop.f32.mrf.mxu1  ;;  %v6731_v5 = vadd.f32 %v13470_v61, %v13469_v63 }
 0x3d8   : > { %7715 = vst [vmem:[%s12987_s19 + $0x58] sm:$0xff] %v7683_v22  ;;  %v7681_v31 = vadd.f32 %v12976_v62, %v7642_v48  ;;  %v7647_v54 = vadd.f32 %v9629_v37, %v7341_v15  ;;  %v13473_v15 = vld [vmem:[#allocation53_spill] sm:$0xff]  ;;  %v7346_v48 = vadd.f32 %v12998_v28, %v7040_v13  ;;  %v13475_v37 = vld [vmem:[#allocation4_spill] sm:$0xff]  ;;  %v13490_v13 = vld [vmem:[#allocation55_spill] sm:$0xff] }
 0x3d9   : > { %v7554_v1 = vpop.f32.mrf.mxu1  ;;  %v6736_v35 = vadd.f32 %v13473_v15, %v13472_v56  ;;  %v7038_v59 = vadd.f32 %v13474_v47, %v6731_v5  ;;  %v9597_v56 = vpop.f32.mrf.mxu0 }
 0x3da   : > { %7713 = vst [vmem:[%s12987_s19 + $0x48] sm:$0xff] %v7681_v31  ;;  %v7686_v2 = vadd.f32 %v12976_v62, %v7647_v54  ;;  %v7645_v29 = vadd.f32 %v7554_v1, %v7339_v17  ;;  %v6734_v17 = vadd.f32 %v13476_v41, %v13475_v37  ;;  %v13477_v31 = vld [vmem:[#allocation70_spill] sm:$0xff]  ;;  %v6737_v1 = vadd.f32 %v13479_v49, %v13478_v10 }
 0x3db   : > { %v9630_v39 = vpop.f32.mrf.mxu1  ;;  %v7344_v8 = vadd.f32 %v13012_v20, %v7038_v59  ;;  %v7043_v54 = vadd.f32 %v13477_v31, %v6736_v35  ;;  %v13493_v59 = vld [vmem:[#allocation24_spill] sm:$0xff] }
 0x3dc   : > { %7718 = vst [vmem:[%s12987_s19 + $0x70] sm:$0xff] %v7686_v2  ;;  %v7684_v7 = vadd.f32 %v12976_v62, %v7645_v29  ;;  %v7648_v42 = vadd.f32 %v9630_v39, %v7342_v53  ;;  %v7041_v2 = vadd.f32 %v13480_v11, %v6734_v17  ;;  %v13495_v17 = vld [vmem:[#allocation23_spill] sm:$0xff]  ;;  %v13499_v11 = vld [vmem:[#allocation58_spill] sm:$0xff] }
 0x3dd   : > { %v7557_v43 = vpop.f32.mrf.mxu1  ;;  %v7349_v23 = vadd.f32 %v13026_v44, %v7043_v54  ;;  %v13497_v54 = vld [vmem:[#allocation61_spill] sm:$0xff] }
 0x3de   : > { %7716 = vst [vmem:[%s12987_s19 + $0x60] sm:$0xff] %v7684_v7  ;;  %v7687_v33 = vadd.f32 %v12976_v62, %v7648_v42  ;;  %v7646_v27 = vadd.f32 %v7557_v43, %v7340_v40  ;;  %v7347_v55 = vadd.f32 %v13040_v19, %v7041_v2  ;;  %v13483_v40 = vld [vmem:[#allocation63_spill] sm:$0xff]  ;;  %v13484_v7 = vld [vmem:[#allocation52_spill] sm:$0xff]  ;;  %v13500_v2 = vld [vmem:[#allocation57_spill] sm:$0xff] }
 0x3df   : > { %v9633_v4 = vpop.f32.mrf.mxu1  ;;  %v7044_v60 = vadd.f32 %v13483_v40, %v6737_v1  ;;  %v13485_v42 = vld [vmem:[#allocation15_spill] sm:$0xff]  ;;  %v13498_v1 = vld [vmem:[#allocation33_spill] sm:$0xff]  ;;  %v13503_v40 = vld [vmem:[#allocation34_spill] sm:$0xff] }
 0x3e0   : > { %7719 = vst [vmem:[%s12987_s19 + $0x78] sm:$0xff] %v7687_v33  ;;  %v7685_v58 = vadd.f32 %v12976_v62, %v7646_v27  ;;  %v7651_v45 = vadd.f32 %v9633_v4, %v7345_v12  ;;  %v6740_v50 = vadd.f32 %v13485_v42, %v13484_v7  ;;  %v13486_v12 = vld [vmem:[#allocation39_spill] sm:$0xff]  ;;  %v13487_v33 = vld [vmem:[#allocation9_spill] sm:$0xff]  ;;  %v13488_v27 = vld [vmem:[#allocation20_spill] sm:$0xff] }
 0x3e1   : > { %v7570_v22 = vpop.f32.mrf.mxu1  ;;  %v7350_v43 = vadd.f32 %v13054_v14, %v7044_v60  ;;  %v7042_v38 = vadd.f32 %v13486_v12, %v6735_v36  ;;  %v6738_v63 = vadd.f32 %v13488_v27, %v13487_v33  ;;  %v13489_v4 = vld [vmem:[#allocation31_spill] sm:$0xff]  ;;  %v13506_v12 = vld [vmem:[#allocation22_spill] sm:$0xff] }
 0x3e2   : > { %7717 = vst [vmem:[%s12987_s19 + $0x68] sm:$0xff] %v7685_v58  ;;  %v7690_v57 = vadd.f32 %v12976_v62, %v7651_v45  ;;  %v7649_v24 = vadd.f32 %v7570_v22, %v7343_v32  ;;  %v7047_v32 = vadd.f32 %v13489_v4, %v6740_v50  ;;  %v13491_v58 = vld [vmem:[#allocation56_spill] sm:$0xff]  ;;  %v13492_v22 = vld [vmem:[#allocation65_spill] sm:$0xff]  ;;  %v13504_v7 = vld [vmem:[#allocation79_spill] sm:$0xff] }
 0x3e3   : > { %v9634_v9 = vpop.f32.mrf.mxu1  ;;  %v7348_v5 = vadd.f32 %v13068_v30, %v7042_v38  ;;  %v6741_v45 = vadd.f32 %v13491_v58, %v13490_v13  ;;  %v13507_v4 = vld [vmem:[#allocation66_spill] sm:$0xff] }
 0x3e4   : > { %7722 = vst [vmem:[%s12987_s19 + $0x90] sm:$0xff] %v7690_v57  ;;  %v7688_v25 = vadd.f32 %v12976_v62, %v7649_v24  ;;  %v7652_v28 = vadd.f32 %v9634_v9, %v7346_v48  ;;  %v7353_v35 = vadd.f32 %v9593_v6, %v7047_v32  ;;  %v7045_v48 = vadd.f32 %v13492_v22, %v6738_v63  ;;  %v13494_v57 = vld [vmem:[#allocation32_spill] sm:$0xff] }
 0x3e5   : > { %v7573_v53 = vpop.f32.mrf.mxu1  ;;  %v6739_v24 = vadd.f32 %v13494_v57, %v13493_v59  ;;  %v7048_v9 = vadd.f32 %v13495_v17, %v6741_v45  ;;  %v13496_v6 = vld [vmem:[#allocation28_spill] sm:$0xff] }
 0x3e6   : > { %7720 = vst [vmem:[%s12987_s19 + $0x80] sm:$0xff] %v7688_v25  ;;  %v7691_v20 = vadd.f32 %v12976_v62, %v7652_v28  ;;  %v7650_v29 = vadd.f32 %v7573_v53, %v7344_v8  ;;  %v7351_v41 = vadd.f32 %v7296_v46, %v7045_v48  ;;  %v6744_v25 = vadd.f32 %v13497_v54, %v13496_v6  ;;  %v7312_v28 = vpop.f32.mrf.mxu0 }
 0x3e7   : > { %v9637_v39 = vpop.f32.mrf.mxu1  ;;  %v7354_v49 = vadd.f32 %v9594_v26, %v7048_v9  ;;  %v7046_v53 = vadd.f32 %v13498_v1, %v6739_v24  ;;  %v13502_v26 = vld [vmem:[#allocation14_spill] sm:$0xff] }
 0x3e8   : > { %7723 = vst [vmem:[%s12987_s19 + $0x98] sm:$0xff] %v7691_v20  ;;  %v7689_v51 = vadd.f32 %v12976_v62, %v7650_v29  ;;  %v7655_v44 = vadd.f32 %v9637_v39, %v7349_v23  ;;  %v6742_v20 = vadd.f32 %v13500_v2, %v13499_v11  ;;  %v7051_v36 = vadd.f32 %v13501_v34, %v6744_v25 }
 0x3e9   : > { %v7586_v16 = vpop.f32.mrf.mxu1  ;;  %v7352_v3 = vadd.f32 %v7299_v21, %v7046_v53  ;;  %v6745_v60 = vadd.f32 %v13503_v40, %v13502_v26 }
 0x3ea   : > { %7721 = vst [vmem:[%s12987_s19 + $0x88] sm:$0xff] %v7689_v51  ;;  %v7694_v19 = vadd.f32 %v12976_v62, %v7655_v44  ;;  %v7653_v18 = vadd.f32 %v7586_v16, %v7347_v55  ;;  %v9598_v51 = vpop.f32.mrf.mxu0  ;;  %v7049_v42 = vadd.f32 %v13504_v7, %v6742_v20  ;;  %v7357_v50 = vadd.f32 %v9597_v56, %v7051_v36 }
 0x3eb   : > { %v9638_v61 = vpop.f32.mrf.mxu1 }
 0x3ec   : > { %7726 = vst [vmem:[%s12987_s19 + $0xb0] sm:$0xff] %v7694_v19  ;;  %v7692_v52 = vadd.f32 %v12976_v62, %v7653_v18  ;;  %v7656_v14 = vadd.f32 %v9638_v61, %v7350_v43  ;;  %v13505_v43 = vld [vmem:[#allocation16_spill] sm:$0xff]  ;;  %v7052_v18 = vadd.f32 %v12962_v0, %v6745_v60  ;;  %v7355_v33 = vadd.f32 %v7312_v28, %v7049_v42  ;;  %v7315_v61 = vpop.f32.mrf.mxu0 }
 0x3ed   : > { %v7589_v15 = vpop.f32.mrf.mxu1  ;;  %v6743_v38 = vadd.f32 %v13506_v12, %v13505_v43 }
 0x3ee   : > { %7724 = vst [vmem:[%s12987_s19 + $0xa0] sm:$0xff] %v7692_v52  ;;  %v7695_v47 = vadd.f32 %v12976_v62, %v7656_v14  ;;  %v7654_v30 = vadd.f32 %v7589_v15, %v7348_v5  ;;  %v7358_v52 = vadd.f32 %v9598_v51, %v7052_v18 }
 0x3ef   : > { %v9641_v37 = vpop.f32.mrf.mxu1  ;;  %v7050_v32 = vadd.f32 %v13507_v4, %v6743_v38 }
 0x3f0   : > { %7727 = vst [vmem:[%s12987_s19 + $0xb8] sm:$0xff] %v7695_v47  ;;  %v7693_v8 = vadd.f32 %v12976_v62, %v7654_v30  ;;  %v7659_v31 = vadd.f32 %v9641_v37, %v7353_v35 }
 0x3f1   : > { %v7602_v10 = vpop.f32.mrf.mxu1  ;;  %v7356_v45 = vadd.f32 %v7315_v61, %v7050_v32 }
 0x3f2   : > { %7725 = vst [vmem:[%s12987_s19 + $0xa8] sm:$0xff] %v7693_v8  ;;  %v7698_v23 = vadd.f32 %v12976_v62, %v7659_v31  ;;  %v7657_v46 = vadd.f32 %v7602_v10, %v7351_v41 }
 0x3f3   : > { %v9642_v29 = vpop.f32.mrf.mxu1 }
 0x3f4   : > { %7730 = vst [vmem:[%s12987_s19 + $0xd0] sm:$0xff] %v7698_v23  ;;  %v7696_v39 = vadd.f32 %v12976_v62, %v7657_v46  ;;  %v7660_v55 = vadd.f32 %v9642_v29, %v7354_v49 }
 0x3f5   : > { %v7605_v44 = vpop.f32.mrf.mxu1 }
 0x3f6   : > { %7728 = vst [vmem:[%s12987_s19 + $0xc0] sm:$0xff] %v7696_v39  ;;  %v7699_v16 = vadd.f32 %v12976_v62, %v7660_v55  ;;  %v7658_v21 = vadd.f32 %v7605_v44, %v7352_v3 }
 0x3f7   : > { %v9645_v19 = vpop.f32.mrf.mxu1 }
 0x3f8   : > { %7731 = vst [vmem:[%s12987_s19 + $0xd8] sm:$0xff] %v7699_v16  ;;  %v7697_v27 = vadd.f32 %v12976_v62, %v7658_v21  ;;  %v7663_v63 = vadd.f32 %v9645_v19, %v7357_v50 }
 0x3f9   : > { %v7618_v5 = vpop.f32.mrf.mxu1 }
 0x3fa   : > { %7729 = vst [vmem:[%s12987_s19 + $0xc8] sm:$0xff] %v7697_v27  ;;  %v7702_v14 = vadd.f32 %v12976_v62, %v7663_v63  ;;  %v7661_v13 = vadd.f32 %v7618_v5, %v7355_v33 }
 0x3fb   : > { %v9646_v58 = vpop.f32.mrf.mxu1 }
 0x3fc   : > { %7734 = vst [vmem:[%s12987_s19 + $0xf0] sm:$0xff] %v7702_v14  ;;  %v7700_v0 = vadd.f32 %v12976_v62, %v7661_v13  ;;  %v7664_v56 = vadd.f32 %v9646_v58, %v7358_v52 }
 0x3fd   : > { %v7621_v15 = vpop.f32.mrf.mxu1 }
 0x3fe   : > { %7732 = vst [vmem:[%s12987_s19 + $0xe0] sm:$0xff] %v7700_v0  ;;  %v7703_v35 = vadd.f32 %v12976_v62, %v7664_v56  ;;  %v7662_v22 = vadd.f32 %v7621_v15, %v7356_v45 }
 0x400   : > { %7735 = vst [vmem:[%s12987_s19 + $0xf8] sm:$0xff] %v7703_v35  ;;  %v7701_v48 = vadd.f32 %v12976_v62, %v7662_v22 }
 0x402   : > { %7733 = vst [vmem:[%s12987_s19 + $0xe8] sm:$0xff] %v7701_v48 }
 0x403 PF: > { %s15_s18 = sadd.s32 1, %s9801_s18  }
 0x404   : > { %p12_p4 = scmp.ge.s32.totalorder %s15_s18, 4  }
 0x406   :  { %14 = sbr.rel (!%p12_p4) target bundleno = 1 (0x1), region = 90 }

</bundles_post_ra>
